<compile_context>
chip_gen: v5e
topology: v5e:2x2
jax: 0.10.0
libtpu: 0.0.40
codegen_flags: <defaults>
</compile_context>

<pallas_src>
import math

import jax
import jax.numpy as jnp
from jax.experimental import pallas as pl
from jax.experimental.pallas import tpu as pltpu


def _round_up(x, m):
    return ((x + m - 1) // m) * m


# ----------------------------------------------------------------------------
# Fused kernel: per grid step, TB timesteps of
#   GCN:  relu(A_t @ (X_t @ W0)) -> relu(A_t @ (. @ W1))        (batched)
#   LSTM: stacked layers, h/c carried in VMEM scratch           (sequential)
# ----------------------------------------------------------------------------
def _make_fused_kernel(num_lstm_layers, block_t, seq_len):
    L = num_lstm_layers
    TB = block_t
    T = seq_len
    needs_mask = (T % TB) != 0   # tail timesteps of the last block are padding

    def kernel(*refs):
        a_ref, x_ref, w0_ref, w1_ref = refs[0:4]
        lstm_refs = refs[4:4 + 3 * L]          # (W_x, W_h, b) per layer
        out_ref = refs[4 + 3 * L]              # [N, Hp] f32
        scratch = refs[5 + 3 * L:]             # h0,c0,h1,c1,... each [N,Hp] f32

        _, N, Fin = x_ref.shape
        F1 = w0_ref.shape[1]
        F2p = w1_ref.shape[1]
        Hp = scratch[0].shape[-1]

        step = pl.program_id(0)

        @pl.when(step == 0)
        def _init():
            for sc in scratch:
                sc[...] = jnp.zeros_like(sc)

        # Inputs for this block of TB timesteps; cast to bf16 in-kernel.
        A = a_ref[...].astype(jnp.bfloat16)                 # (TB, N, N)
        X = x_ref[...].astype(jnp.bfloat16)                 # (TB, N, Fin)

        # ---- GCN layer 0: relu(A_t @ (X_t @ W0)), batched over TB steps ----
        xw0 = jnp.dot(X.reshape(TB * N, Fin), w0_ref[...],
                      preferred_element_type=jnp.float32)    # (TB*N, F1)
        h1 = jnp.einsum('tij,tjk->tik', A,
                        xw0.reshape(TB, N, F1).astype(jnp.bfloat16),
                        preferred_element_type=jnp.float32)
        h1 = jnp.maximum(h1, 0.0)

        # ---- GCN layer 1: relu(A_t @ (h_t @ W1)) ----
        hw1 = jnp.dot(h1.reshape(TB * N, F1).astype(jnp.bfloat16), w1_ref[...],
                      preferred_element_type=jnp.float32)    # (TB*N, F2p)
        h2 = jnp.einsum('tij,tjk->tik', A,
                        hw1.reshape(TB, N, F2p).astype(jnp.bfloat16),
                        preferred_element_type=jnp.float32)
        x2 = jnp.maximum(h2, 0.0)                            # (TB, N, F2p) f32

        # ---- hoisted LSTM layer-0 input projection over all TB timesteps ----
        wx0_ref, b0_ref = lstm_refs[0], lstm_refs[2]
        gx0 = jnp.dot(x2.reshape(TB * N, F2p).astype(jnp.bfloat16),
                      wx0_ref[...],
                      preferred_element_type=jnp.float32) + b0_ref[...]
        # gx0: (TB*N, 4*Hp) f32, padded gate columns are exactly 0.

        # ---- sequential LSTM recurrence over the TB timesteps ----
        for tt in range(TB):
            x = None
            new_states = []
            for l in range(L):
                wx_ref, wh_ref, b_ref = lstm_refs[3 * l:3 * l + 3]
                h_sc, c_sc = scratch[2 * l], scratch[2 * l + 1]

                if l == 0:
                    gates = gx0[tt * N:(tt + 1) * N, :]
                else:
                    gates = jnp.dot(x.astype(jnp.bfloat16), wx_ref[...],
                                    preferred_element_type=jnp.float32)
                    gates = gates + b_ref[...]
                # Recurrent half (K=Hp) is the only dot on the critical path.
                gates = gates + jnp.dot(h_sc[...].astype(jnp.bfloat16),
                                        wh_ref[...],
                                        preferred_element_type=jnp.float32)

                # Gate blocks are Hp(=128)-wide -> lane-aligned static slices.
                i_g = jax.nn.sigmoid(gates[:, 0 * Hp:1 * Hp])
                f_g = jax.nn.sigmoid(gates[:, 1 * Hp:2 * Hp])
                g_g = jnp.tanh(gates[:, 2 * Hp:3 * Hp])
                o_g = jax.nn.sigmoid(gates[:, 3 * Hp:4 * Hp])

                c_new = f_g * c_sc[...] + i_g * g_g
                h_new = o_g * jnp.tanh(c_new)
                new_states.append((h_new, c_new))
                x = h_new                       # feeds next stacked layer

            def _commit(new_states=new_states):
                for l in range(L):
                    scratch[2 * l][...] = new_states[l][0]
                    scratch[2 * l + 1][...] = new_states[l][1]

            if needs_mask:
                # Skip state update for zero-padded tail timesteps.
                pl.when(step * TB + tt < T)(_commit)
            else:
                _commit()

        @pl.when(step == pl.num_programs(0) - 1)
        def _write():
            out_ref[...] = scratch[2 * (L - 1)][...]   # last valid h, top layer

    return kernel


# ----------------------------------------------------------------------------
# Wrapper: Sp_GCN_LSTM_A.forward  ->  out[-1]  ([N, lstm_l2_feats])
# ----------------------------------------------------------------------------
def sp_gcn_lstm_a_forward(A_seq, X_seq, params, block_t=8):
    T, N, _ = A_seq.shape
    Fin = X_seq.shape[-1]

    W0 = params["gcn_w0"]            # [Fin, F1] bf16
    W1p = params["gcn_w1_pad"]       # [F1, F2p] bf16 (zero-padded cols)
    lstm = params["lstm"]            # list of (W_x bf16, W_h bf16, b f32)
    H = params["lstm_hidden"]
    L = len(lstm)
    F1 = W0.shape[1]
    F2p = W1p.shape[1]
    Hp = lstm[0][1].shape[0]         # W_h: [Hp, 4*Hp]

    TB = min(block_t, T)
    T_pad = _round_up(T, TB)
    if T_pad != T:
        pad = T_pad - T
        A_seq = jnp.pad(A_seq, ((0, pad), (0, 0), (0, 0)))
        X_seq = jnp.pad(X_seq, ((0, pad), (0, 0), (0, 0)))

    in_specs = [
        pl.BlockSpec((TB, N, N), lambda s: (s, 0, 0)),      # A (f32, cast in kernel)
        pl.BlockSpec((TB, N, Fin), lambda s: (s, 0, 0)),    # X (f32, cast in kernel)
        pl.BlockSpec((Fin, F1), lambda s: (0, 0)),          # W0
        pl.BlockSpec((F1, F2p), lambda s: (0, 0)),          # W1 (padded)
    ]
    flat_lstm = []
    for (Wx, Wh, b) in lstm:
        in_specs.append(pl.BlockSpec(Wx.shape, lambda s: (0, 0)))
        in_specs.append(pl.BlockSpec(Wh.shape, lambda s: (0, 0)))
        in_specs.append(pl.BlockSpec(b.shape, lambda s: (0, 0)))
        flat_lstm += [Wx, Wh, b]

    out_padded = pl.pallas_call(
        _make_fused_kernel(L, TB, T),
        out_shape=jax.ShapeDtypeStruct((N, Hp), jnp.float32),
        grid_spec=pltpu.PrefetchScalarGridSpec(
            num_scalar_prefetch=0,
            grid=(T_pad // TB,),
            in_specs=in_specs,
            out_specs=pl.BlockSpec((N, Hp), lambda s: (0, 0)),
            scratch_shapes=[pltpu.VMEM((N, Hp), jnp.float32)] * (2 * L),
        ),
        compiler_params=pltpu.CompilerParams(
            # Must stay sequential: h/c scratch carry + resident output.
            dimension_semantics=("arbitrary",)),
    )(A_seq, X_seq, W0, W1p, *flat_lstm)

    return out_padded[:, :H]                                # drop lane padding


# ----------------------------------------------------------------------------
# Parameter construction (PyTorch-style init, packed/padded for the kernel)
# ----------------------------------------------------------------------------
def _pack_lstm_layer(W_ih, W_hh, b_ih, b_hh, in_pad, Hp):
    """PyTorch layout (W_ih [4H,In], W_hh [4H,H], b [4H]) -> split padded
    weights W_x [in_pad,4Hp], W_h [Hp,4Hp] (bf16) and folded bias [1,4Hp]
    (f32).  Padded rows/cols are zero so the padded hidden state stays 0."""
    H = W_hh.shape[1]
    In = W_ih.shape[1]
    Wx = jnp.zeros((in_pad, 4 * Hp), jnp.float32)
    Wh = jnp.zeros((Hp, 4 * Hp), jnp.float32)
    b = jnp.zeros((1, 4 * Hp), jnp.float32)
    for g in range(4):                                   # gate order: i, f, g, o
        Wx = Wx.at[:In, g * Hp:g * Hp + H].set(W_ih[g * H:(g + 1) * H, :].T)
        Wh = Wh.at[:H, g * Hp:g * Hp + H].set(W_hh[g * H:(g + 1) * H, :].T)
        b = b.at[0, g * Hp:g * Hp + H].set(
            b_ih[g * H:(g + 1) * H] + b_hh[g * H:(g + 1) * H])
    return Wx.astype(jnp.bfloat16), Wh.astype(jnp.bfloat16), b


def make_params(key, feats_per_node, hidden_feats, lstm_feats, lstm_layers,
                lane=128):
    F1, F2 = hidden_feats
    F2p = _round_up(F2, lane)
    Hp = _round_up(lstm_feats, lane)
    H = lstm_feats

    keys = jax.random.split(key, 2 + 4 * lstm_layers)

    # GCN weights: u.reset_param -> uniform(-stdv, stdv), stdv = 1/sqrt(fan_out)
    stdv0 = 1.0 / math.sqrt(F1)
    W0 = jax.random.uniform(keys[0], (feats_per_node, F1), jnp.float32,
                            minval=-stdv0, maxval=stdv0)
    stdv1 = 1.0 / math.sqrt(F2)
    W1 = jax.random.uniform(keys[1], (F1, F2), jnp.float32,
                            minval=-stdv1, maxval=stdv1)
    W1_pad = jnp.zeros((F1, F2p), jnp.float32).at[:, :F2].set(W1)

    # LSTM weights: uniform(-1/sqrt(H), 1/sqrt(H)), PyTorch layout then packed.
    lstm_packed, lstm_raw = [], []
    stdv = 1.0 / math.sqrt(H)
    for layer in range(lstm_layers):
        in_sz = F2 if layer == 0 else H
        in_pad = F2p if layer == 0 else Hp
        k0, k1, k2, k3 = keys[2 + 4 * layer: 6 + 4 * layer]
        W_ih = jax.random.uniform(k0, (4 * H, in_sz), jnp.float32,
                                  minval=-stdv, maxval=stdv)
        W_hh = jax.random.uniform(k1, (4 * H, H), jnp.float32,
                                  minval=-stdv, maxval=stdv)
        b_ih = jax.random.uniform(k2, (4 * H,), jnp.float32,
                                  minval=-stdv, maxval=stdv)
        b_hh = jax.random.uniform(k3, (4 * H,), jnp.float32,
                                  minval=-stdv, maxval=stdv)
        lstm_packed.append(_pack_lstm_layer(W_ih, W_hh, b_ih, b_hh, in_pad, Hp))
        lstm_raw.append((W_ih, W_hh, b_ih, b_hh))

    packed = {
        "gcn_w0": W0.astype(jnp.bfloat16),
        "gcn_w1_pad": W1_pad.astype(jnp.bfloat16),
        "lstm": lstm_packed,
        "lstm_hidden": H,
    }
    raw = {"W0": W0, "W1": W1, "lstm_raw": lstm_raw, "H": H}
    return packed, raw


# ----------------------------------------------------------------------------
# Pure-JAX f32 reference of the PyTorch module (for correctness check)
# ----------------------------------------------------------------------------
def _reference_forward(A_seq, X_seq, raw):
    W0, W1, H = raw["W0"], raw["W1"], raw["H"]
    T, N = A_seq.shape[0], A_seq.shape[1]
    seq = []
    for t in range(T):
        h = jax.nn.relu(A_seq[t] @ (X_seq[t] @ W0))
        h = jax.nn.relu(A_seq[t] @ (h @ W1))
        seq.append(h)
    x_seq = jnp.stack(seq)                       # (T, N, F2)
    for (W_ih, W_hh, b_ih, b_hh) in raw["lstm_raw"]:
        h = jnp.zeros((N, H), jnp.float32)
        c = jnp.zeros((N, H), jnp.float32)
        hs = []
        for t in range(x_seq.shape[0]):
            g = x_seq[t] @ W_ih.T + h @ W_hh.T + b_ih + b_hh
            i_g = jax.nn.sigmoid(g[:, 0 * H:1 * H])
            f_g = jax.nn.sigmoid(g[:, 1 * H:2 * H])
            g_g = jnp.tanh(g[:, 2 * H:3 * H])
            o_g = jax.nn.sigmoid(g[:, 3 * H:4 * H])
            c = f_g * c + i_g * g_g
            h = o_g * jnp.tanh(c)
            hs.append(h)
        x_seq = jnp.stack(hs)
    return x_seq[-1]


if __name__ == "__main__":
    # args: feats_per_node=8, hidden_feats=[16,16] (num_hidden_layers=2),
    #       layer_2_feats=16, lstm_l2_feats=32, lstm_l2_layers=2
    T, N = 6, 16
    feats_per_node = 8
    hidden_feats = [16, 16]
    lstm_l2_feats = 32
    lstm_l2_layers = 2

    key = jax.random.PRNGKey(0)
    k_a, k_x, k_p = jax.random.split(key, 3)

    # A_list: T row-normalized adjacency-like matrices; Nodes_list: T feature mats
    A_seq = jax.random.uniform(k_a, (T, N, N), jnp.float32)
    A_seq = A_seq / jnp.sum(A_seq, axis=-1, keepdims=True)
    X_seq = jax.random.normal(k_x, (T, N, feats_per_node), jnp.float32)

    params, raw = make_params(k_p, feats_per_node, hidden_feats,
                              lstm_l2_feats, lstm_l2_layers)

    # block_t=4: exercises both the time-blocked recurrence carry across grid
    # steps (grid=(2,)) and the masked tail (T=6 -> 2 padded timesteps).
    out = sp_gcn_lstm_a_forward(A_seq, X_seq, params, block_t=4)
    out = jax.block_until_ready(out)
    assert out.shape == (N, lstm_l2_feats), out.shape

    ref = _reference_forward(A_seq, X_seq, raw)
    assert jnp.allclose(out, ref, rtol=2e-2, atol=2e-2), (
        "max abs diff = %f" % float(jnp.max(jnp.abs(out - ref))))

    print("KERNEL_OK")
</pallas_src>

<mosaic_0001>
module attributes {stable_mosaic.version = 11 : i64} {
  func.func @kernel(%arg0: i32, %arg1: memref<4x16x16xf32, #tpu.memory_space<vmem>>, %arg2: memref<4x16x8xf32, #tpu.memory_space<vmem>>, %arg3: memref<8x16xbf16, #tpu.memory_space<vmem>>, %arg4: memref<16x128xbf16, #tpu.memory_space<vmem>>, %arg5: memref<128x512xbf16, #tpu.memory_space<vmem>>, %arg6: memref<128x512xbf16, #tpu.memory_space<vmem>>, %arg7: memref<1x512xf32, #tpu.memory_space<vmem>>, %arg8: memref<128x512xbf16, #tpu.memory_space<vmem>>, %arg9: memref<128x512xbf16, #tpu.memory_space<vmem>>, %arg10: memref<1x512xf32, #tpu.memory_space<vmem>>, %arg11: memref<16x128xf32, #tpu.memory_space<vmem>>, %arg12: memref<16x128xf32, #tpu.memory_space<vmem>>, %arg13: memref<16x128xf32, #tpu.memory_space<vmem>>, %arg14: memref<16x128xf32, #tpu.memory_space<vmem>>, %arg15: memref<16x128xf32, #tpu.memory_space<vmem>>) attributes {dimension_semantics = [#tpu.dimension_semantics<arbitrary>], iteration_bounds = array<i64: 2>, scalar_prefetch = 0 : i64, scratch_operands = 4 : i64, tpu.core_type = #tpu.core_type<tc>, window_params = [{transform_indices = @transform_0, window_bounds = array<i64: 4, 16, 16>}, {transform_indices = @transform_1, window_bounds = array<i64: 4, 16, 8>}, {pipeline_mode = #tpu.pipeline_mode<synchronous>, transform_indices = @transform_2, window_bounds = array<i64: 8, 16>}, {pipeline_mode = #tpu.pipeline_mode<synchronous>, transform_indices = @transform_3, window_bounds = array<i64: 16, 128>}, {pipeline_mode = #tpu.pipeline_mode<synchronous>, transform_indices = @transform_4, window_bounds = array<i64: 128, 512>}, {pipeline_mode = #tpu.pipeline_mode<synchronous>, transform_indices = @transform_5, window_bounds = array<i64: 128, 512>}, {pipeline_mode = #tpu.pipeline_mode<synchronous>, transform_indices = @transform_6, window_bounds = array<i64: 1, 512>}, {pipeline_mode = #tpu.pipeline_mode<synchronous>, transform_indices = @transform_7, window_bounds = array<i64: 128, 512>}, {pipeline_mode = #tpu.pipeline_mode<synchronous>, transform_indices = @transform_8, window_bounds = array<i64: 128, 512>}, {pipeline_mode = #tpu.pipeline_mode<synchronous>, transform_indices = @transform_9, window_bounds = array<i64: 1, 512>}, {pipeline_mode = #tpu.pipeline_mode<synchronous>, transform_indices = @transform_10, window_bounds = array<i64: 16, 128>}]} {
    %c0_i32 = arith.constant 0 : i32
    %0 = arith.cmpi eq, %arg0, %c0_i32 : i32
    %1 = arith.extui %0 : i1 to i32
    %c0_i32_0 = arith.constant 0 : i32
    %2 = arith.cmpi ne, %1, %c0_i32_0 : i32
    scf.if %2 {
      %cst_133 = arith.constant 0.000000e+00 : f32
      %330 = vector.broadcast %cst_133 : f32 to vector<16x128xf32>
      %c0_134 = arith.constant 0 : index
      %c0_135 = arith.constant 0 : index
      %331 = vector.load %arg12[%c0_134, %c0_135] : memref<16x128xf32, #tpu.memory_space<vmem>>, vector<16x128xf32>
      tpu.vector_store %arg12[%c0_134, %c0_135], %330 {strides = array<i32>} : memref<16x128xf32, #tpu.memory_space<vmem>>, vector<16x128xf32>,
      %cst_136 = arith.constant 0.000000e+00 : f32
      %332 = vector.broadcast %cst_136 : f32 to vector<16x128xf32>
      %c0_137 = arith.constant 0 : index
      %c0_138 = arith.constant 0 : index
      %333 = vector.load %arg13[%c0_137, %c0_138] : memref<16x128xf32, #tpu.memory_space<vmem>>, vector<16x128xf32>
      tpu.vector_store %arg13[%c0_137, %c0_138], %332 {strides = array<i32>} : memref<16x128xf32, #tpu.memory_space<vmem>>, vector<16x128xf32>,
      %cst_139 = arith.constant 0.000000e+00 : f32
      %334 = vector.broadcast %cst_139 : f32 to vector<16x128xf32>
      %c0_140 = arith.constant 0 : index
      %c0_141 = arith.constant 0 : index
      %335 = vector.load %arg14[%c0_140, %c0_141] : memref<16x128xf32, #tpu.memory_space<vmem>>, vector<16x128xf32>
      tpu.vector_store %arg14[%c0_140, %c0_141], %334 {strides = array<i32>} : memref<16x128xf32, #tpu.memory_space<vmem>>, vector<16x128xf32>,
      %cst_142 = arith.constant 0.000000e+00 : f32
      %336 = vector.broadcast %cst_142 : f32 to vector<16x128xf32>
      %c0_143 = arith.constant 0 : index
      %c0_144 = arith.constant 0 : index
      %337 = vector.load %arg15[%c0_143, %c0_144] : memref<16x128xf32, #tpu.memory_space<vmem>>, vector<16x128xf32>
      tpu.vector_store %arg15[%c0_143, %c0_144], %336 {strides = array<i32>} : memref<16x128xf32, #tpu.memory_space<vmem>>, vector<16x128xf32>,
    } else {
    }
    %c0 = arith.constant 0 : index
    %c0_1 = arith.constant 0 : index
    %c0_2 = arith.constant 0 : index
    %3 = vector.load %arg1[%c0, %c0_1, %c0_2] : memref<4x16x16xf32, #tpu.memory_space<vmem>>, vector<4x16x16xf32>
    %4 = arith.truncf %3 : vector<4x16x16xf32> to vector<4x16x16xbf16>
    %c0_3 = arith.constant 0 : index
    %c0_4 = arith.constant 0 : index
    %c0_5 = arith.constant 0 : index
    %5 = vector.load %arg2[%c0_3, %c0_4, %c0_5] : memref<4x16x8xf32, #tpu.memory_space<vmem>>, vector<4x16x8xf32>
    %6 = arith.truncf %5 : vector<4x16x8xf32> to vector<4x16x8xbf16>
    %7 = vector.shape_cast %6 : vector<4x16x8xbf16> to vector<64x8xbf16>
    %c0_6 = arith.constant 0 : index
    %c0_7 = arith.constant 0 : index
    %8 = vector.load %arg3[%c0_6, %c0_7] : memref<8x16xbf16, #tpu.memory_space<vmem>>, vector<8x16xbf16>
    %cst = arith.constant dense<0.000000e+00> : vector<64x16xf32>
    %9 = tpu.matmul %7, %8, %cst {dimension_numbers = #tpu.dot_dimension_numbers<[1], [0], [0], [1], [0, 0, 1, 1], [], []>} : vector<64x8xbf16>, vector<8x16xbf16>, vector<64x16xf32> -> vector<64x16xf32>
    %10 = vector.shape_cast %9 : vector<64x16xf32> to vector<4x16x16xf32>
    %11 = arith.truncf %10 : vector<4x16x16xf32> to vector<4x16x16xbf16>
    "tpu.trace_start"() <{level = 10 : i32, message = "tij,tjk->tik"}> : () -> ()
    %cst_8 = arith.constant dense<0.000000e+00> : vector<4x16x16xf32>
    %12 = tpu.matmul %4, %11, %cst_8 {dimension_numbers = #tpu.dot_dimension_numbers<[2], [1], [1], [2], [0, 0, 0, 1, 1, 2], [0], [0]>} : vector<4x16x16xbf16>, vector<4x16x16xbf16>, vector<4x16x16xf32> -> vector<4x16x16xf32>
    "tpu.trace_stop"() : () -> ()
    %cst_9 = arith.constant 0.000000e+00 : f32
    %13 = vector.broadcast %cst_9 : f32 to vector<4x16x16xf32>
    %14 = arith.maximumf %12, %13 : vector<4x16x16xf32>
    %15 = vector.shape_cast %14 : vector<4x16x16xf32> to vector<64x16xf32>
    %16 = arith.truncf %15 : vector<64x16xf32> to vector<64x16xbf16>
    %c0_10 = arith.constant 0 : index
    %c0_11 = arith.constant 0 : index
    %17 = vector.load %arg4[%c0_10, %c0_11] : memref<16x128xbf16, #tpu.memory_space<vmem>>, vector<16x128xbf16>
    %cst_12 = arith.constant dense<0.000000e+00> : vector<64x128xf32>
    %18 = tpu.matmul %16, %17, %cst_12 {dimension_numbers = #tpu.dot_dimension_numbers<[1], [0], [0], [1], [0, 0, 1, 1], [], []>} : vector<64x16xbf16>, vector<16x128xbf16>, vector<64x128xf32> -> vector<64x128xf32>
    %19 = vector.shape_cast %18 : vector<64x128xf32> to vector<4x16x128xf32>
    %20 = arith.truncf %19 : vector<4x16x128xf32> to vector<4x16x128xbf16>
    "tpu.trace_start"() <{level = 10 : i32, message = "tij,tjk->tik"}> : () -> ()
    %cst_13 = arith.constant dense<0.000000e+00> : vector<4x16x128xf32>
    %21 = tpu.matmul %4, %20, %cst_13 {dimension_numbers = #tpu.dot_dimension_numbers<[2], [1], [1], [2], [0, 0, 0, 1, 1, 2], [0], [0]>} : vector<4x16x16xbf16>, vector<4x16x128xbf16>, vector<4x16x128xf32> -> vector<4x16x128xf32>
    "tpu.trace_stop"() : () -> ()
    %cst_14 = arith.constant 0.000000e+00 : f32
    %22 = vector.broadcast %cst_14 : f32 to vector<4x16x128xf32>
    %23 = arith.maximumf %21, %22 : vector<4x16x128xf32>
    %24 = vector.shape_cast %23 : vector<4x16x128xf32> to vector<64x128xf32>
    %25 = arith.truncf %24 : vector<64x128xf32> to vector<64x128xbf16>
    %c0_15 = arith.constant 0 : index
    %c0_16 = arith.constant 0 : index
    %26 = vector.load %arg5[%c0_15, %c0_16] : memref<128x512xbf16, #tpu.memory_space<vmem>>, vector<128x512xbf16>
    %cst_17 = arith.constant dense<0.000000e+00> : vector<64x512xf32>
    %27 = tpu.matmul %25, %26, %cst_17 {dimension_numbers = #tpu.dot_dimension_numbers<[1], [0], [0], [1], [0, 0, 1, 1], [], []>} : vector<64x128xbf16>, vector<128x512xbf16>, vector<64x512xf32> -> vector<64x512xf32>
    %c0_18 = arith.constant 0 : index
    %c0_19 = arith.constant 0 : index
    %28 = vector.load %arg7[%c0_18, %c0_19] : memref<1x512xf32, #tpu.memory_space<vmem>>, vector<1x512xf32>
    %29 = vector.broadcast %28 : vector<1x512xf32> to vector<64x512xf32>
    %30 = arith.addf %27, %29 : vector<64x512xf32>
    %31 = vector.extract_strided_slice %30 {offsets = [0, 0], sizes = [16, 512], strides = [1, 1]} : vector<64x512xf32> to vector<16x512xf32>
    %c0_20 = arith.constant 0 : index
    %c0_21 = arith.constant 0 : index
    %32 = vector.load %arg12[%c0_20, %c0_21] : memref<16x128xf32, #tpu.memory_space<vmem>>, vector<16x128xf32>
    %33 = arith.truncf %32 : vector<16x128xf32> to vector<16x128xbf16>
    %c0_22 = arith.constant 0 : index
    %c0_23 = arith.constant 0 : index
    %34 = vector.load %arg6[%c0_22, %c0_23] : memref<128x512xbf16, #tpu.memory_space<vmem>>, vector<128x512xbf16>
    %cst_24 = arith.constant dense<0.000000e+00> : vector<16x512xf32>
    %35 = tpu.matmul %33, %34, %cst_24 {dimension_numbers = #tpu.dot_dimension_numbers<[1], [0], [0], [1], [0, 0, 1, 1], [], []>} : vector<16x128xbf16>, vector<128x512xbf16>, vector<16x512xf32> -> vector<16x512xf32>
    %36 = arith.addf %31, %35 : vector<16x512xf32>
    %37 = vector.extract_strided_slice %36 {offsets = [0, 0], sizes = [16, 128], strides = [1, 1]} : vector<16x512xf32> to vector<16x128xf32>
    %38 = arith.negf %37 : vector<16x128xf32>
    %39 = math.exp %38 : vector<16x128xf32>
    %cst_25 = arith.constant 1.000000e+00 : f32
    %40 = vector.broadcast %cst_25 : f32 to vector<16x128xf32>
    %41 = arith.addf %40, %39 : vector<16x128xf32>
    %42 = arith.divf %40, %41 : vector<16x128xf32>
    %43 = vector.extract_strided_slice %36 {offsets = [0, 128], sizes = [16, 128], strides = [1, 1]} : vector<16x512xf32> to vector<16x128xf32>
    %44 = arith.negf %43 : vector<16x128xf32>
    %45 = math.exp %44 : vector<16x128xf32>
    %cst_26 = arith.constant 1.000000e+00 : f32
    %46 = vector.broadcast %cst_26 : f32 to vector<16x128xf32>
    %47 = arith.addf %46, %45 : vector<16x128xf32>
    %48 = arith.divf %46, %47 : vector<16x128xf32>
    %49 = vector.extract_strided_slice %36 {offsets = [0, 256], sizes = [16, 128], strides = [1, 1]} : vector<16x512xf32> to vector<16x128xf32>
    %50 = math.tanh %49 : vector<16x128xf32>
    %51 = vector.extract_strided_slice %36 {offsets = [0, 384], sizes = [16, 128], strides = [1, 1]} : vector<16x512xf32> to vector<16x128xf32>
    %52 = arith.negf %51 : vector<16x128xf32>
    %53 = math.exp %52 : vector<16x128xf32>
    %cst_27 = arith.constant 1.000000e+00 : f32
    %54 = vector.broadcast %cst_27 : f32 to vector<16x128xf32>
    %55 = arith.addf %54, %53 : vector<16x128xf32>
    %56 = arith.divf %54, %55 : vector<16x128xf32>
    %c0_28 = arith.constant 0 : index
    %c0_29 = arith.constant 0 : index
    %57 = vector.load %arg13[%c0_28, %c0_29] : memref<16x128xf32, #tpu.memory_space<vmem>>, vector<16x128xf32>
    %58 = arith.mulf %48, %57 : vector<16x128xf32>
    %59 = arith.mulf %42, %50 : vector<16x128xf32>
    %60 = arith.addf %58, %59 : vector<16x128xf32>
    %61 = math.tanh %60 : vector<16x128xf32>
    %62 = arith.mulf %56, %61 : vector<16x128xf32>
    %63 = arith.truncf %62 : vector<16x128xf32> to vector<16x128xbf16>
    %c0_30 = arith.constant 0 : index
    %c0_31 = arith.constant 0 : index
    %64 = vector.load %arg8[%c0_30, %c0_31] : memref<128x512xbf16, #tpu.memory_space<vmem>>, vector<128x512xbf16>
    %cst_32 = arith.constant dense<0.000000e+00> : vector<16x512xf32>
    %65 = tpu.matmul %63, %64, %cst_32 {dimension_numbers = #tpu.dot_dimension_numbers<[1], [0], [0], [1], [0, 0, 1, 1], [], []>} : vector<16x128xbf16>, vector<128x512xbf16>, vector<16x512xf32> -> vector<16x512xf32>
    %c0_33 = arith.constant 0 : index
    %c0_34 = arith.constant 0 : index
    %66 = vector.load %arg10[%c0_33, %c0_34] : memref<1x512xf32, #tpu.memory_space<vmem>>, vector<1x512xf32>
    %67 = vector.broadcast %66 : vector<1x512xf32> to vector<16x512xf32>
    %68 = arith.addf %65, %67 : vector<16x512xf32>
    %c0_35 = arith.constant 0 : index
    %c0_36 = arith.constant 0 : index
    %69 = vector.load %arg14[%c0_35, %c0_36] : memref<16x128xf32, #tpu.memory_space<vmem>>, vector<16x128xf32>
    %70 = arith.truncf %69 : vector<16x128xf32> to vector<16x128xbf16>
    %c0_37 = arith.constant 0 : index
    %c0_38 = arith.constant 0 : index
    %71 = vector.load %arg9[%c0_37, %c0_38] : memref<128x512xbf16, #tpu.memory_space<vmem>>, vector<128x512xbf16>
    %cst_39 = arith.constant dense<0.000000e+00> : vector<16x512xf32>
    %72 = tpu.matmul %70, %71, %cst_39 {dimension_numbers = #tpu.dot_dimension_numbers<[1], [0], [0], [1], [0, 0, 1, 1], [], []>} : vector<16x128xbf16>, vector<128x512xbf16>, vector<16x512xf32> -> vector<16x512xf32>
    %73 = arith.addf %68, %72 : vector<16x512xf32>
    %74 = vector.extract_strided_slice %73 {offsets = [0, 0], sizes = [16, 128], strides = [1, 1]} : vector<16x512xf32> to vector<16x128xf32>
    %75 = arith.negf %74 : vector<16x128xf32>
    %76 = math.exp %75 : vector<16x128xf32>
    %cst_40 = arith.constant 1.000000e+00 : f32
    %77 = vector.broadcast %cst_40 : f32 to vector<16x128xf32>
    %78 = arith.addf %77, %76 : vector<16x128xf32>
    %79 = arith.divf %77, %78 : vector<16x128xf32>
    %80 = vector.extract_strided_slice %73 {offsets = [0, 128], sizes = [16, 128], strides = [1, 1]} : vector<16x512xf32> to vector<16x128xf32>
    %81 = arith.negf %80 : vector<16x128xf32>
    %82 = math.exp %81 : vector<16x128xf32>
    %cst_41 = arith.constant 1.000000e+00 : f32
    %83 = vector.broadcast %cst_41 : f32 to vector<16x128xf32>
    %84 = arith.addf %83, %82 : vector<16x128xf32>
    %85 = arith.divf %83, %84 : vector<16x128xf32>
    %86 = vector.extract_strided_slice %73 {offsets = [0, 256], sizes = [16, 128], strides = [1, 1]} : vector<16x512xf32> to vector<16x128xf32>
    %87 = math.tanh %86 : vector<16x128xf32>
    %88 = vector.extract_strided_slice %73 {offsets = [0, 384], sizes = [16, 128], strides = [1, 1]} : vector<16x512xf32> to vector<16x128xf32>
    %89 = arith.negf %88 : vector<16x128xf32>
    %90 = math.exp %89 : vector<16x128xf32>
    %cst_42 = arith.constant 1.000000e+00 : f32
    %91 = vector.broadcast %cst_42 : f32 to vector<16x128xf32>
    %92 = arith.addf %91, %90 : vector<16x128xf32>
    %93 = arith.divf %91, %92 : vector<16x128xf32>
    %c0_43 = arith.constant 0 : index
    %c0_44 = arith.constant 0 : index
    %94 = vector.load %arg15[%c0_43, %c0_44] : memref<16x128xf32, #tpu.memory_space<vmem>>, vector<16x128xf32>
    %95 = arith.mulf %85, %94 : vector<16x128xf32>
    %96 = arith.mulf %79, %87 : vector<16x128xf32>
    %97 = arith.addf %95, %96 : vector<16x128xf32>
    %98 = math.tanh %97 : vector<16x128xf32>
    %99 = arith.mulf %93, %98 : vector<16x128xf32>
    %c4_i32 = arith.constant 4 : i32
    %100 = arith.muli %arg0, %c4_i32 : i32
    %c0_i32_45 = arith.constant 0 : i32
    %101 = arith.addi %100, %c0_i32_45 : i32
    %c6_i32 = arith.constant 6 : i32
    %102 = arith.cmpi slt, %101, %c6_i32 : i32
    %103 = arith.extui %102 : i1 to i32
    %c0_i32_46 = arith.constant 0 : i32
    %104 = arith.cmpi ne, %103, %c0_i32_46 : i32
    scf.if %104 {
      %c0_133 = arith.constant 0 : index
      %c0_134 = arith.constant 0 : index
      %330 = vector.load %arg12[%c0_133, %c0_134] : memref<16x128xf32, #tpu.memory_space<vmem>>, vector<16x128xf32>
      tpu.vector_store %arg12[%c0_133, %c0_134], %62 {strides = array<i32>} : memref<16x128xf32, #tpu.memory_space<vmem>>, vector<16x128xf32>,
      %c0_135 = arith.constant 0 : index
      %c0_136 = arith.constant 0 : index
      %331 = vector.load %arg13[%c0_135, %c0_136] : memref<16x128xf32, #tpu.memory_space<vmem>>, vector<16x128xf32>
      tpu.vector_store %arg13[%c0_135, %c0_136], %60 {strides = array<i32>} : memref<16x128xf32, #tpu.memory_space<vmem>>, vector<16x128xf32>,
      %c0_137 = arith.constant 0 : index
      %c0_138 = arith.constant 0 : index
      %332 = vector.load %arg14[%c0_137, %c0_138] : memref<16x128xf32, #tpu.memory_space<vmem>>, vector<16x128xf32>
      tpu.vector_store %arg14[%c0_137, %c0_138], %99 {strides = array<i32>} : memref<16x128xf32, #tpu.memory_space<vmem>>, vector<16x128xf32>,
      %c0_139 = arith.constant 0 : index
      %c0_140 = arith.constant 0 : index
      %333 = vector.load %arg15[%c0_139, %c0_140] : memref<16x128xf32, #tpu.memory_space<vmem>>, vector<16x128xf32>
      tpu.vector_store %arg15[%c0_139, %c0_140], %97 {strides = array<i32>} : memref<16x128xf32, #tpu.memory_space<vmem>>, vector<16x128xf32>,
    } else {
    }
    %105 = vector.extract_strided_slice %30 {offsets = [16, 0], sizes = [16, 512], strides = [1, 1]} : vector<64x512xf32> to vector<16x512xf32>
    %c0_47 = arith.constant 0 : index
    %c0_48 = arith.constant 0 : index
    %106 = vector.load %arg12[%c0_47, %c0_48] : memref<16x128xf32, #tpu.memory_space<vmem>>, vector<16x128xf32>
    %107 = arith.truncf %106 : vector<16x128xf32> to vector<16x128xbf16>
    %c0_49 = arith.constant 0 : index
    %c0_50 = arith.constant 0 : index
    %108 = vector.load %arg6[%c0_49, %c0_50] : memref<128x512xbf16, #tpu.memory_space<vmem>>, vector<128x512xbf16>
    %cst_51 = arith.constant dense<0.000000e+00> : vector<16x512xf32>
    %109 = tpu.matmul %107, %108, %cst_51 {dimension_numbers = #tpu.dot_dimension_numbers<[1], [0], [0], [1], [0, 0, 1, 1], [], []>} : vector<16x128xbf16>, vector<128x512xbf16>, vector<16x512xf32> -> vector<16x512xf32>
    %110 = arith.addf %105, %109 : vector<16x512xf32>
    %111 = vector.extract_strided_slice %110 {offsets = [0, 0], sizes = [16, 128], strides = [1, 1]} : vector<16x512xf32> to vector<16x128xf32>
    %112 = arith.negf %111 : vector<16x128xf32>
    %113 = math.exp %112 : vector<16x128xf32>
    %cst_52 = arith.constant 1.000000e+00 : f32
    %114 = vector.broadcast %cst_52 : f32 to vector<16x128xf32>
    %115 = arith.addf %114, %113 : vector<16x128xf32>
    %116 = arith.divf %114, %115 : vector<16x128xf32>
    %117 = vector.extract_strided_slice %110 {offsets = [0, 128], sizes = [16, 128], strides = [1, 1]} : vector<16x512xf32> to vector<16x128xf32>
    %118 = arith.negf %117 : vector<16x128xf32>
    %119 = math.exp %118 : vector<16x128xf32>
    %cst_53 = arith.constant 1.000000e+00 : f32
    %120 = vector.broadcast %cst_53 : f32 to vector<16x128xf32>
    %121 = arith.addf %120, %119 : vector<16x128xf32>
    %122 = arith.divf %120, %121 : vector<16x128xf32>
    %123 = vector.extract_strided_slice %110 {offsets = [0, 256], sizes = [16, 128], strides = [1, 1]} : vector<16x512xf32> to vector<16x128xf32>
    %124 = math.tanh %123 : vector<16x128xf32>
    %125 = vector.extract_strided_slice %110 {offsets = [0, 384], sizes = [16, 128], strides = [1, 1]} : vector<16x512xf32> to vector<16x128xf32>
    %126 = arith.negf %125 : vector<16x128xf32>
    %127 = math.exp %126 : vector<16x128xf32>
    %cst_54 = arith.constant 1.000000e+00 : f32
    %128 = vector.broadcast %cst_54 : f32 to vector<16x128xf32>
    %129 = arith.addf %128, %127 : vector<16x128xf32>
    %130 = arith.divf %128, %129 : vector<16x128xf32>
    %c0_55 = arith.constant 0 : index
    %c0_56 = arith.constant 0 : index
    %131 = vector.load %arg13[%c0_55, %c0_56] : memref<16x128xf32, #tpu.memory_space<vmem>>, vector<16x128xf32>
    %132 = arith.mulf %122, %131 : vector<16x128xf32>
    %133 = arith.mulf %116, %124 : vector<16x128xf32>
    %134 = arith.addf %132, %133 : vector<16x128xf32>
    %135 = math.tanh %134 : vector<16x128xf32>
    %136 = arith.mulf %130, %135 : vector<16x128xf32>
    %137 = arith.truncf %136 : vector<16x128xf32> to vector<16x128xbf16>
    %c0_57 = arith.constant 0 : index
    %c0_58 = arith.constant 0 : index
    %138 = vector.load %arg8[%c0_57, %c0_58] : memref<128x512xbf16, #tpu.memory_space<vmem>>, vector<128x512xbf16>
    %cst_59 = arith.constant dense<0.000000e+00> : vector<16x512xf32>
    %139 = tpu.matmul %137, %138, %cst_59 {dimension_numbers = #tpu.dot_dimension_numbers<[1], [0], [0], [1], [0, 0, 1, 1], [], []>} : vector<16x128xbf16>, vector<128x512xbf16>, vector<16x512xf32> -> vector<16x512xf32>
    %c0_60 = arith.constant 0 : index
    %c0_61 = arith.constant 0 : index
    %140 = vector.load %arg10[%c0_60, %c0_61] : memref<1x512xf32, #tpu.memory_space<vmem>>, vector<1x512xf32>
    %141 = vector.broadcast %140 : vector<1x512xf32> to vector<16x512xf32>
    %142 = arith.addf %139, %141 : vector<16x512xf32>
    %c0_62 = arith.constant 0 : index
    %c0_63 = arith.constant 0 : index
    %143 = vector.load %arg14[%c0_62, %c0_63] : memref<16x128xf32, #tpu.memory_space<vmem>>, vector<16x128xf32>
    %144 = arith.truncf %143 : vector<16x128xf32> to vector<16x128xbf16>
    %c0_64 = arith.constant 0 : index
    %c0_65 = arith.constant 0 : index
    %145 = vector.load %arg9[%c0_64, %c0_65] : memref<128x512xbf16, #tpu.memory_space<vmem>>, vector<128x512xbf16>
    %cst_66 = arith.constant dense<0.000000e+00> : vector<16x512xf32>
    %146 = tpu.matmul %144, %145, %cst_66 {dimension_numbers = #tpu.dot_dimension_numbers<[1], [0], [0], [1], [0, 0, 1, 1], [], []>} : vector<16x128xbf16>, vector<128x512xbf16>, vector<16x512xf32> -> vector<16x512xf32>
    %147 = arith.addf %142, %146 : vector<16x512xf32>
    %148 = vector.extract_strided_slice %147 {offsets = [0, 0], sizes = [16, 128], strides = [1, 1]} : vector<16x512xf32> to vector<16x128xf32>
    %149 = arith.negf %148 : vector<16x128xf32>
    %150 = math.exp %149 : vector<16x128xf32>
    %cst_67 = arith.constant 1.000000e+00 : f32
    %151 = vector.broadcast %cst_67 : f32 to vector<16x128xf32>
    %152 = arith.addf %151, %150 : vector<16x128xf32>
    %153 = arith.divf %151, %152 : vector<16x128xf32>
    %154 = vector.extract_strided_slice %147 {offsets = [0, 128], sizes = [16, 128], strides = [1, 1]} : vector<16x512xf32> to vector<16x128xf32>
    %155 = arith.negf %154 : vector<16x128xf32>
    %156 = math.exp %155 : vector<16x128xf32>
    %cst_68 = arith.constant 1.000000e+00 : f32
    %157 = vector.broadcast %cst_68 : f32 to vector<16x128xf32>
    %158 = arith.addf %157, %156 : vector<16x128xf32>
    %159 = arith.divf %157, %158 : vector<16x128xf32>
    %160 = vector.extract_strided_slice %147 {offsets = [0, 256], sizes = [16, 128], strides = [1, 1]} : vector<16x512xf32> to vector<16x128xf32>
    %161 = math.tanh %160 : vector<16x128xf32>
    %162 = vector.extract_strided_slice %147 {offsets = [0, 384], sizes = [16, 128], strides = [1, 1]} : vector<16x512xf32> to vector<16x128xf32>
    %163 = arith.negf %162 : vector<16x128xf32>
    %164 = math.exp %163 : vector<16x128xf32>
    %cst_69 = arith.constant 1.000000e+00 : f32
    %165 = vector.broadcast %cst_69 : f32 to vector<16x128xf32>
    %166 = arith.addf %165, %164 : vector<16x128xf32>
    %167 = arith.divf %165, %166 : vector<16x128xf32>
    %c0_70 = arith.constant 0 : index
    %c0_71 = arith.constant 0 : index
    %168 = vector.load %arg15[%c0_70, %c0_71] : memref<16x128xf32, #tpu.memory_space<vmem>>, vector<16x128xf32>
    %169 = arith.mulf %159, %168 : vector<16x128xf32>
    %170 = arith.mulf %153, %161 : vector<16x128xf32>
    %171 = arith.addf %169, %170 : vector<16x128xf32>
    %172 = math.tanh %171 : vector<16x128xf32>
    %173 = arith.mulf %167, %172 : vector<16x128xf32>
    %c4_i32_72 = arith.constant 4 : i32
    %174 = arith.muli %arg0, %c4_i32_72 : i32
    %c1_i32 = arith.constant 1 : i32
    %175 = arith.addi %174, %c1_i32 : i32
    %c6_i32_73 = arith.constant 6 : i32
    %176 = arith.cmpi slt, %175, %c6_i32_73 : i32
    %177 = arith.extui %176 : i1 to i32
    %c0_i32_74 = arith.constant 0 : i32
    %178 = arith.cmpi ne, %177, %c0_i32_74 : i32
    scf.if %178 {
      %c0_133 = arith.constant 0 : index
      %c0_134 = arith.constant 0 : index
      %330 = vector.load %arg12[%c0_133, %c0_134] : memref<16x128xf32, #tpu.memory_space<vmem>>, vector<16x128xf32>
      tpu.vector_store %arg12[%c0_133, %c0_134], %136 {strides = array<i32>} : memref<16x128xf32, #tpu.memory_space<vmem>>, vector<16x128xf32>,
      %c0_135 = arith.constant 0 : index
      %c0_136 = arith.constant 0 : index
      %331 = vector.load %arg13[%c0_135, %c0_136] : memref<16x128xf32, #tpu.memory_space<vmem>>, vector<16x128xf32>
      tpu.vector_store %arg13[%c0_135, %c0_136], %134 {strides = array<i32>} : memref<16x128xf32, #tpu.memory_space<vmem>>, vector<16x128xf32>,
      %c0_137 = arith.constant 0 : index
      %c0_138 = arith.constant 0 : index
      %332 = vector.load %arg14[%c0_137, %c0_138] : memref<16x128xf32, #tpu.memory_space<vmem>>, vector<16x128xf32>
      tpu.vector_store %arg14[%c0_137, %c0_138], %173 {strides = array<i32>} : memref<16x128xf32, #tpu.memory_space<vmem>>, vector<16x128xf32>,
      %c0_139 = arith.constant 0 : index
      %c0_140 = arith.constant 0 : index
      %333 = vector.load %arg15[%c0_139, %c0_140] : memref<16x128xf32, #tpu.memory_space<vmem>>, vector<16x128xf32>
      tpu.vector_store %arg15[%c0_139, %c0_140], %171 {strides = array<i32>} : memref<16x128xf32, #tpu.memory_space<vmem>>, vector<16x128xf32>,
    } else {
    }
    %179 = vector.extract_strided_slice %30 {offsets = [32, 0], sizes = [16, 512], strides = [1, 1]} : vector<64x512xf32> to vector<16x512xf32>
    %c0_75 = arith.constant 0 : index
    %c0_76 = arith.constant 0 : index
    %180 = vector.load %arg12[%c0_75, %c0_76] : memref<16x128xf32, #tpu.memory_space<vmem>>, vector<16x128xf32>
    %181 = arith.truncf %180 : vector<16x128xf32> to vector<16x128xbf16>
    %c0_77 = arith.constant 0 : index
    %c0_78 = arith.constant 0 : index
    %182 = vector.load %arg6[%c0_77, %c0_78] : memref<128x512xbf16, #tpu.memory_space<vmem>>, vector<128x512xbf16>
    %cst_79 = arith.constant dense<0.000000e+00> : vector<16x512xf32>
    %183 = tpu.matmul %181, %182, %cst_79 {dimension_numbers = #tpu.dot_dimension_numbers<[1], [0], [0], [1], [0, 0, 1, 1], [], []>} : vector<16x128xbf16>, vector<128x512xbf16>, vector<16x512xf32> -> vector<16x512xf32>
    %184 = arith.addf %179, %183 : vector<16x512xf32>
    %185 = vector.extract_strided_slice %184 {offsets = [0, 0], sizes = [16, 128], strides = [1, 1]} : vector<16x512xf32> to vector<16x128xf32>
    %186 = arith.negf %185 : vector<16x128xf32>
    %187 = math.exp %186 : vector<16x128xf32>
    %cst_80 = arith.constant 1.000000e+00 : f32
    %188 = vector.broadcast %cst_80 : f32 to vector<16x128xf32>
    %189 = arith.addf %188, %187 : vector<16x128xf32>
    %190 = arith.divf %188, %189 : vector<16x128xf32>
    %191 = vector.extract_strided_slice %184 {offsets = [0, 128], sizes = [16, 128], strides = [1, 1]} : vector<16x512xf32> to vector<16x128xf32>
    %192 = arith.negf %191 : vector<16x128xf32>
    %193 = math.exp %192 : vector<16x128xf32>
    %cst_81 = arith.constant 1.000000e+00 : f32
    %194 = vector.broadcast %cst_81 : f32 to vector<16x128xf32>
    %195 = arith.addf %194, %193 : vector<16x128xf32>
    %196 = arith.divf %194, %195 : vector<16x128xf32>
    %197 = vector.extract_strided_slice %184 {offsets = [0, 256], sizes = [16, 128], strides = [1, 1]} : vector<16x512xf32> to vector<16x128xf32>
    %198 = math.tanh %197 : vector<16x128xf32>
    %199 = vector.extract_strided_slice %184 {offsets = [0, 384], sizes = [16, 128], strides = [1, 1]} : vector<16x512xf32> to vector<16x128xf32>
    %200 = arith.negf %199 : vector<16x128xf32>
    %201 = math.exp %200 : vector<16x128xf32>
    %cst_82 = arith.constant 1.000000e+00 : f32
    %202 = vector.broadcast %cst_82 : f32 to vector<16x128xf32>
    %203 = arith.addf %202, %201 : vector<16x128xf32>
    %204 = arith.divf %202, %203 : vector<16x128xf32>
    %c0_83 = arith.constant 0 : index
    %c0_84 = arith.constant 0 : index
    %205 = vector.load %arg13[%c0_83, %c0_84] : memref<16x128xf32, #tpu.memory_space<vmem>>, vector<16x128xf32>
    %206 = arith.mulf %196, %205 : vector<16x128xf32>
    %207 = arith.mulf %190, %198 : vector<16x128xf32>
    %208 = arith.addf %206, %207 : vector<16x128xf32>
    %209 = math.tanh %208 : vector<16x128xf32>
    %210 = arith.mulf %204, %209 : vector<16x128xf32>
    %211 = arith.truncf %210 : vector<16x128xf32> to vector<16x128xbf16>
    %c0_85 = arith.constant 0 : index
    %c0_86 = arith.constant 0 : index
    %212 = vector.load %arg8[%c0_85, %c0_86] : memref<128x512xbf16, #tpu.memory_space<vmem>>, vector<128x512xbf16>
    %cst_87 = arith.constant dense<0.000000e+00> : vector<16x512xf32>
    %213 = tpu.matmul %211, %212, %cst_87 {dimension_numbers = #tpu.dot_dimension_numbers<[1], [0], [0], [1], [0, 0, 1, 1], [], []>} : vector<16x128xbf16>, vector<128x512xbf16>, vector<16x512xf32> -> vector<16x512xf32>
    %c0_88 = arith.constant 0 : index
    %c0_89 = arith.constant 0 : index
    %214 = vector.load %arg10[%c0_88, %c0_89] : memref<1x512xf32, #tpu.memory_space<vmem>>, vector<1x512xf32>
    %215 = vector.broadcast %214 : vector<1x512xf32> to vector<16x512xf32>
    %216 = arith.addf %213, %215 : vector<16x512xf32>
    %c0_90 = arith.constant 0 : index
    %c0_91 = arith.constant 0 : index
    %217 = vector.load %arg14[%c0_90, %c0_91] : memref<16x128xf32, #tpu.memory_space<vmem>>, vector<16x128xf32>
    %218 = arith.truncf %217 : vector<16x128xf32> to vector<16x128xbf16>
    %c0_92 = arith.constant 0 : index
    %c0_93 = arith.constant 0 : index
    %219 = vector.load %arg9[%c0_92, %c0_93] : memref<128x512xbf16, #tpu.memory_space<vmem>>, vector<128x512xbf16>
    %cst_94 = arith.constant dense<0.000000e+00> : vector<16x512xf32>
    %220 = tpu.matmul %218, %219, %cst_94 {dimension_numbers = #tpu.dot_dimension_numbers<[1], [0], [0], [1], [0, 0, 1, 1], [], []>} : vector<16x128xbf16>, vector<128x512xbf16>, vector<16x512xf32> -> vector<16x512xf32>
    %221 = arith.addf %216, %220 : vector<16x512xf32>
    %222 = vector.extract_strided_slice %221 {offsets = [0, 0], sizes = [16, 128], strides = [1, 1]} : vector<16x512xf32> to vector<16x128xf32>
    %223 = arith.negf %222 : vector<16x128xf32>
    %224 = math.exp %223 : vector<16x128xf32>
    %cst_95 = arith.constant 1.000000e+00 : f32
    %225 = vector.broadcast %cst_95 : f32 to vector<16x128xf32>
    %226 = arith.addf %225, %224 : vector<16x128xf32>
    %227 = arith.divf %225, %226 : vector<16x128xf32>
    %228 = vector.extract_strided_slice %221 {offsets = [0, 128], sizes = [16, 128], strides = [1, 1]} : vector<16x512xf32> to vector<16x128xf32>
    %229 = arith.negf %228 : vector<16x128xf32>
    %230 = math.exp %229 : vector<16x128xf32>
    %cst_96 = arith.constant 1.000000e+00 : f32
    %231 = vector.broadcast %cst_96 : f32 to vector<16x128xf32>
    %232 = arith.addf %231, %230 : vector<16x128xf32>
    %233 = arith.divf %231, %232 : vector<16x128xf32>
    %234 = vector.extract_strided_slice %221 {offsets = [0, 256], sizes = [16, 128], strides = [1, 1]} : vector<16x512xf32> to vector<16x128xf32>
    %235 = math.tanh %234 : vector<16x128xf32>
    %236 = vector.extract_strided_slice %221 {offsets = [0, 384], sizes = [16, 128], strides = [1, 1]} : vector<16x512xf32> to vector<16x128xf32>
    %237 = arith.negf %236 : vector<16x128xf32>
    %238 = math.exp %237 : vector<16x128xf32>
    %cst_97 = arith.constant 1.000000e+00 : f32
    %239 = vector.broadcast %cst_97 : f32 to vector<16x128xf32>
    %240 = arith.addf %239, %238 : vector<16x128xf32>
    %241 = arith.divf %239, %240 : vector<16x128xf32>
    %c0_98 = arith.constant 0 : index
    %c0_99 = arith.constant 0 : index
    %242 = vector.load %arg15[%c0_98, %c0_99] : memref<16x128xf32, #tpu.memory_space<vmem>>, vector<16x128xf32>
    %243 = arith.mulf %233, %242 : vector<16x128xf32>
    %244 = arith.mulf %227, %235 : vector<16x128xf32>
    %245 = arith.addf %243, %244 : vector<16x128xf32>
    %246 = math.tanh %245 : vector<16x128xf32>
    %247 = arith.mulf %241, %246 : vector<16x128xf32>
    %c4_i32_100 = arith.constant 4 : i32
    %248 = arith.muli %arg0, %c4_i32_100 : i32
    %c2_i32 = arith.constant 2 : i32
    %249 = arith.addi %248, %c2_i32 : i32
    %c6_i32_101 = arith.constant 6 : i32
    %250 = arith.cmpi slt, %249, %c6_i32_101 : i32
    %251 = arith.extui %250 : i1 to i32
    %c0_i32_102 = arith.constant 0 : i32
    %252 = arith.cmpi ne, %251, %c0_i32_102 : i32
    scf.if %252 {
      %c0_133 = arith.constant 0 : index
      %c0_134 = arith.constant 0 : index
      %330 = vector.load %arg12[%c0_133, %c0_134] : memref<16x128xf32, #tpu.memory_space<vmem>>, vector<16x128xf32>
      tpu.vector_store %arg12[%c0_133, %c0_134], %210 {strides = array<i32>} : memref<16x128xf32, #tpu.memory_space<vmem>>, vector<16x128xf32>,
      %c0_135 = arith.constant 0 : index
      %c0_136 = arith.constant 0 : index
      %331 = vector.load %arg13[%c0_135, %c0_136] : memref<16x128xf32, #tpu.memory_space<vmem>>, vector<16x128xf32>
      tpu.vector_store %arg13[%c0_135, %c0_136], %208 {strides = array<i32>} : memref<16x128xf32, #tpu.memory_space<vmem>>, vector<16x128xf32>,
      %c0_137 = arith.constant 0 : index
      %c0_138 = arith.constant 0 : index
      %332 = vector.load %arg14[%c0_137, %c0_138] : memref<16x128xf32, #tpu.memory_space<vmem>>, vector<16x128xf32>
      tpu.vector_store %arg14[%c0_137, %c0_138], %247 {strides = array<i32>} : memref<16x128xf32, #tpu.memory_space<vmem>>, vector<16x128xf32>,
      %c0_139 = arith.constant 0 : index
      %c0_140 = arith.constant 0 : index
      %333 = vector.load %arg15[%c0_139, %c0_140] : memref<16x128xf32, #tpu.memory_space<vmem>>, vector<16x128xf32>
      tpu.vector_store %arg15[%c0_139, %c0_140], %245 {strides = array<i32>} : memref<16x128xf32, #tpu.memory_space<vmem>>, vector<16x128xf32>,
    } else {
    }
    %253 = vector.extract_strided_slice %30 {offsets = [48, 0], sizes = [16, 512], strides = [1, 1]} : vector<64x512xf32> to vector<16x512xf32>
    %c0_103 = arith.constant 0 : index
    %c0_104 = arith.constant 0 : index
    %254 = vector.load %arg12[%c0_103, %c0_104] : memref<16x128xf32, #tpu.memory_space<vmem>>, vector<16x128xf32>
    %255 = arith.truncf %254 : vector<16x128xf32> to vector<16x128xbf16>
    %c0_105 = arith.constant 0 : index
    %c0_106 = arith.constant 0 : index
    %256 = vector.load %arg6[%c0_105, %c0_106] : memref<128x512xbf16, #tpu.memory_space<vmem>>, vector<128x512xbf16>
    %cst_107 = arith.constant dense<0.000000e+00> : vector<16x512xf32>
    %257 = tpu.matmul %255, %256, %cst_107 {dimension_numbers = #tpu.dot_dimension_numbers<[1], [0], [0], [1], [0, 0, 1, 1], [], []>} : vector<16x128xbf16>, vector<128x512xbf16>, vector<16x512xf32> -> vector<16x512xf32>
    %258 = arith.addf %253, %257 : vector<16x512xf32>
    %259 = vector.extract_strided_slice %258 {offsets = [0, 0], sizes = [16, 128], strides = [1, 1]} : vector<16x512xf32> to vector<16x128xf32>
    %260 = arith.negf %259 : vector<16x128xf32>
    %261 = math.exp %260 : vector<16x128xf32>
    %cst_108 = arith.constant 1.000000e+00 : f32
    %262 = vector.broadcast %cst_108 : f32 to vector<16x128xf32>
    %263 = arith.addf %262, %261 : vector<16x128xf32>
    %264 = arith.divf %262, %263 : vector<16x128xf32>
    %265 = vector.extract_strided_slice %258 {offsets = [0, 128], sizes = [16, 128], strides = [1, 1]} : vector<16x512xf32> to vector<16x128xf32>
    %266 = arith.negf %265 : vector<16x128xf32>
    %267 = math.exp %266 : vector<16x128xf32>
    %cst_109 = arith.constant 1.000000e+00 : f32
    %268 = vector.broadcast %cst_109 : f32 to vector<16x128xf32>
    %269 = arith.addf %268, %267 : vector<16x128xf32>
    %270 = arith.divf %268, %269 : vector<16x128xf32>
    %271 = vector.extract_strided_slice %258 {offsets = [0, 256], sizes = [16, 128], strides = [1, 1]} : vector<16x512xf32> to vector<16x128xf32>
    %272 = math.tanh %271 : vector<16x128xf32>
    %273 = vector.extract_strided_slice %258 {offsets = [0, 384], sizes = [16, 128], strides = [1, 1]} : vector<16x512xf32> to vector<16x128xf32>
    %274 = arith.negf %273 : vector<16x128xf32>
    %275 = math.exp %274 : vector<16x128xf32>
    %cst_110 = arith.constant 1.000000e+00 : f32
    %276 = vector.broadcast %cst_110 : f32 to vector<16x128xf32>
    %277 = arith.addf %276, %275 : vector<16x128xf32>
    %278 = arith.divf %276, %277 : vector<16x128xf32>
    %c0_111 = arith.constant 0 : index
    %c0_112 = arith.constant 0 : index
    %279 = vector.load %arg13[%c0_111, %c0_112] : memref<16x128xf32, #tpu.memory_space<vmem>>, vector<16x128xf32>
    %280 = arith.mulf %270, %279 : vector<16x128xf32>
    %281 = arith.mulf %264, %272 : vector<16x128xf32>
    %282 = arith.addf %280, %281 : vector<16x128xf32>
    %283 = math.tanh %282 : vector<16x128xf32>
    %284 = arith.mulf %278, %283 : vector<16x128xf32>
    %285 = arith.truncf %284 : vector<16x128xf32> to vector<16x128xbf16>
    %c0_113 = arith.constant 0 : index
    %c0_114 = arith.constant 0 : index
    %286 = vector.load %arg8[%c0_113, %c0_114] : memref<128x512xbf16, #tpu.memory_space<vmem>>, vector<128x512xbf16>
    %cst_115 = arith.constant dense<0.000000e+00> : vector<16x512xf32>
    %287 = tpu.matmul %285, %286, %cst_115 {dimension_numbers = #tpu.dot_dimension_numbers<[1], [0], [0], [1], [0, 0, 1, 1], [], []>} : vector<16x128xbf16>, vector<128x512xbf16>, vector<16x512xf32> -> vector<16x512xf32>
    %c0_116 = arith.constant 0 : index
    %c0_117 = arith.constant 0 : index
    %288 = vector.load %arg10[%c0_116, %c0_117] : memref<1x512xf32, #tpu.memory_space<vmem>>, vector<1x512xf32>
    %289 = vector.broadcast %288 : vector<1x512xf32> to vector<16x512xf32>
    %290 = arith.addf %287, %289 : vector<16x512xf32>
    %c0_118 = arith.constant 0 : index
    %c0_119 = arith.constant 0 : index
    %291 = vector.load %arg14[%c0_118, %c0_119] : memref<16x128xf32, #tpu.memory_space<vmem>>, vector<16x128xf32>
    %292 = arith.truncf %291 : vector<16x128xf32> to vector<16x128xbf16>
    %c0_120 = arith.constant 0 : index
    %c0_121 = arith.constant 0 : index
    %293 = vector.load %arg9[%c0_120, %c0_121] : memref<128x512xbf16, #tpu.memory_space<vmem>>, vector<128x512xbf16>
    %cst_122 = arith.constant dense<0.000000e+00> : vector<16x512xf32>
    %294 = tpu.matmul %292, %293, %cst_122 {dimension_numbers = #tpu.dot_dimension_numbers<[1], [0], [0], [1], [0, 0, 1, 1], [], []>} : vector<16x128xbf16>, vector<128x512xbf16>, vector<16x512xf32> -> vector<16x512xf32>
    %295 = arith.addf %290, %294 : vector<16x512xf32>
    %296 = vector.extract_strided_slice %295 {offsets = [0, 0], sizes = [16, 128], strides = [1, 1]} : vector<16x512xf32> to vector<16x128xf32>
    %297 = arith.negf %296 : vector<16x128xf32>
    %298 = math.exp %297 : vector<16x128xf32>
    %cst_123 = arith.constant 1.000000e+00 : f32
    %299 = vector.broadcast %cst_123 : f32 to vector<16x128xf32>
    %300 = arith.addf %299, %298 : vector<16x128xf32>
    %301 = arith.divf %299, %300 : vector<16x128xf32>
    %302 = vector.extract_strided_slice %295 {offsets = [0, 128], sizes = [16, 128], strides = [1, 1]} : vector<16x512xf32> to vector<16x128xf32>
    %303 = arith.negf %302 : vector<16x128xf32>
    %304 = math.exp %303 : vector<16x128xf32>
    %cst_124 = arith.constant 1.000000e+00 : f32
    %305 = vector.broadcast %cst_124 : f32 to vector<16x128xf32>
    %306 = arith.addf %305, %304 : vector<16x128xf32>
    %307 = arith.divf %305, %306 : vector<16x128xf32>
    %308 = vector.extract_strided_slice %295 {offsets = [0, 256], sizes = [16, 128], strides = [1, 1]} : vector<16x512xf32> to vector<16x128xf32>
    %309 = math.tanh %308 : vector<16x128xf32>
    %310 = vector.extract_strided_slice %295 {offsets = [0, 384], sizes = [16, 128], strides = [1, 1]} : vector<16x512xf32> to vector<16x128xf32>
    %311 = arith.negf %310 : vector<16x128xf32>
    %312 = math.exp %311 : vector<16x128xf32>
    %cst_125 = arith.constant 1.000000e+00 : f32
    %313 = vector.broadcast %cst_125 : f32 to vector<16x128xf32>
    %314 = arith.addf %313, %312 : vector<16x128xf32>
    %315 = arith.divf %313, %314 : vector<16x128xf32>
    %c0_126 = arith.constant 0 : index
    %c0_127 = arith.constant 0 : index
    %316 = vector.load %arg15[%c0_126, %c0_127] : memref<16x128xf32, #tpu.memory_space<vmem>>, vector<16x128xf32>
    %317 = arith.mulf %307, %316 : vector<16x128xf32>
    %318 = arith.mulf %301, %309 : vector<16x128xf32>
    %319 = arith.addf %317, %318 : vector<16x128xf32>
    %320 = math.tanh %319 : vector<16x128xf32>
    %321 = arith.mulf %315, %320 : vector<16x128xf32>
    %c4_i32_128 = arith.constant 4 : i32
    %322 = arith.muli %arg0, %c4_i32_128 : i32
    %c3_i32 = arith.constant 3 : i32
    %323 = arith.addi %322, %c3_i32 : i32
    %c6_i32_129 = arith.constant 6 : i32
    %324 = arith.cmpi slt, %323, %c6_i32_129 : i32
    %325 = arith.extui %324 : i1 to i32
    %c0_i32_130 = arith.constant 0 : i32
    %326 = arith.cmpi ne, %325, %c0_i32_130 : i32
    scf.if %326 {
      %c0_133 = arith.constant 0 : index
      %c0_134 = arith.constant 0 : index
      %330 = vector.load %arg12[%c0_133, %c0_134] : memref<16x128xf32, #tpu.memory_space<vmem>>, vector<16x128xf32>
      tpu.vector_store %arg12[%c0_133, %c0_134], %284 {strides = array<i32>} : memref<16x128xf32, #tpu.memory_space<vmem>>, vector<16x128xf32>,
      %c0_135 = arith.constant 0 : index
      %c0_136 = arith.constant 0 : index
      %331 = vector.load %arg13[%c0_135, %c0_136] : memref<16x128xf32, #tpu.memory_space<vmem>>, vector<16x128xf32>
      tpu.vector_store %arg13[%c0_135, %c0_136], %282 {strides = array<i32>} : memref<16x128xf32, #tpu.memory_space<vmem>>, vector<16x128xf32>,
      %c0_137 = arith.constant 0 : index
      %c0_138 = arith.constant 0 : index
      %332 = vector.load %arg14[%c0_137, %c0_138] : memref<16x128xf32, #tpu.memory_space<vmem>>, vector<16x128xf32>
      tpu.vector_store %arg14[%c0_137, %c0_138], %321 {strides = array<i32>} : memref<16x128xf32, #tpu.memory_space<vmem>>, vector<16x128xf32>,
      %c0_139 = arith.constant 0 : index
      %c0_140 = arith.constant 0 : index
      %333 = vector.load %arg15[%c0_139, %c0_140] : memref<16x128xf32, #tpu.memory_space<vmem>>, vector<16x128xf32>
      tpu.vector_store %arg15[%c0_139, %c0_140], %319 {strides = array<i32>} : memref<16x128xf32, #tpu.memory_space<vmem>>, vector<16x128xf32>,
    } else {
    }
    %c1_i32_131 = arith.constant 1 : i32
    %327 = arith.cmpi eq, %arg0, %c1_i32_131 : i32
    %328 = arith.extui %327 : i1 to i32
    %c0_i32_132 = arith.constant 0 : i32
    %329 = arith.cmpi ne, %328, %c0_i32_132 : i32
    scf.if %329 {
      %c0_133 = arith.constant 0 : index
      %c0_134 = arith.constant 0 : index
      %330 = vector.load %arg14[%c0_133, %c0_134] : memref<16x128xf32, #tpu.memory_space<vmem>>, vector<16x128xf32>
      %c0_135 = arith.constant 0 : index
      %c0_136 = arith.constant 0 : index
      %331 = vector.load %arg11[%c0_135, %c0_136] : memref<16x128xf32, #tpu.memory_space<vmem>>, vector<16x128xf32>
      tpu.vector_store %arg11[%c0_135, %c0_136], %330 {strides = array<i32>} : memref<16x128xf32, #tpu.memory_space<vmem>>, vector<16x128xf32>,
    } else {
    }
    return
  }
  func.func @transform_0(%arg0: i32) -> (i32, i32, i32) {
    %c0_i32 = arith.constant 0 : i32
    %c0_i32_0 = arith.constant 0 : i32
    %c0_i32_1 = arith.constant 0 : i32
    return %arg0, %c0_i32, %c0_i32_0 : i32, i32, i32
  }
  func.func @transform_1(%arg0: i32) -> (i32, i32, i32) {
    %c0_i32 = arith.constant 0 : i32
    %c0_i32_0 = arith.constant 0 : i32
    %c0_i32_1 = arith.constant 0 : i32
    return %arg0, %c0_i32, %c0_i32_0 : i32, i32, i32
  }
  func.func @transform_2(%arg0: i32) -> (i32, i32) {
    %c0_i32 = arith.constant 0 : i32
    %c0_i32_0 = arith.constant 0 : i32
    %c0_i32_1 = arith.constant 0 : i32
    return %c0_i32, %c0_i32_0 : i32, i32
  }
  func.func @transform_3(%arg0: i32) -> (i32, i32) {
    %c0_i32 = arith.constant 0 : i32
    %c0_i32_0 = arith.constant 0 : i32
    %c0_i32_1 = arith.constant 0 : i32
    return %c0_i32, %c0_i32_0 : i32, i32
  }
  func.func @transform_4(%arg0: i32) -> (i32, i32) {
    %c0_i32 = arith.constant 0 : i32
    %c0_i32_0 = arith.constant 0 : i32
    %c0_i32_1 = arith.constant 0 : i32
    return %c0_i32, %c0_i32_0 : i32, i32
  }
  func.func @transform_5(%arg0: i32) -> (i32, i32) {
    %c0_i32 = arith.constant 0 : i32
    %c0_i32_0 = arith.constant 0 : i32
    %c0_i32_1 = arith.constant 0 : i32
    return %c0_i32, %c0_i32_0 : i32, i32
  }
  func.func @transform_6(%arg0: i32) -> (i32, i32) {
    %c0_i32 = arith.constant 0 : i32
    %c0_i32_0 = arith.constant 0 : i32
    %c0_i32_1 = arith.constant 0 : i32
    return %c0_i32, %c0_i32_0 : i32, i32
  }
  func.func @transform_7(%arg0: i32) -> (i32, i32) {
    %c0_i32 = arith.constant 0 : i32
    %c0_i32_0 = arith.constant 0 : i32
    %c0_i32_1 = arith.constant 0 : i32
    return %c0_i32, %c0_i32_0 : i32, i32
  }
  func.func @transform_8(%arg0: i32) -> (i32, i32) {
    %c0_i32 = arith.constant 0 : i32
    %c0_i32_0 = arith.constant 0 : i32
    %c0_i32_1 = arith.constant 0 : i32
    return %c0_i32, %c0_i32_0 : i32, i32
  }
  func.func @transform_9(%arg0: i32) -> (i32, i32) {
    %c0_i32 = arith.constant 0 : i32
    %c0_i32_0 = arith.constant 0 : i32
    %c0_i32_1 = arith.constant 0 : i32
    return %c0_i32, %c0_i32_0 : i32, i32
  }
  func.func @transform_10(%arg0: i32) -> (i32, i32) {
    %c0_i32 = arith.constant 0 : i32
    %c0_i32_0 = arith.constant 0 : i32
    %c0_i32_1 = arith.constant 0 : i32
    return %c0_i32, %c0_i32_0 : i32, i32
  }
}

</mosaic_0001>

<bundles_post_ra>
// kernel: tpu_custom_call.1
= control target key start
LH: loop header
LB: loop body
LE: loop exit
PB: predicated region body
PF: predicated region fallthrough
CT: control target
= control target key end

     0   :  { %15 = vsyncpa [#allocation7], 0  ;;  %s9429_s0 = inlined_call_operand.vmem [shape: f32[8,16,16], index: 0, kind: input, shape index: {}]   ;;  %s9430_s1 = inlined_call_operand.vmem [shape: f32[8,16,8], index: 1, kind: input, shape index: {}]   ;;  %s9431_s2 = inlined_call_operand.vmem [shape: bf16[8,16], index: 2, kind: input, shape index: {}]   ;;  %s9432_s3 = inlined_call_operand.vmem [shape: bf16[16,128], index: 3, kind: input, shape index: {}]   ;;  %s9433_s4 = inlined_call_operand.hbm [shape: bf16[128,512], index: 4, kind: input, shape index: {}]   ;;  %s9434_s5 = inlined_call_operand.hbm [shape: bf16[128,512], index: 5, kind: input, shape index: {}]   ;;  %s9435_s6 = inlined_call_operand.vmem [shape: f32[1,512], index: 6, kind: input, shape index: {}]   ;;  %s9436_s7 = inlined_call_operand.hbm [shape: bf16[128,512], index: 7, kind: input, shape index: {}]   ;;  %s9437_s8 = inlined_call_operand.hbm [shape: bf16[128,512], index: 8, kind: input, shape index: {}]   ;;  %s9438_s9 = inlined_call_operand.vmem [shape: f32[1,512], index: 9, kind: input, shape index: {}]   ;;  %s9439_s10 = inlined_call_operand.hbm [shape: f32[16,128], index: 10, kind: output, shape index: {}]  }
   0x1   :  { %16 = vsyncpa [#allocation10], 0 }
   0x2   :  { %17 = vsyncpa [#allocation13], 0 }
   0x3   :  { %18 = vsyncpa [#allocation8], 0  ;;  %s8184_s13 = smov 0  }
   0x4 LB: > { %s8190_s14 = sadd.s32 4294967295, %s8117_s13   ;;  %p5451_p0 = scmp.ge.s32.totalorder %s8117_s13, 1  ;;  %s8117_s13 = sphi %s8184_s13, %s24_s13  }
   0x5   : > { %p270_p1 = scmp.lt.s32.totalorder %s8117_s13, 3  ;;  %p5452_p2 = scmp.ne.s32.totalorder %s8190_s14, 0 }
   0x6   : > { %p7663_p3 = scmp.eq.s32.totalorder %s8190_s14, 0  ;;  %s301_s17 = sshll.u32 %s9434_s5, 4  ;;  %s302_s17 = int_to_ptr.hbm [resolvable:$true] %s301_s17 }
   0x7   : > { %p8199_p4 = pnand %p5451_p0, %p270_p1  ;;  %s287_s21 = sshll.u32 %s9433_s4, 4  ;;  %s288_s21 = int_to_ptr.hbm [resolvable:$true] %s287_s21 }
   0x8   : > { %s8119_s22 = smov [#allocation9]   ;;  %s8120_s25 = smov [#allocation6]  }
   0x9   : > { %p7650_p5 = pneg %p8199_p4  ;;  %s303_s23 = sshll.u32 %s8119_s22, 4  ;;  %s304_s23 = int_to_ptr.vmem [resolvable:$true] %s303_s23 }
   0xa   : > { %s289_s26 = sshll.u32 %s8120_s25, 4  ;;  %s318_s29 = sshll.u32 %s9436_s7, 4  ;;  %s290_s26 = int_to_ptr.vmem [resolvable:$true] %s289_s26  ;;  %s319_s29 = int_to_ptr.hbm [resolvable:$true] %s318_s29 }
   0xb   : > { %p8210_p6 = pnand %p7663_p3, %p7650_p5  ;;  %s8121_s30 = smov 256  }
   0xc   : > { %s8122_s11 = smov 16   ;;  %s8123_s12 = smov [#allocation11]  }
   0xd   : > { %7656 = dma.hbm_to_vmem [thread:$0]  (!%p8210_p6), %s302_s17, 4096, %s304_s23, [#allocation10], %s8121_s30, %s8121_s30, %s8122_s11  }
   0xe   : > { %7653 = dma.hbm_to_vmem [thread:$0]  (!%p8210_p6), %s288_s21, 4096, %s290_s26, [#allocation7], %s8121_s30, %s8121_s30, %s8122_s11  }
   0xf   : > { %s320_s15 = sshll.u32 %s8123_s12, 4  ;;  %s332_s20 = sshll.u32 %s9437_s8, 4  ;;  %s321_s15 = int_to_ptr.vmem [resolvable:$true] %s320_s15  ;;  %s333_s20 = int_to_ptr.hbm [resolvable:$true] %s332_s20 }
  0x10   : > { %7659 = dma.hbm_to_vmem [thread:$0]  (!%p8210_p6), %s319_s29, 4096, %s321_s15, [#allocation10], %s8121_s30, %s8121_s30, %s8122_s11  }
  0x11   : > { %s8124_s22 = smov [#allocation12]   ;;  %373 = sbr.rel (%p8199_p4) target bundleno = 2380 (0x94c), region = 60 }
  0x12   : > { %s334_s25 = sshll.u32 %s8124_s22, 4  ;;  %s335_s25 = int_to_ptr.vmem [resolvable:$true] %s334_s25 }
  0x13   : > { %7662 = dma.hbm_to_vmem [thread:$0]  (!%p8210_p6), %s333_s20, 4096, %s335_s25, [#allocation13], %s8121_s30, %s8121_s30, %s8122_s11  }
  0x16   : > { %8100 = dma.done.wait (%p7663_p3), [#allocation7], 4096  }
  0x17   : > { %8102 = vsyncadd (%p7663_p3), [#allocation7], 4294963200 }
  0x18   : > { %8104 = dma.done.wait (%p7663_p3), [#allocation10], 8192  }
  0x19   : > { %8106 = vsyncadd (%p7663_p3), [#allocation10], 4294959104 }
  0x1a   : > { %8108 = dma.done.wait (%p7663_p3), [#allocation13], 4096  }
  0x1b   : > { %8110 = vsyncadd (%p7663_p3), [#allocation13], 4294963200  ;;  %s8243_s17 = sshll.u32 %s8190_s14, 2 }
  0x1c   : > { %p430_p7 = scmp.lt.s32.totalorder %s8243_s17, 7 }
  0x1d   : > { %447 = sbr.rel (%p5452_p2) target bundleno = 43 (0x2b), region = 80 }
  0x1e   : > { %s431_s18 = scalar_select %p430_p7, %s8243_s17, 7 }
  0x20   : > { %s7211_s21 = sshll.u32 %s431_s18, 4 }
  0x21   : > { %s8250_s26 = scalar_lea.vmem %s9429_s0, %s7211_s21  ;;  %s8255_s29 = scalar_lea.vmem %s9430_s1, %s7211_s21 }
  0x22   : > { %v8125_v0 = vmov 0.0  }
  0x23   : > { %448 = vst [vmem:[#allocation2] sm:$0xff] %v8125_v0 }
  0x24   : > { %449 = vst [vmem:[#allocation2 + $0x8] sm:$0xff] %v8125_v0 }
  0x25   : > { %450 = vst [vmem:[#allocation3 + $0x8] sm:$0xff] %v8125_v0 }
  0x26   : > { %451 = vst [vmem:[#allocation3] sm:$0xff] %v8125_v0 }
  0x27   : > { %452 = vst [vmem:[#allocation4 + $0x8] sm:$0xff] %v8125_v0 }
  0x28   : > { %453 = vst [vmem:[#allocation4] sm:$0xff] %v8125_v0 }
  0x29   : > { %454 = vst [vmem:[#allocation5] sm:$0xff] %v8125_v0 }
  0x2a   : > { %455 = vst [vmem:[#allocation5 + $0x8] sm:$0xff] %v8125_v0 }
  0x2b PF: > { %v488_v1 = vld [vmem:[%s9431_s2] sm:$0xf]  ;;  %vm522_vm0 = vcmask 1043456   ;;  %v473_v3 = vld [vmem:[%s8255_s29 + $0x8] sm:$0xff]  ;;  %vm509_vm1 = vcmask 64512   ;;  %v474_v10 = vld [vmem:[%s8255_s29 + $0x10] sm:$0xff] }
  0x2c   : > { %v472_v2 = vld [vmem:[%s8255_s29] sm:$0xff]  ;;  %v524_v4 = vsel %vm522_vm0, %v488_v1, 0  ;;  %v481_v6 = vpack.c.bf16 %v473_v3, %v473_v3  ;;  %v475_v11 = vld [vmem:[%s8255_s29 + $0x18] sm:$0xff]  ;;  %v482_v12 = vpack.c.bf16 %v474_v10, %v474_v10  ;;  %v477_v18 = vld [vmem:[%s8255_s29 + $0x28] sm:$0xff]  ;;  %vm574_vm2 = vcmask 130048   ;;  %p6014_p8 = scmp.ge.s32.totalorder %s8243_s17, 6 }
  0x2d   : > { %v480_v5 = vpack.c.bf16 %v472_v2, %v472_v2  ;;  %533 = vmatpush.bf16.msra.mxu0 %v524_v4  ;;  %v483_v13 = vpack.c.bf16 %v475_v11, %v475_v11  ;;  %v476_v17 = vld [vmem:[%s8255_s29 + $0x20] sm:$0xff]  ;;  %v485_v20 = vpack.c.bf16 %v477_v18, %v477_v18  ;;  %v478_v24 = vld [vmem:[%s8255_s29 + $0x30] sm:$0xff]  ;;  %v479_v25 = vld [vmem:[%s8255_s29 + $0x38] sm:$0xff] }
  0x2e   : > { %v498_v8 = vunpack.c.l.b16 %v481_v6  ;;  %v499_v14 = vunpack.c.l.b16 %v482_v12  ;;  %v484_v19 = vpack.c.bf16 %v476_v17, %v476_v17  ;;  %v486_v26 = vpack.c.bf16 %v478_v24, %v478_v24  ;;  %v456_v32 = vld [vmem:[%s8250_s26] sm:$0xff]  ;;  %v457_v33 = vld [vmem:[%s8250_s26 + $0x8] sm:$0xff]  ;;  %v458_v46 = vld [vmem:[%s8250_s26 + $0x10] sm:$0xff] }
  0x2f   : > { %v497_v7 = vunpack.c.l.b16 %v480_v5  ;;  %v500_v15 = vunpack.c.l.b16 %v483_v13  ;;  %v502_v22 = vunpack.c.l.b16 %v485_v20  ;;  %v487_v27 = vpack.c.bf16 %v479_v25, %v479_v25  ;;  %v459_v47 = vld [vmem:[%s8250_s26 + $0x18] sm:$0xff]  ;;  %v460_v60 = vld [vmem:[%s8250_s26 + $0x20] sm:$0xff]  ;;  %v461_v61 = vld [vmem:[%s8250_s26 + $0x28] sm:$0xff] }
  0x30   : > { %v501_v21 = vunpack.c.l.b16 %v484_v19  ;;  %v503_v28 = vunpack.c.l.b16 %v486_v26  ;;  %v464_v34 = vpack.c.bf16 %v456_v32, %v456_v32  ;;  %v465_v35 = vpack.c.bf16 %v457_v33, %v457_v33  ;;  %v462_v10 = vld [vmem:[%s8250_s26 + $0x30] sm:$0xff]  ;;  %v463_v11 = vld [vmem:[%s8250_s26 + $0x38] sm:$0xff] }
  0x31   : > { %v505_v9 = vpack.c.b16 %v498_v8, %v497_v7  ;;  %v506_v16 = vpack.c.b16 %v500_v15, %v499_v14  ;;  %v504_v29 = vunpack.c.l.b16 %v487_v27  ;;  %v466_v48 = vpack.c.bf16 %v458_v46, %v458_v46 }
  0x32   : > { %v507_v23 = vpack.c.b16 %v502_v22, %v501_v21  ;;  %v565_v39 = vunpack.c.l.b16 %v464_v34  ;;  %v566_v40 = vunpack.c.l.b16 %v465_v35  ;;  %v467_v49 = vpack.c.bf16 %v459_v47, %v459_v47 }
  0x33   : > { %5469 = vmatmul.msk.bf16.vlgmr.msra.gmra.mxu0 %vm509_vm1, %v505_v9  ;;  %v508_v30 = vpack.c.b16 %v504_v29, %v503_v28  ;;  %v594_v53 = vunpack.c.l.b16 %v466_v48  ;;  %v468_v62 = vpack.c.bf16 %v460_v60, %v460_v60  ;;  %v469_v63 = vpack.c.bf16 %v461_v61, %v461_v61  ;;  %v5603_v61 = vld [vmem:[#allocation6 + $0xe0] sm:$0xf] }
  0x34   : > { %v8276_v44 = vpack.c.b16 %v566_v40, %v565_v39  ;;  %v595_v54 = vunpack.c.l.b16 %v467_v49  ;;  %v470_v13 = vpack.c.bf16 %v462_v10, %v462_v10  ;;  %v471_v14 = vpack.c.bf16 %v463_v11, %v463_v11  ;;  %v5571_v10 = vld [vmem:[#allocation6 + $0xa0] sm:$0xf]  ;;  %v7236_v11 = vld [vmem:[#allocation6 + $0xac] sm:$0xf0] }
  0x35   : > { %v622_v3 = vunpack.c.l.b16 %v468_v62  ;;  %v623_v4 = vunpack.c.l.b16 %v469_v63  ;;  %v7244_v62 = vld [vmem:[#allocation6 + $0xec] sm:$0xf0]  ;;  %v7243_v63 = vld [vmem:[#allocation6 + $0xec] sm:$0xf] }
  0x36   : > { %v8282_v58 = vpack.c.b16 %v595_v54, %v594_v53  ;;  %v650_v18 = vunpack.c.l.b16 %v470_v13  ;;  %v651_v19 = vunpack.c.l.b16 %v471_v14  ;;  %v7242_v13 = vld [vmem:[#allocation6 + $0xe4] sm:$0xf]  ;;  %v5605_v14 = vld [vmem:[#allocation6 + $0xf0] sm:$0xf0] }
  0x37   : > { %v8288_v8 = vpack.c.b16 %v623_v4, %v622_v3  ;;  %v7240_v3 = vld [vmem:[#allocation6 + $0xcc] sm:$0xf0] }
  0x38   : > { %v8294_v22 = vpack.c.b16 %v651_v19, %v650_v18  ;;  %v5555_v19 = vld [vmem:[#allocation6 + $0x80] sm:$0xf] }
  0x43   : > { %5470 = vmatmul.msk.bf16.gmra.mxu0 %vm509_vm1, %v506_v16 }
  0x53   : > { %5471 = vmatmul.msk.bf16.gmra.mxu0 %vm509_vm1, %v507_v23  ;;  %v7213_v23 = vld [vmem:[%s9432_s3] sm:$0xff] }
  0x63   : > { %5472 = vmatmul.msk.bf16.gmra.mxu0 %vm509_vm1, %v508_v30 }
  0xb0   : > { %v535_v31 = vpop.f32.mrf.mxu0 }
  0xb1   : > { %v555_v36 = vpack.c.bf16 %v535_v31, %v535_v31 }
  0xb3   : > { %v570_v41 = vunpack.c.l.b16 %v555_v36 }
  0xb8   : > { %v537_v37 = vpop.f32.mrf.mxu0 }
  0xb9   : > { %v556_v38 = vpack.c.bf16 %v537_v37, %v537_v37 }
  0xbb   : > { %v571_v42 = vunpack.c.l.b16 %v556_v38 }
  0xbd   : > { %v572_v43 = vpack.c.b16 %v571_v42, %v570_v41 }
  0xbf   : > { %585 = vmatpush.bf16.msra.mxu1 %v572_v43 }
  0xc0   : > { %v540_v45 = vpop.f32.mrf.mxu0 }
  0xc1   : > { %v557_v50 = vpack.c.bf16 %v540_v45, %v540_v45 }
  0xc2   : > { %5473 = vmatmul.msk.bf16.vlgmr.msra.gmra.mxu1 %vm574_vm2, %v8276_v44 }
  0xc3   : > { %v599_v55 = vunpack.c.l.b16 %v557_v50 }
  0xc8   : > { %v542_v51 = vpop.f32.mrf.mxu0 }
  0xc9   : > { %v558_v52 = vpack.c.bf16 %v542_v51, %v542_v51 }
  0xcb   : > { %v600_v56 = vunpack.c.l.b16 %v558_v52 }
  0xcd   : > { %v601_v57 = vpack.c.b16 %v600_v56, %v599_v55 }
  0xcf   : > { %613 = vmatpush.bf16.msra.mxu2 %v601_v57 }
  0xd0   : > { %v545_v59 = vpop.f32.mrf.mxu0 }
  0xd1   : > { %v559_v0 = vpack.c.bf16 %v545_v59, %v545_v59 }
  0xd2   : > { %5474 = vmatmul.msk.bf16.vlgmr.msra.gmra.mxu2 %vm574_vm2, %v8282_v58 }
  0xd3   : > { %v627_v5 = vunpack.c.l.b16 %v559_v0  ;;  %715 = vmatpush.bf16.msrb.mxu2 %v7213_v23  ;;  %v5604_v0 = vor.u32 %v7244_v62, %v5603_v61  ;;  %v5579_v62 = vld [vmem:[#allocation6 + $0xa8] sm:$0xf] }
  0xd5   : > { %1039 = vmatpush.bf16.msrb.mxu0 %v5604_v0 }
  0xd8   : > { %v547_v1 = vpop.f32.mrf.mxu0 }
  0xd9   : > { %v560_v2 = vpack.c.bf16 %v547_v1, %v547_v1  ;;  %v5613_v1 = vld [vmem:[#allocation6 + $0xf8] sm:$0xf0] }
  0xdb   : > { %v628_v6 = vunpack.c.l.b16 %v560_v2  ;;  %v5587_v2 = vld [vmem:[#allocation6 + $0xc0] sm:$0xf] }
  0xdc   : > { %v5588_v4 = vor.u32 %v7240_v3, %v5587_v2  ;;  %v7233_v2 = vld [vmem:[#allocation6 + $0x94] sm:$0xf0] }
  0xdd   : > { %v629_v7 = vpack.c.b16 %v628_v6, %v627_v5  ;;  %v7239_v5 = vld [vmem:[#allocation6 + $0xcc] sm:$0xf]  ;;  %v5597_v6 = vld [vmem:[#allocation6 + $0xd8] sm:$0xf0] }
  0xde   : > { %1040 = vmatpush.bf16.msrb.mxu0 %v5588_v4  ;;  %v7229_v4 = vld [vmem:[#allocation6 + $0x74] sm:$0xf0] }
  0xdf   : > { %641 = vmatpush.bf16.msra.mxu3 %v629_v7  ;;  %v5600_v7 = vor.u32 %v7239_v5, %v5597_v6  ;;  %v5523_v6 = vld [vmem:[#allocation6 + $0x40] sm:$0xf] }
  0xe0   : > { %v550_v9 = vpop.f32.mrf.mxu0 }
  0xe1   : > { %v561_v12 = vpack.c.bf16 %v550_v9, %v550_v9 }
  0xe2   : > { %5475 = vmatmul.msk.bf16.vlgmr.msra.gmra.mxu3 %vm574_vm2, %v8288_v8 }
  0xe3   : > { %v655_v16 = vunpack.c.l.b16 %v561_v12 }
  0xe8   : > { %v552_v15 = vpop.f32.mrf.mxu0 }
  0xe9   : > { %v562_v17 = vpack.c.bf16 %v552_v15, %v552_v15  ;;  %v5572_v15 = vor.u32 %v7236_v11, %v5571_v10  ;;  %v5525_v11 = vld [vmem:[#allocation6 + $0x50] sm:$0xf0] }
  0xeb   : > { %v656_v20 = vunpack.c.l.b16 %v562_v17  ;;  %v5581_v17 = vld [vmem:[#allocation6 + $0xb8] sm:$0xf0]  ;;  %1041 = vmatpush.bf16.msrb.mxu0 %v5572_v15 }
  0xec   : > { %v5533_v15 = vld [vmem:[#allocation6 + $0x58] sm:$0xf0] }
  0xed   : > { %v657_v21 = vpack.c.b16 %v656_v20, %v655_v16  ;;  %v7235_v16 = vld [vmem:[#allocation6 + $0xac] sm:$0xf]  ;;  %v7232_v20 = vld [vmem:[#allocation6 + $0x8c] sm:$0xf0] }
  0xee   : > { %v5584_v18 = vor.u32 %v7235_v16, %v5581_v17  ;;  %v5507_v16 = vld [vmem:[#allocation6 + $0x20] sm:$0xf] }
  0xef   : > { %669 = vmatpush.bf16.msrb.mxu1 %v657_v21 }
  0xf2   : > { %5476 = vmatmul.msk.bf16.vlgmr.msrb.gmra.mxu1 %vm574_vm2, %v8294_v22 }
 0x13f   : > { %v587_v24 = vpop.f32.mrf.mxu1 }
 0x140   : > { %v676_v26 = vmax.f32 %v587_v24, 0.0  ;;  %v5608_v24 = vor.u32 %v7242_v13, %v5605_v14  ;;  %v7225_v13 = vld [vmem:[#allocation6 + $0x54] sm:$0xf0]  ;;  %v7223_v14 = vld [vmem:[#allocation6 + $0x4c] sm:$0xf] }
 0x141   : > { %v5536_v17 = vor.u32 %v7223_v14, %v5533_v15  ;;  %v7273_v14 = vld [vmem:[#allocation9 + $0xd4] sm:$0xf0]  ;;  %v7267_v15 = vld [vmem:[#allocation9 + $0xac] sm:$0xf] }
 0x147   : > { %v589_v25 = vpop.f32.mrf.mxu1 }
 0x148   : > { %v677_v27 = vmax.f32 %v589_v25, 0.0  ;;  %v7231_v25 = vld [vmem:[#allocation6 + $0x8c] sm:$0xf] }
 0x14a   : > { %v684_v28 = vpack.c.bf16 %v677_v27, %v676_v26  ;;  %v5565_v26 = vld [vmem:[#allocation6 + $0x98] sm:$0xf0] }
 0x14c   : > { %5481 = vmatmul.msk.bf16.vlgmr.msrb.gmra.mxu2 %vm574_vm2, %v684_v28  ;;  %v7238_v28 = vld [vmem:[#allocation6 + $0xc4] sm:$0xf] }
 0x155   : > { %v615_v29 = vpop.f32.mrf.mxu2 }
 0x156   : > { %v678_v31 = vmax.f32 %v615_v29, 0.0  ;;  %v5589_v29 = vld [vmem:[#allocation6 + $0xd0] sm:$0xf0] }
 0x15d   : > { %v617_v30 = vpop.f32.mrf.mxu2 }
 0x15e   : > { %v679_v32 = vmax.f32 %v617_v30, 0.0  ;;  %v5556_v30 = vor.u32 %v7232_v20, %v5555_v19  ;;  %v7218_v19 = vld [vmem:[#allocation6 + $0x24] sm:$0xf]  ;;  %v5509_v20 = vld [vmem:[#allocation6 + $0x30] sm:$0xf0] }
 0x160   : > { %v685_v33 = vpack.c.bf16 %v679_v32, %v678_v31  ;;  %v5568_v31 = vor.u32 %v7231_v25, %v5565_v26  ;;  %v5539_v32 = vld [vmem:[#allocation6 + $0x60] sm:$0xf]  ;;  %1042 = vmatpush.bf16.msrb.mxu0 %v5556_v30  ;;  %v7221_v25 = vld [vmem:[#allocation6 + $0x34] sm:$0xf0]  ;;  %v7219_v26 = vld [vmem:[#allocation6 + $0x2c] sm:$0xf] }
 0x161   : > { %v5491_v30 = vld [vmem:[#allocation6] sm:$0xf] }
 0x162   : > { %5482 = vmatmul.msk.bf16.gmra.mxu2 %vm574_vm2, %v685_v33  ;;  %v7228_v33 = vld [vmem:[#allocation6 + $0x6c] sm:$0xf0] }
 0x165   : > { %v643_v34 = vpop.f32.mrf.mxu3 }
 0x166   : > { %v680_v36 = vmax.f32 %v643_v34, 0.0 }
 0x16d   : > { %v645_v35 = vpop.f32.mrf.mxu3 }
 0x16e   : > { %v681_v37 = vmax.f32 %v645_v35, 0.0  ;;  %v5592_v35 = vor.u32 %v7238_v28, %v5589_v29  ;;  %v5517_v28 = vld [vmem:[#allocation6 + $0x38] sm:$0xf0] }
 0x16f   : > { %v671_v38 = vpop.f32.mrf.mxu1  ;;  %v5520_v29 = vor.u32 %v7219_v26, %v5517_v28  ;;  %v7264_v28 = vld [vmem:[#allocation9 + $0x8c] sm:$0xf0] }
 0x170   : > { %v686_v39 = vpack.c.bf16 %v681_v37, %v680_v36  ;;  %v682_v41 = vmax.f32 %v671_v38, 0.0  ;;  %v7227_v36 = vld [vmem:[#allocation6 + $0x6c] sm:$0xf]  ;;  %v5549_v37 = vld [vmem:[#allocation6 + $0x78] sm:$0xf0] }
 0x171   : > { %v7234_v38 = vld [vmem:[#allocation6 + $0xa4] sm:$0xf] }
 0x172   : > { %5483 = vmatmul.msk.bf16.gmra.mxu2 %vm574_vm2, %v686_v39  ;;  %v5573_v39 = vld [vmem:[#allocation6 + $0xb0] sm:$0xf0] }
 0x177   : > { %v673_v40 = vpop.f32.mrf.mxu1 }
 0x178   : > { %v683_v42 = vmax.f32 %v673_v40, 0.0  ;;  %v5540_v40 = vor.u32 %v7228_v33, %v5539_v32  ;;  %v7214_v32 = vld [vmem:[#allocation6 + $0x4] sm:$0xf] }
 0x17a   : > { %v687_v43 = vpack.c.bf16 %v683_v42, %v682_v41  ;;  %v5552_v41 = vor.u32 %v7227_v36, %v5549_v37  ;;  %v5576_v42 = vor.u32 %v7234_v38, %v5573_v39  ;;  %1043 = vmatpush.bf16.msrb.mxu0 %v5540_v40  ;;  %v7217_v36 = vld [vmem:[#allocation6 + $0x14] sm:$0xf0]  ;;  %v7215_v39 = vld [vmem:[#allocation6 + $0xc] sm:$0xf]  ;;  %v5501_v40 = vld [vmem:[#allocation6 + $0x18] sm:$0xf0] }
 0x182   : > { %5484 = vmatmul.msk.bf16.gmra.mxu2 %vm574_vm2, %v687_v43  ;;  %v7230_v43 = vld [vmem:[#allocation6 + $0x84] sm:$0xf] }
 0x1cf   : > { %v717_v45 = vpop.f32.mrf.mxu2 }
 0x1d0   : > { %v737_v46 = vpack.c.bf16 %v717_v45, %v717_v45  ;;  %v5557_v45 = vld [vmem:[#allocation6 + $0x90] sm:$0xf0] }
 0x1d2   : > { %v747_v49 = vunpack.c.l.b16 %v737_v46 }
 0x1d7   : > { %v719_v47 = vpop.f32.mrf.mxu2 }
 0x1d8   : > { %v738_v48 = vpack.c.bf16 %v719_v47, %v719_v47 }
 0x1da   : > { %v748_v50 = vunpack.c.l.b16 %v738_v48  ;;  %v5611_v48 = vld [vmem:[#allocation6 + $0xe8] sm:$0xf] }
 0x1dc   : > { %v749_v51 = vpack.c.b16 %v748_v50, %v747_v49  ;;  %v5560_v49 = vor.u32 %v7230_v43, %v5557_v45  ;;  %v5733_v43 = vld [vmem:[#allocation9 + $0xf0] sm:$0xf0] }
 0x1de   : > { %758 = vmatpush.bf16.msrb.mxu3 %v749_v51  ;;  %v7245_v51 = vld [vmem:[#allocation6 + $0xf4] sm:$0xf0] }
 0x1e1   : > { %5485 = vmatmul.msk.bf16.vlgmr.msrb.gmra.mxu3 %vm574_vm2, %v8276_v44  ;;  %v5616_v44 = vor.u32 %v7243_v63, %v5613_v1  ;;  %v7237_v63 = vld [vmem:[#allocation6 + $0xb4] sm:$0xf0]  ;;  %v5563_v1 = vld [vmem:[#allocation6 + $0x88] sm:$0xf] }
 0x1e2   : > { %v5580_v0 = vor.u32 %v7237_v63, %v5579_v62  ;;  %v5564_v3 = vor.u32 %v7233_v2, %v5563_v1  ;;  %v7272_v62 = vld [vmem:[#allocation9 + $0xcc] sm:$0xf0]  ;;  %v5701_v1 = vld [vmem:[#allocation9 + $0xb0] sm:$0xf0]  ;;  %v5739_v2 = vld [vmem:[#allocation9 + $0xe8] sm:$0xf] }
 0x1e3   : > { %1126 = vmatpush.bf16.msra.mxu2 %v5616_v44  ;;  %v5547_v44 = vld [vmem:[#allocation6 + $0x68] sm:$0xf] }
 0x1e4   : > { %v5548_v5 = vor.u32 %v7229_v4, %v5547_v44  ;;  %v7277_v44 = vld [vmem:[#allocation9 + $0xf4] sm:$0xf0]  ;;  %v7271_v4 = vld [vmem:[#allocation9 + $0xcc] sm:$0xf] }
 0x1e5   : > { %v722_v52 = vpop.f32.mrf.mxu2 }
 0x1e6   : > { %v739_v53 = vpack.c.bf16 %v722_v52, %v722_v52  ;;  %v7226_v52 = vld [vmem:[#allocation6 + $0x64] sm:$0xf] }
 0x1e7   : > { %1127 = vmatpush.bf16.msra.mxu2 %v5600_v7  ;;  %v7224_v7 = vld [vmem:[#allocation6 + $0x4c] sm:$0xf0] }
 0x1e8   : > { %v767_v56 = vunpack.c.l.b16 %v739_v53  ;;  %v5541_v53 = vld [vmem:[#allocation6 + $0x70] sm:$0xf0]  ;;  %v5524_v10 = vor.u32 %v7224_v7, %v5523_v6  ;;  %v5740_v6 = vor.u32 %v7277_v44, %v5739_v2  ;;  %v5699_v7 = vld [vmem:[#allocation9 + $0xa0] sm:$0xf]  ;;  %v5643_v2 = vld [vmem:[#allocation9 + $0x28] sm:$0xf] }
 0x1ea   : > { %1044 = vmatpush.bf16.msrb.mxu0 %v5524_v10  ;;  %v7268_v10 = vld [vmem:[#allocation9 + $0xac] sm:$0xf0] }
 0x1eb   : > { %1128 = vmatpush.bf16.msra.mxu2 %v5584_v18  ;;  %v7220_v18 = vld [vmem:[#allocation6 + $0x2c] sm:$0xf0] }
 0x1ed   : > { %v724_v54 = vpop.f32.mrf.mxu2 }
 0x1ee   : > { %v740_v55 = vpack.c.bf16 %v724_v54, %v724_v54 }
 0x1ef   : > { %1129 = vmatpush.bf16.msra.mxu2 %v5568_v31  ;;  %v7216_v31 = vld [vmem:[#allocation6 + $0xc] sm:$0xf0] }
 0x1f0   : > { %v768_v57 = vunpack.c.l.b16 %v740_v55  ;;  %v5492_v33 = vor.u32 %v7216_v31, %v5491_v30  ;;  %v5669_v31 = vld [vmem:[#allocation9 + $0x70] sm:$0xf0] }
 0x1f2   : > { %v769_v59 = vpack.c.b16 %v768_v57, %v767_v56  ;;  %v5544_v56 = vor.u32 %v7226_v52, %v5541_v53  ;;  %v5717_v52 = vld [vmem:[#allocation9 + $0xd0] sm:$0xf0]  ;;  %v7275_v53 = vld [vmem:[#allocation9 + $0xec] sm:$0xf] }
 0x1f3   : > { %1130 = vmatpush.bf16.msra.mxu2 %v5552_v41  ;;  %v5504_v41 = vor.u32 %v7215_v39, %v5501_v40  ;;  %v5667_v39 = vld [vmem:[#allocation9 + $0x60] sm:$0xf]  ;;  %v7260_v40 = vld [vmem:[#allocation9 + $0x6c] sm:$0xf0] }
 0x1f4   : > { %778 = vmatpush.bf16.msra.mxu1 %v769_v59  ;;  %v5595_v59 = vld [vmem:[#allocation6 + $0xc8] sm:$0xf] }
 0x1f5   : > { %v727_v60 = vpop.f32.mrf.mxu2 }
 0x1f6   : > { %v741_v9 = vpack.c.bf16 %v727_v60, %v727_v60  ;;  %v7241_v60 = vld [vmem:[#allocation6 + $0xd4] sm:$0xf0] }
 0x1f7   : > { %5486 = vmatmul.msk.bf16.vlgmr.msra.gmra.mxu1 %vm574_vm2, %v8282_v58  ;;  %v5596_v61 = vor.u32 %v7241_v60, %v5595_v59  ;;  %1131 = vmatpush.bf16.msra.mxu2 %v5536_v17  ;;  %v5709_v17 = vld [vmem:[#allocation9 + $0xb8] sm:$0xf0] }
 0x1f8   : > { %v787_v21 = vunpack.c.l.b16 %v741_v9  ;;  %v7222_v9 = vld [vmem:[#allocation6 + $0x44] sm:$0xf] }
 0x1fb   : > { %1132 = vmatpush.bf16.msra.mxu2 %v5520_v29  ;;  %v7258_v29 = vld [vmem:[#allocation9 + $0x64] sm:$0xf] }
 0x1fd   : > { %v729_v12 = vpop.f32.mrf.mxu2 }
 0x1fe   : > { %v742_v58 = vpack.c.bf16 %v729_v12, %v729_v12  ;;  %v5531_v12 = vld [vmem:[#allocation6 + $0x48] sm:$0xf] }
 0x1ff   : > { %1133 = vmatpush.bf16.msra.mxu2 %v5504_v41  ;;  %v5675_v41 = vld [vmem:[#allocation9 + $0x68] sm:$0xf] }
 0x200   : > { %v788_v23 = vunpack.c.l.b16 %v742_v58  ;;  %v5528_v58 = vor.u32 %v7222_v9, %v5525_v11  ;;  %v7262_v11 = vld [vmem:[#allocation9 + $0x84] sm:$0xf] }
 0x202   : > { %v789_v27 = vpack.c.b16 %v788_v23, %v787_v21  ;;  %v5508_v21 = vor.u32 %v7220_v18, %v5507_v16  ;;  %v5512_v23 = vor.u32 %v7218_v19, %v5509_v20  ;;  %v5712_v19 = vor.u32 %v7267_v15, %v5709_v17  ;;  %v5707_v20 = vld [vmem:[#allocation9 + $0xa8] sm:$0xf] }
 0x203   : > { %v5627_v17 = vld [vmem:[#allocation9 + $0x8] sm:$0xf] }
 0x204   : > { %798 = vmatpush.bf16.msra.mxu3 %v789_v27  ;;  %1045 = vmatpush.bf16.msrb.mxu0 %v5508_v21  ;;  %v7269_v21 = vld [vmem:[#allocation9 + $0xb4] sm:$0xf0] }
 0x205   : > { %v732_v34 = vpop.f32.mrf.mxu2  ;;  %v5708_v26 = vor.u32 %v7269_v21, %v5707_v20 }
 0x206   : > { %v743_v46 = vpack.c.bf16 %v732_v34, %v732_v34  ;;  %v5493_v34 = vld [vmem:[#allocation6 + $0x10] sm:$0xf0] }
 0x207   : > { %5487 = vmatmul.msk.bf16.vlgmr.msra.gmra.mxu3 %vm574_vm2, %v8288_v8  ;;  %v5612_v8 = vor.u32 %v7245_v51, %v5611_v48  ;;  %v5496_v37 = vor.u32 %v7214_v32, %v5493_v34  ;;  %v7276_v48 = vld [vmem:[#allocation9 + $0xec] sm:$0xf0]  ;;  %v5691_v32 = vld [vmem:[#allocation9 + $0x88] sm:$0xf]  ;;  %v5672_v34 = vor.u32 %v7258_v29, %v5669_v31 }
 0x208   : > { %1068 = vmatpush.bf16.msrb.mxu3 %v5608_v24  ;;  %v807_v54 = vunpack.c.l.b16 %v743_v46  ;;  %v5515_v24 = vld [vmem:[#allocation6 + $0x28] sm:$0xf]  ;;  %1046 = vmatpush.bf16.msrb.mxu0 %v5492_v33  ;;  %v7265_v33 = vld [vmem:[#allocation9 + $0x94] sm:$0xf0] }
 0x209   : > { %v5516_v27 = vor.u32 %v7221_v25, %v5515_v24  ;;  %v1156_v31 = vld [vmem:[#allocation2 + $0x8] sm:$0xff] }
 0x20c   : > { %1069 = vmatpush.bf16.msrb.mxu3 %v5592_v35  ;;  %v5499_v35 = vld [vmem:[#allocation6 + $0x8] sm:$0xf] }
 0x20d   : > { %v734_v47 = vpop.f32.mrf.mxu2  ;;  %v5500_v38 = vor.u32 %v7217_v36, %v5499_v35  ;;  %v7263_v35 = vld [vmem:[#allocation9 + $0x8c] sm:$0xf]  ;;  %v5693_v36 = vld [vmem:[#allocation9 + $0x98] sm:$0xf0] }
 0x20e   : > { %v744_v50 = vpack.c.bf16 %v734_v47, %v734_v47  ;;  %v5731_v47 = vld [vmem:[#allocation9 + $0xe0] sm:$0xf] }
 0x20f   : > { %v5732_v51 = vor.u32 %v7276_v48, %v5731_v47 }
 0x210   : > { %1070 = vmatpush.bf16.msrb.mxu3 %v5576_v42  ;;  %v808_v55 = vunpack.c.l.b16 %v744_v50  ;;  %v7274_v42 = vld [vmem:[#allocation9 + $0xe4] sm:$0xf] }
 0x211   : > { %v5736_v45 = vor.u32 %v7274_v42, %v5733_v43  ;;  %1350 = vmatpush.bf16.msra.mxu0 %v5732_v51  ;;  %v5668_v42 = vor.u32 %v7260_v40, %v5667_v39  ;;  %v7261_v43 = vld [vmem:[#allocation9 + $0x74] sm:$0xf0]  ;;  %v7254_v51 = vld [vmem:[#allocation9 + $0x44] sm:$0xf]  ;;  %v869_v39 = vld [vmem:[%s9435_s6] sm:$0xf] }
 0x212   : > { %v809_v57 = vpack.c.b16 %v808_v55, %v807_v54  ;;  %v5741_v54 = vld [vmem:[#allocation9 + $0xf8] sm:$0xf0]  ;;  %v5676_v47 = vor.u32 %v7261_v43, %v5675_v41  ;;  %v8330_v41 = vperm.slane %v869_v39, 0  ;;  %v8334_v43 = vperm.slane %v869_v39, 2 }
 0x214   : > { %1071 = vmatpush.bf16.msrb.mxu3 %v5560_v49  ;;  %818 = vmatpush.bf16.msrb.mxu1 %v809_v57  ;;  %v7270_v49 = vld [vmem:[#allocation9 + $0xc4] sm:$0xf]  ;;  %v5744_v57 = vor.u32 %v7275_v53, %v5741_v54  ;;  %v5653_v53 = vld [vmem:[#allocation9 + $0x50] sm:$0xf0]  ;;  %v5659_v54 = vld [vmem:[#allocation9 + $0x48] sm:$0xf] }
 0x216   : > { %1392 = vmatpush.bf16.msrb.mxu2 %v5744_v57  ;;  %v7255_v57 = vld [vmem:[#allocation9 + $0x4c] sm:$0xf] }
 0x217   : > { %5488 = vmatmul.msk.bf16.vlgmr.msrb.gmra.mxu1 %vm574_vm2, %v8294_v22  ;;  %v5532_v22 = vor.u32 %v7225_v13, %v5531_v12  ;;  %v5685_v12 = vld [vmem:[#allocation9 + $0x90] sm:$0xf0]  ;;  %v5700_v13 = vor.u32 %v7268_v10, %v5699_v7  ;;  %v5619_v7 = vld [vmem:[#allocation9] sm:$0xf]  ;;  %v7248_v10 = vld [vmem:[#allocation9 + $0xc] sm:$0xf0] }
 0x218   : > { %1097 = vmatpush.bf16.msra.mxu1 %v5612_v8  ;;  %1072 = vmatpush.bf16.msrb.mxu3 %v5544_v56  ;;  %v5720_v56 = vor.u32 %v7270_v49, %v5717_v52  ;;  %v5651_v49 = vld [vmem:[#allocation9 + $0x40] sm:$0xf]  ;;  %v5620_v15 = vor.u32 %v7248_v10, %v5619_v7 }
 0x21c   : > { %1098 = vmatpush.bf16.msra.mxu1 %v5596_v61  ;;  %1073 = vmatpush.bf16.msrb.mxu3 %v5528_v58  ;;  %v5715_v61 = vld [vmem:[#allocation9 + $0xc0] sm:$0xf]  ;;  %v5688_v58 = vor.u32 %v7262_v11, %v5685_v12  ;;  %v7246_v11 = vld [vmem:[#allocation9 + $0x4] sm:$0xf]  ;;  %v5621_v12 = vld [vmem:[#allocation9 + $0x10] sm:$0xf0] }
 0x21d   : > { %v5716_v63 = vor.u32 %v7272_v62, %v5715_v61 }
 0x21f   : > { %1351 = vmatpush.bf16.msra.mxu0 %v5716_v63  ;;  %v7252_v63 = vld [vmem:[#allocation9 + $0x2c] sm:$0xf0] }
 0x220   : > { %1099 = vmatpush.bf16.msra.mxu1 %v5580_v0  ;;  %1074 = vmatpush.bf16.msrb.mxu3 %v5512_v23  ;;  %v7266_v0 = vld [vmem:[#allocation9 + $0xa4] sm:$0xf] }
 0x223   : > { %1352 = vmatpush.bf16.msra.mxu0 %v5700_v13 }
 0x224   : > { %1100 = vmatpush.bf16.msra.mxu1 %v5564_v3  ;;  %1075 = vmatpush.bf16.msrb.mxu3 %v5496_v37  ;;  %v5704_v3 = vor.u32 %v7266_v0, %v5701_v1  ;;  %v5696_v37 = vor.u32 %v7263_v35, %v5693_v36  ;;  %v7250_v0 = vld [vmem:[#allocation9 + $0x24] sm:$0xf]  ;;  %v5637_v1 = vld [vmem:[#allocation9 + $0x30] sm:$0xf0] }
 0x228   : > { %1101 = vmatpush.bf16.msra.mxu1 %v5548_v5  ;;  %1364 = vmatpush.bf16.msra.mxu3 %v5736_v45  ;;  %v5725_v5 = vld [vmem:[#allocation9 + $0xd8] sm:$0xf0]  ;;  %v7259_v45 = vld [vmem:[#allocation9 + $0x6c] sm:$0xf] }
 0x229   : > { %v5728_v9 = vor.u32 %v7271_v4, %v5725_v5  ;;  %v5640_v4 = vor.u32 %v7250_v0, %v5637_v1  ;;  %v7251_v5 = vld [vmem:[#allocation9 + $0x2c] sm:$0xf] }
 0x22b   : > { %1393 = vmatpush.bf16.msrb.mxu2 %v5728_v9 }
 0x22c   : > { %1102 = vmatpush.bf16.msra.mxu1 %v5532_v22  ;;  %1365 = vmatpush.bf16.msra.mxu3 %v5720_v56  ;;  %v5723_v22 = vld [vmem:[#allocation9 + $0xc8] sm:$0xf]  ;;  %v5656_v56 = vor.u32 %v7254_v51, %v5653_v53 }
 0x22d   : > { %v5724_v16 = vor.u32 %v7273_v14, %v5723_v22  ;;  %v5624_v22 = vor.u32 %v7246_v11, %v5621_v12  ;;  %v5629_v14 = vld [vmem:[#allocation9 + $0x18] sm:$0xf0] }
 0x22f   : > { %1394 = vmatpush.bf16.msrb.mxu2 %v5712_v19 }
 0x230   : > { %1103 = vmatpush.bf16.msra.mxu1 %v5516_v27  ;;  %1366 = vmatpush.bf16.msra.mxu3 %v5704_v3  ;;  %v5683_v27 = vld [vmem:[#allocation9 + $0x80] sm:$0xf]  ;;  %v7253_v3 = vld [vmem:[#allocation9 + $0x34] sm:$0xf0] }
 0x231   : > { %v5684_v30 = vor.u32 %v7264_v28, %v5683_v27  ;;  %v5644_v13 = vor.u32 %v7253_v3, %v5643_v2 }
 0x233   : > { %1353 = vmatpush.bf16.msra.mxu0 %v5684_v30  ;;  %1395 = vmatpush.bf16.msrb.mxu2 %v5696_v37  ;;  %v1155_v30 = vld [vmem:[#allocation2] sm:$0xff] }
 0x234   : > { %1104 = vmatpush.bf16.msra.mxu1 %v5500_v38  ;;  %1367 = vmatpush.bf16.msra.mxu3 %v5688_v58  ;;  %v5692_v38 = vor.u32 %v7265_v33, %v5691_v32  ;;  %v7247_v58 = vld [vmem:[#allocation9 + $0xc] sm:$0xf]  ;;  %v1157_v32 = vpack.c.bf16 %v1156_v31, %v1155_v30  ;;  %v5849_v30 = vld [vmem:[#allocation11 + $0xc0] sm:$0xf]  ;;  %v7304_v31 = vld [vmem:[#allocation11 + $0xcc] sm:$0xf0] }
 0x235   : > { %v5632_v19 = vor.u32 %v7247_v58, %v5629_v14 }
 0x237   : > { %1354 = vmatpush.bf16.msra.mxu0 %v5668_v42 }
 0x238   : > { %1378 = vmatpush.bf16.msrb.mxu1 %v5740_v6  ;;  %1368 = vmatpush.bf16.msra.mxu3 %v5672_v34  ;;  %v5645_v6 = vld [vmem:[#allocation9 + $0x38] sm:$0xf0] }
 0x239   : > { %v5648_v9 = vor.u32 %v7251_v5, %v5645_v6 }
 0x23c   : > { %1379 = vmatpush.bf16.msrb.mxu1 %v5724_v16  ;;  %1369 = vmatpush.bf16.msra.mxu3 %v5656_v56 }
 0x240   : > { %1380 = vmatpush.bf16.msrb.mxu1 %v5708_v26  ;;  %1370 = vmatpush.bf16.msra.mxu3 %v5640_v4 }
 0x244   : > { %1381 = vmatpush.bf16.msrb.mxu1 %v5692_v38  ;;  %1371 = vmatpush.bf16.msra.mxu3 %v5624_v22 }
 0x248   : > { %1382 = vmatpush.bf16.msrb.mxu1 %v5676_v47 }
 0x264   : > { %v760_v46 = vpop.f32.mrf.mxu3 }
 0x265   : > { %v825_v55 = vmax.f32 %v760_v46, 0.0  ;;  %v5677_v46 = vld [vmem:[#allocation9 + $0x78] sm:$0xf0] }
 0x266   : > { %v5680_v48 = vor.u32 %v7259_v45, %v5677_v46 }
 0x268   : > { %1396 = vmatpush.bf16.msrb.mxu2 %v5680_v48 }
 0x26c   : > { %v762_v50 = vpop.f32.mrf.mxu3 }
 0x26d   : > { %v826_v8 = vmax.f32 %v762_v50, 0.0  ;;  %v7256_v50 = vld [vmem:[#allocation9 + $0x4c] sm:$0xf0] }
 0x26e   : > { %v5652_v52 = vor.u32 %v7256_v50, %v5651_v49  ;;  %v8342_v49 = vperm.slane %v869_v39, 1  ;;  %v8344_v50 = vperm.slane %v869_v39, 3 }
 0x26f   : > { %v833_v59 = vpack.c.bf16 %v826_v8, %v825_v55  ;;  %v7257_v55 = vld [vmem:[#allocation9 + $0x54] sm:$0xf0] }
 0x270   : > { %v5660_v61 = vor.u32 %v7257_v55, %v5659_v54  ;;  %1355 = vmatpush.bf16.msra.mxu0 %v5652_v52 }
 0x271   : > { %1047 = vmatmul.bf16.vlgmr.msrb.gmra.mxu0 %v833_v59  ;;  %1076 = vmatmul.bf16.vlgmr.msrb.gmra.mxu3 %v833_v59 }
 0x272   : > { %1105 = vmatmul.bf16.vlgmr.msra.gmra.mxu1 %v833_v59  ;;  %1134 = vmatmul.bf16.vlgmr.msra.gmra.mxu2 %v833_v59  ;;  %v5661_v59 = vld [vmem:[#allocation9 + $0x58] sm:$0xf0] }
 0x273   : > { %v5664_v62 = vor.u32 %v7255_v57, %v5661_v59  ;;  %1383 = vmatpush.bf16.msrb.mxu1 %v5660_v61 }
 0x274   : > { %v780_v60 = vpop.f32.mrf.mxu1 }
 0x275   : > { %v827_v23 = vmax.f32 %v780_v60, 0.0  ;;  %v5635_v60 = vld [vmem:[#allocation9 + $0x20] sm:$0xf]  ;;  %1397 = vmatpush.bf16.msrb.mxu2 %v5664_v62 }
 0x276   : > { %v5636_v44 = vor.u32 %v7252_v63, %v5635_v60 }
 0x277   : > { %1384 = vmatpush.bf16.msrb.mxu1 %v5644_v13 }
 0x278   : > { %1356 = vmatpush.bf16.msra.mxu0 %v5636_v44 }
 0x279   : > { %1398 = vmatpush.bf16.msrb.mxu2 %v5648_v9 }
 0x27c   : > { %v782_v18 = vpop.f32.mrf.mxu1  ;;  %1357 = vmatpush.bf16.msra.mxu0 %v5620_v15 }
 0x27d   : > { %v828_v24 = vmax.f32 %v782_v18, 0.0  ;;  %v7249_v18 = vld [vmem:[#allocation9 + $0x14] sm:$0xf0]  ;;  %1399 = vmatpush.bf16.msrb.mxu2 %v5632_v19 }
 0x27f   : > { %v834_v25 = vpack.c.bf16 %v828_v24, %v827_v23 }
 0x281   : > { %1052 = vmatmul.bf16.gmra.mxu0 %v834_v25  ;;  %1081 = vmatmul.bf16.gmra.mxu3 %v834_v25 }
 0x282   : > { %1110 = vmatmul.bf16.gmra.mxu1 %v834_v25  ;;  %1139 = vmatmul.bf16.gmra.mxu2 %v834_v25  ;;  %v5628_v25 = vor.u32 %v7249_v18, %v5627_v17  ;;  %v7308_v17 = vld [vmem:[#allocation11 + $0xec] sm:$0xf0]  ;;  %v7306_v18 = vld [vmem:[#allocation11 + $0xe4] sm:$0xf] }
 0x284   : > { %1385 = vmatpush.bf16.msrb.mxu1 %v5628_v25 }
 0x28a   : > { %v800_v8 = vpop.f32.mrf.mxu3 }
 0x28b   : > { %v829_v20 = vmax.f32 %v800_v8, 0.0 }
 0x292   : > { %v802_v16 = vpop.f32.mrf.mxu3 }
 0x293   : > { %v830_v21 = vmax.f32 %v802_v16, 0.0  ;;  %v5865_v16 = vld [vmem:[#allocation11 + $0xe0] sm:$0xf] }
 0x294   : > { %v820_v23 = vpop.f32.mrf.mxu1 }
 0x295   : > { %v835_v24 = vpack.c.bf16 %v830_v21, %v829_v20  ;;  %v831_v28 = vmax.f32 %v820_v23, 0.0  ;;  %v5866_v20 = vor.u32 %v7308_v17, %v5865_v16  ;;  %v5867_v21 = vld [vmem:[#allocation11 + $0xf0] sm:$0xf0]  ;;  %v5873_v23 = vld [vmem:[#allocation11 + $0xe8] sm:$0xf] }
 0x296   : > { %v5870_v25 = vor.u32 %v7306_v18, %v5867_v21  ;;  %v5835_v18 = vld [vmem:[#allocation11 + $0xb0] sm:$0xf0]  ;;  %v7301_v21 = vld [vmem:[#allocation11 + $0xb4] sm:$0xf0] }
 0x297   : > { %1057 = vmatmul.bf16.gmra.mxu0 %v835_v24  ;;  %1086 = vmatmul.bf16.gmra.mxu3 %v835_v24 }
 0x298   : > { %1115 = vmatmul.bf16.gmra.mxu1 %v835_v24  ;;  %1144 = vmatmul.bf16.gmra.mxu2 %v835_v24  ;;  %v7309_v24 = vld [vmem:[#allocation11 + $0xf4] sm:$0xf0] }
 0x299   : > { %1745 = vmatpush.bf16.msrb.mxu0 %v5866_v20  ;;  %1759 = vmatpush.bf16.msrb.mxu3 %v5870_v25  ;;  %v5841_v20 = vld [vmem:[#allocation11 + $0xa8] sm:$0xf]  ;;  %v7299_v25 = vld [vmem:[#allocation11 + $0xac] sm:$0xf] }
 0x29c   : > { %v822_v26 = vpop.f32.mrf.mxu1 }
 0x29d   : > { %v832_v27 = vmax.f32 %v822_v26, 0.0  ;;  %v5874_v26 = vor.u32 %v7309_v24, %v5873_v23  ;;  %v5842_v24 = vor.u32 %v7301_v21, %v5841_v20  ;;  %v5809_v20 = vld [vmem:[#allocation11 + $0x68] sm:$0xf]  ;;  %v7293_v21 = vld [vmem:[#allocation11 + $0x74] sm:$0xf0] }
 0x29f   : > { %v836_v29 = vpack.c.bf16 %v832_v27, %v831_v28  ;;  %v7307_v27 = vld [vmem:[#allocation11 + $0xec] sm:$0xf]  ;;  %v5875_v28 = vld [vmem:[#allocation11 + $0xf8] sm:$0xf0]  ;;  %1773 = vmatpush.bf16.msra.mxu1 %v5874_v26 }
 0x2a0   : > { %v5843_v26 = vld [vmem:[#allocation11 + $0xb8] sm:$0xf0] }
 0x2a7   : > { %1062 = vmatmul.bf16.gmra.mxu0 %v836_v29  ;;  %1091 = vmatmul.bf16.gmra.mxu3 %v836_v29 }
 0x2a8   : > { %1120 = vmatmul.bf16.gmra.mxu1 %v836_v29  ;;  %1149 = vmatmul.bf16.gmra.mxu2 %v836_v29  ;;  %v5878_v29 = vor.u32 %v7307_v27, %v5875_v28  ;;  %v5846_v27 = vor.u32 %v7299_v25, %v5843_v26  ;;  %v5817_v28 = vld [vmem:[#allocation11 + $0x80] sm:$0xf]  ;;  %v5810_v25 = vor.u32 %v7293_v21, %v5809_v20  ;;  %v7291_v26 = vld [vmem:[#allocation11 + $0x6c] sm:$0xf]  ;;  %v7284_v20 = vld [vmem:[#allocation11 + $0x2c] sm:$0xf0] }
 0x2aa   : > { %1787 = vmatpush.bf16.msra.mxu2 %v5878_v29  ;;  %v7296_v29 = vld [vmem:[#allocation11 + $0x8c] sm:$0xf0] }
 0x2b7   : > { %1358 = vmatmul.bf16.vlgmr.msra.gmra.mxu0 %v1157_v32  ;;  %1372 = vmatmul.bf16.vlgmr.msra.gmra.mxu3 %v1157_v32 }
 0x2b8   : > { %1386 = vmatmul.bf16.vlgmr.msrb.gmra.mxu1 %v1157_v32  ;;  %1400 = vmatmul.bf16.vlgmr.msrb.gmra.mxu2 %v1157_v32  ;;  %v7302_v32 = vld [vmem:[#allocation11 + $0xc4] sm:$0xf] }
 0x2ee   : > { %v8313_v33 = vpop.f32.mrf.mxu0 }
 0x2ef   : > { %v8315_v34 = vpop.f32.mrf.mxu1 }
 0x2f4   : > { %v8317_v35 = vpop.f32.mrf.mxu3 }
 0x2f5   : > { %v8319_v36 = vpop.f32.mrf.mxu2 }
 0x2f6   : > { %v8321_v37 = vpop.f32.mrf.mxu0 }
 0x2f7   : > { %v8323_v38 = vpop.f32.mrf.mxu1 }
 0x2fc   : > { %v8328_v40 = vpop.f32.mrf.mxu3 }
 0x2fd   : > { %v8332_v42 = vpop.f32.mrf.mxu2 }
 0x2fe   : > { %v1053_v45 = vpop.f32.mrf.mxu0 }
 0x2ff   : > { %v8337_v46 = vadd.f32 %v1053_v45, %v8330_v41  ;;  %v1111_v47 = vpop.f32.mrf.mxu1  ;;  %v5850_v45 = vor.u32 %v7304_v31, %v5849_v30  ;;  %v7294_v30 = vld [vmem:[#allocation11 + $0x84] sm:$0xf] }
 0x300   : > { %v8340_v48 = vadd.f32 %v1111_v47, %v8334_v43  ;;  %v5851_v47 = vld [vmem:[#allocation11 + $0xd0] sm:$0xf0] }
 0x301   : > { %1746 = vmatpush.bf16.msrb.mxu0 %v5850_v45  ;;  %v5825_v45 = vld [vmem:[#allocation11 + $0x88] sm:$0xf] }
 0x304   : > { %v1082_v51 = vpop.f32.mrf.mxu3 }
 0x305   : > { %v8347_v52 = vadd.f32 %v1082_v51, %v8342_v49  ;;  %v1140_v53 = vpop.f32.mrf.mxu2  ;;  %v5857_v51 = vld [vmem:[#allocation11 + $0xc8] sm:$0xf] }
 0x306   : > { %v8350_v54 = vadd.f32 %v1140_v53, %v8344_v50  ;;  %v1055_v55 = vpop.f32.mrf.mxu0  ;;  %v7305_v53 = vld [vmem:[#allocation11 + $0xd4] sm:$0xf0] }
 0x307   : > { %v8353_v8 = vadd.f32 %v1055_v55, %v8330_v41  ;;  %v1113_v56 = vpop.f32.mrf.mxu1 }
 0x308   : > { %v8356_v57 = vadd.f32 %v1113_v56, %v8334_v43 }
 0x30c   : > { %v1084_v59 = vpop.f32.mrf.mxu3 }
 0x30d   : > { %v8359_v60 = vadd.f32 %v1084_v59, %v8342_v49  ;;  %v1142_v61 = vpop.f32.mrf.mxu2  ;;  %v5854_v59 = vor.u32 %v7302_v32, %v5851_v47  ;;  %v5818_v32 = vor.u32 %v7296_v29, %v5817_v28  ;;  %v7297_v47 = vld [vmem:[#allocation11 + $0x94] sm:$0xf0]  ;;  %v1078_v29 = vadd.f32 %v8317_v35, %v8342_v49 }
 0x30e   : > { %v8362_v62 = vadd.f32 %v1142_v61, %v8344_v50  ;;  %v5858_v61 = vor.u32 %v7305_v53, %v5857_v51  ;;  %v1049_v51 = vadd.f32 %v8313_v33, %v8330_v41  ;;  %v7290_v33 = vld [vmem:[#allocation11 + $0x64] sm:$0xf] }
 0x30f   : > { %1760 = vmatpush.bf16.msrb.mxu3 %v5854_v59 }
 0x310   : > { %1774 = vmatpush.bf16.msra.mxu1 %v5858_v61  ;;  %v5826_v61 = vor.u32 %v7297_v47, %v5825_v45 }
 0x314   : > { %v1058_v63 = vpop.f32.mrf.mxu0  ;;  %1775 = vmatpush.bf16.msra.mxu1 %v5842_v24 }
 0x315   : > { %v8365_v0 = vadd.f32 %v1058_v63, %v8330_v41  ;;  %v1116_v1 = vpop.f32.mrf.mxu1  ;;  %v7303_v63 = vld [vmem:[#allocation11 + $0xcc] sm:$0xf] }
 0x316   : > { %v8368_v2 = vadd.f32 %v1116_v1, %v8334_v43  ;;  %v5859_v1 = vld [vmem:[#allocation11 + $0xd8] sm:$0xf0] }
 0x318   : > { %1776 = vmatpush.bf16.msra.mxu1 %v5826_v61  ;;  %v1051_v61 = vadd.f32 %v8321_v37, %v8330_v41  ;;  %v7282_v37 = vld [vmem:[#allocation11 + $0x24] sm:$0xf] }
 0x31a   : > { %v1087_v3 = vpop.f32.mrf.mxu3 }
 0x31b   : > { %v8371_v44 = vadd.f32 %v1087_v3, %v8342_v49  ;;  %v1145_v4 = vpop.f32.mrf.mxu2 }
 0x31c   : > { %v8374_v5 = vadd.f32 %v1145_v4, %v8344_v50  ;;  %v1060_v6 = vpop.f32.mrf.mxu0  ;;  %1777 = vmatpush.bf16.msra.mxu1 %v5810_v25 }
 0x31d   : > { %v8377_v7 = vadd.f32 %v1060_v6, %v8330_v41  ;;  %v1118_v9 = vpop.f32.mrf.mxu1  ;;  %v5862_v6 = vor.u32 %v7303_v63, %v5859_v1  ;;  %v7295_v63 = vld [vmem:[#allocation11 + $0x8c] sm:$0xf]  ;;  %v5827_v1 = vld [vmem:[#allocation11 + $0x98] sm:$0xf0] }
 0x31e   : > { %v8380_v10 = vadd.f32 %v1118_v9, %v8334_v43 }
 0x31f   : > { %1788 = vmatpush.bf16.msra.mxu2 %v5862_v6 }
 0x322   : > { %v1089_v11 = vpop.f32.mrf.mxu3 }
 0x323   : > { %v8383_v12 = vadd.f32 %v1089_v11, %v8342_v49  ;;  %v1147_v13 = vpop.f32.mrf.mxu2  ;;  %1789 = vmatpush.bf16.msra.mxu2 %v5846_v27  ;;  %v5811_v27 = vld [vmem:[#allocation11 + $0x78] sm:$0xf0] }
 0x324   : > { %v8386_v58 = vadd.f32 %v1147_v13, %v8344_v50  ;;  %v1063_v22 = vpop.f32.mrf.mxu0  ;;  %v5833_v13 = vld [vmem:[#allocation11 + $0xa0] sm:$0xf]  ;;  %v5814_v28 = vor.u32 %v7291_v26, %v5811_v27 }
 0x325   : > { %v8389_v14 = vadd.f32 %v1063_v22, %v8330_v41  ;;  %v1121_v15 = vpop.f32.mrf.mxu1  ;;  %v7300_v22 = vld [vmem:[#allocation11 + $0xac] sm:$0xf0] }
 0x326   : > { %v8392_v19 = vadd.f32 %v1121_v15, %v8334_v43  ;;  %v7298_v15 = vld [vmem:[#allocation11 + $0xa4] sm:$0xf]  ;;  %v5834_v17 = vor.u32 %v7300_v22, %v5833_v13  ;;  %v5801_v22 = vld [vmem:[#allocation11 + $0x60] sm:$0xf] }
 0x327   : > { %v5838_v23 = vor.u32 %v7298_v15, %v5835_v18  ;;  %v7292_v15 = vld [vmem:[#allocation11 + $0x6c] sm:$0xf0]  ;;  %v5803_v18 = vld [vmem:[#allocation11 + $0x70] sm:$0xf0] }
 0x328   : > { %9442 = vst [vmem:[#allocation19_spill] sm:$0xff] %v8392_v19  ;;  %1747 = vmatpush.bf16.msrb.mxu0 %v5834_v17  ;;  %v5802_v17 = vor.u32 %v7292_v15, %v5801_v22  ;;  %v5806_v24 = vor.u32 %v7290_v33, %v5803_v18  ;;  %v5769_v18 = vld [vmem:[#allocation11 + $0x20] sm:$0xf] }
 0x329   : > { %1761 = vmatpush.bf16.msrb.mxu3 %v5838_v23 }
 0x32a   : > { %v1092_v39 = vpop.f32.mrf.mxu3 }
 0x32b   : > { %v8395_v55 = vadd.f32 %v1092_v39, %v8342_v49  ;;  %v1150_v56 = vpop.f32.mrf.mxu2  ;;  %v5819_v39 = vld [vmem:[#allocation11 + $0x90] sm:$0xf0] }
 0x32c   : > { %v8398_v3 = vadd.f32 %v1150_v56, %v8344_v50  ;;  %v1065_v4 = vpop.f32.mrf.mxu0  ;;  %v5822_v59 = vor.u32 %v7294_v30, %v5819_v39  ;;  %1748 = vmatpush.bf16.msrb.mxu0 %v5818_v32  ;;  %v5785_v30 = vld [vmem:[#allocation11 + $0x40] sm:$0xf]  ;;  %v7286_v32 = vld [vmem:[#allocation11 + $0x44] sm:$0xf]  ;;  %v1136_v39 = vadd.f32 %v8319_v36, %v8344_v50 }
 0x32d   : > { %v8401_v9 = vadd.f32 %v1065_v4, %v8330_v41  ;;  %v1123_v11 = vpop.f32.mrf.mxu1  ;;  %v5771_v41 = vld [vmem:[#allocation11 + $0x30] sm:$0xf0] }
 0x32e   : > { %v8404_v16 = vadd.f32 %v1123_v11, %v8334_v43  ;;  %v5830_v11 = vor.u32 %v7295_v63, %v5827_v1  ;;  %1762 = vmatpush.bf16.msrb.mxu3 %v5822_v59  ;;  %v7289_v59 = vld [vmem:[#allocation11 + $0x54] sm:$0xf0]  ;;  %v5774_v27 = vor.u32 %v7282_v37, %v5771_v41  ;;  %v7338_v37 = vld [vmem:[#allocation12 + $0xe4] sm:$0xf] }
 0x330   : > { %9443 = vst [vmem:[#allocation20_spill] sm:$0xff] %v8404_v16  ;;  %1790 = vmatpush.bf16.msra.mxu2 %v5830_v11  ;;  %1749 = vmatpush.bf16.msrb.mxu0 %v5802_v17  ;;  %v7287_v11 = vld [vmem:[#allocation11 + $0x4c] sm:$0xf] }
 0x332   : > { %v1094_v31 = vpop.f32.mrf.mxu3  ;;  %1763 = vmatpush.bf16.msrb.mxu3 %v5806_v24 }
 0x333   : > { %v8409_v53 = vadd.f32 %v1094_v31, %v8342_v49  ;;  %v1152_v56 = vpop.f32.mrf.mxu2  ;;  %v7288_v31 = vld [vmem:[#allocation11 + $0x4c] sm:$0xf0] }
 0x334   : > { %v8412_v4 = vadd.f32 %v1152_v56, %v8344_v50  ;;  %v1359_v6 = vpop.f32.mrf.mxu0  ;;  %1791 = vmatpush.bf16.msra.mxu2 %v5814_v28  ;;  %v5786_v47 = vor.u32 %v7288_v31, %v5785_v30  ;;  %v5793_v56 = vld [vmem:[#allocation11 + $0x48] sm:$0xf]  ;;  %v1107_v30 = vadd.f32 %v8315_v34, %v8334_v43 }
 0x335   : > { %v1406_v13 = vadd.f32 %v1359_v6, %v1049_v51  ;;  %v5787_v51 = vld [vmem:[#allocation11 + $0x50] sm:$0xf0]  ;;  %v5794_v6 = vor.u32 %v7289_v59, %v5793_v56  ;;  %v1387_v25 = vpop.f32.mrf.mxu1  ;;  %v5777_v28 = vld [vmem:[#allocation11 + $0x28] sm:$0xf]  ;;  %v5753_v56 = vld [vmem:[#allocation11] sm:$0xf] }
 0x336   : > { %9444 = vst [vmem:[#allocation21_spill] sm:$0xff] %v8412_v4  ;;  %v5790_v1 = vor.u32 %v7286_v32, %v5787_v51  ;;  %1750 = vmatpush.bf16.msrb.mxu0 %v5786_v47  ;;  %v1080_v47 = vadd.f32 %v8328_v40, %v8342_v49  ;;  %v7280_v59 = vld [vmem:[#allocation11 + $0xc] sm:$0xf0]  ;;  %v1408_v34 = vadd.f32 %v1387_v25, %v1107_v30  ;;  %v5761_v49 = vld [vmem:[#allocation11 + $0x8] sm:$0xf] }
 0x337   : > { %v5745_v23 = vmul.f32 -1.442695, %v1406_v13  ;;  %v5795_v13 = vld [vmem:[#allocation11 + $0x58] sm:$0xf0]  ;;  %1778 = vmatpush.bf16.msra.mxu1 %v5794_v6 }
 0x338   : > { %v5798_v33 = vor.u32 %v7287_v11, %v5795_v13  ;;  %1764 = vmatpush.bf16.msrb.mxu3 %v5790_v1  ;;  %v5755_v1 = vld [vmem:[#allocation11 + $0x10] sm:$0xf0]  ;;  %v5754_v13 = vor.u32 %v7280_v59, %v5753_v56  ;;  %v1109_v56 = vadd.f32 %v8323_v38, %v8334_v43 }
 0x339   : > { %7691 = vpow2.f32 %v5745_v23  ;;  %v5770_v23 = vor.u32 %v7284_v20, %v5769_v18  ;;  %v5763_v18 = vld [vmem:[#allocation11 + $0x18] sm:$0xf0] }
 0x33a   : > { %v1373_v45 = vpop.f32.mrf.mxu3  ;;  %1792 = vmatpush.bf16.msra.mxu2 %v5798_v33 }
 0x33b   : > { %v1407_v63 = vadd.f32 %v1373_v45, %v1078_v29  ;;  %v1401_v35 = vpop.f32.mrf.mxu2  ;;  %v7285_v29 = vld [vmem:[#allocation11 + $0x34] sm:$0xf0]  ;;  %1751 = vmatpush.bf16.msrb.mxu0 %v5770_v23  ;;  %v5779_v45 = vld [vmem:[#allocation11 + $0x38] sm:$0xf0]  ;;  %v7340_v23 = vld [vmem:[#allocation12 + $0xec] sm:$0xf0] }
 0x33c   : > { %v1409_v22 = vadd.f32 %v1401_v35, %v1136_v39  ;;  %v1361_v15 = vpop.f32.mrf.mxu0  ;;  %v5778_v32 = vor.u32 %v7285_v29, %v5777_v28  ;;  %v7283_v39 = vld [vmem:[#allocation11 + $0x2c] sm:$0xf]  ;;  %1765 = vmatpush.bf16.msrb.mxu3 %v5774_v27  ;;  %v5995_v27 = vld [vmem:[#allocation12 + $0xf0] sm:$0xf0] }
 0x33d   : > { %v5747_v36 = vmul.f32 -1.442695, %v1407_v63  ;;  %v1410_v17 = vadd.f32 %v1361_v15, %v1051_v61  ;;  %v5782_v51 = vor.u32 %v7283_v39, %v5779_v45  ;;  %v7278_v61 = vld [vmem:[#allocation11 + $0x4] sm:$0xf]  ;;  %v1138_v63 = vadd.f32 %v8332_v42, %v8344_v50  ;;  %v7279_v15 = vld [vmem:[#allocation11 + $0xc] sm:$0xf] }
 0x33e   : > { %v5749_v21 = vmul.f32 -1.442695, %v1409_v22  ;;  %1779 = vmatpush.bf16.msra.mxu1 %v5778_v32  ;;  %v5758_v40 = vor.u32 %v7278_v61, %v5755_v1  ;;  %v7281_v22 = vld [vmem:[#allocation11 + $0x14] sm:$0xf0]  ;;  %v5993_v42 = vld [vmem:[#allocation12 + $0xe0] sm:$0xf]  ;;  %v5998_v32 = vor.u32 %v7338_v37, %v5995_v27  ;;  %v1389_v61 = vpop.f32.mrf.mxu1 }
 0x33f   : > { %v7692_v24 = vpop.eup %7691  ;;  %7693 = vpow2.f32 %v5747_v36  ;;  %v5746_v26 = vmul.f32 -1.442695, %v1410_v17  ;;  %1793 = vmatpush.bf16.msra.mxu2 %v5782_v51  ;;  %v5762_v17 = vor.u32 %v7281_v22, %v5761_v49  ;;  %1752 = vmatpush.bf16.msrb.mxu0 %v5754_v13  ;;  %v6001_v45 = vld [vmem:[#allocation12 + $0xe8] sm:$0xf]  ;;  %v7339_v51 = vld [vmem:[#allocation12 + $0xec] sm:$0xf] }
 0x340   : > { %v8422_v31 = vadd.f32 1.0, %v7692_v24  ;;  %7695 = vpow2.f32 %v5749_v21  ;;  %1766 = vmatpush.bf16.msrb.mxu3 %v5758_v40  ;;  %v5766_v21 = vor.u32 %v7279_v15, %v5763_v18  ;;  %v7334_v13 = vld [vmem:[#allocation12 + $0xc4] sm:$0xf]  ;;  %v5979_v22 = vld [vmem:[#allocation12 + $0xd0] sm:$0xf0]  ;;  %v1412_v18 = vadd.f32 %v1389_v61, %v1109_v56 }
 0x341   : > { %7697 = vpow2.f32 %v5746_v26  ;;  %v5994_v26 = vor.u32 %v7340_v23, %v5993_v42  ;;  %v5985_v15 = vld [vmem:[#allocation12 + $0xc8] sm:$0xf]  ;;  %v7337_v42 = vld [vmem:[#allocation12 + $0xd4] sm:$0xf0]  ;;  %v7335_v37 = vld [vmem:[#allocation12 + $0xcc] sm:$0xf] }
 0x342   : > { %7699 = vrcp.f32 %v8422_v31  ;;  %v1375_v35 = vpop.f32.mrf.mxu3  ;;  %v1431_v33 = vand.u32 2147483647, %v8422_v31  ;;  %1780 = vmatpush.bf16.msra.mxu1 %v5762_v17  ;;  %v1433_v29 = vand.u32 2147483648, %v8422_v31  ;;  %vm1427_vm3 = vweird.f32 %v8422_v31  ;;  %v7326_v17 = vld [vmem:[#allocation12 + $0x84] sm:$0xf] }
 0x343   : > { %v1411_v6 = vadd.f32 %v1375_v35, %v1080_v47  ;;  %v1403_v11 = vpop.f32.mrf.mxu2  ;;  %7701 = vtanh.f32 %v1408_v34  ;;  %1794 = vmatpush.bf16.msra.mxu2 %v5766_v21  ;;  %1996 = vmatpush.bf16.msra.mxu0 %v5994_v26  ;;  %v7341_v47 = vld [vmem:[#allocation12 + $0xf4] sm:$0xf0]  ;;  %v5977_v34 = vld [vmem:[#allocation12 + $0xc0] sm:$0xf]  ;;  %v7336_v35 = vld [vmem:[#allocation12 + $0xcc] sm:$0xf0]  ;;  %v5982_v21 = vor.u32 %v7334_v13, %v5979_v22  ;;  %v5986_v23 = vor.u32 %v7337_v42, %v5985_v15 }
 0x344   : > { %v1413_v36 = vadd.f32 %v1403_v11, %v1138_v63  ;;  %2010 = vmatpush.bf16.msra.mxu3 %v5998_v32  ;;  %v6003_v63 = vld [vmem:[#allocation12 + $0xf8] sm:$0xf0]  ;;  %v6002_v38 = vor.u32 %v7341_v47, %v6001_v45  ;;  %v5978_v49 = vor.u32 %v7336_v35, %v5977_v34  ;;  %vm8448_vm4 = vcmp.eq.f32.partialorder %v1431_v33, 8.507059e+37  ;;  %v7332_v45 = vld [vmem:[#allocation12 + $0xac] sm:$0xf0] }
 0x345   : > { %v7694_v50 = vpop.eup %7693  ;;  %v5748_v20 = vmul.f32 -1.442695, %v1411_v6  ;;  %v6006_v43 = vor.u32 %v7339_v51, %v6003_v63  ;;  %v1434_v26 = vor.u32 1.1754944e-38, %v1433_v29  ;;  %v7330_v63 = vld [vmem:[#allocation12 + $0xa4] sm:$0xf] }
 0x346   : > { %v7696_v41 = vpop.eup %7695  ;;  %v8430_v24 = vadd.f32 1.0, %v7694_v50  ;;  %v5750_v25 = vmul.f32 -1.442695, %v1413_v36  ;;  %2024 = vmatpush.bf16.msrb.mxu1 %v6002_v38  ;;  %v5963_v34 = vld [vmem:[#allocation12 + $0xb0] sm:$0xf0] }
 0x347   : > { %v7698_v28 = vpop.eup %7697  ;;  %v8433_v30 = vadd.f32 1.0, %v7696_v41  ;;  %7703 = vpow2.f32 %v5748_v20  ;;  %2038 = vmatpush.bf16.msrb.mxu2 %v6006_v43  ;;  %v5987_v41 = vld [vmem:[#allocation12 + $0xd8] sm:$0xf0]  ;;  %1997 = vmatpush.bf16.msra.mxu0 %v5978_v49  ;;  %v5969_v38 = vld [vmem:[#allocation12 + $0xa8] sm:$0xf] }
 0x348   : > { %v8435_v39 = vpop.eup %7699  ;;  %7705 = vrcp.f32 %v8430_v24  ;;  %v1469_v1 = vand.u32 2147483647, %v8430_v24  ;;  %v1471_v6 = vand.u32 2147483648, %v8430_v24  ;;  %v8445_v11 = vadd.f32 1.0, %v7698_v28  ;;  %2011 = vmatpush.bf16.msra.mxu3 %v5982_v21  ;;  %v7333_v22 = vld [vmem:[#allocation12 + $0xb4] sm:$0xf0] }
 0x349   : > { %v1423_v59 = vmul.f32 %v8435_v39, %v8422_v31  ;;  %7707 = vrcp.f32 %v8433_v30  ;;  %v7702_v36 = vpop.eup %7701  ;;  %vm1428_vm5 = vweird.f32 %v8435_v39  ;;  %v5990_v32 = vor.u32 %v7335_v37, %v5987_v41  ;;  %v7331_v15 = vld [vmem:[#allocation12 + $0xac] sm:$0xf]  ;;  %v5945_v21 = vld [vmem:[#allocation12 + $0x80] sm:$0xf] }
 0x34a   : > { %7709 = vpow2.f32 %v5750_v25  ;;  %v5961_v25 = vld [vmem:[#allocation12 + $0xa0] sm:$0xf]  ;;  %v8457_v27 = vor.u32 1.1754944e-38, %v1471_v6  ;;  %vm8466_vm6 = vcmp.eq.f32.partialorder %v1469_v1, 8.507059e+37  ;;  %v1446_v29 = vand.u32 2147483647, %v8445_v11  ;;  %vm8475_vm7 = vmor %vm1427_vm3, %vm1428_vm5  ;;  %2025 = vmatpush.bf16.msrb.mxu1 %v5986_v23 }
 0x34b   : > { %v1424_v40 = vsub.f32 1.0, %v1423_v59  ;;  %7711 = vrcp.f32 %v8445_v11  ;;  %v5962_v61 = vor.u32 %v7332_v45, %v5961_v25  ;;  %v1448_v13 = vand.u32 2147483648, %v8445_v11  ;;  %2039 = vmatpush.bf16.msrb.mxu2 %v5990_v32  ;;  %v5947_v25 = vld [vmem:[#allocation12 + $0x90] sm:$0xf0]  ;;  %v5929_v59 = vld [vmem:[#allocation12 + $0x60] sm:$0xf] }
 0x34c   : > { %vm1465_vm8 = vweird.f32 %v8430_v24  ;;  %vm1442_vm9 = vweird.f32 %v8445_v11  ;;  %vm8513_vm13 = vcmp.eq.f32.partialorder %v1446_v29, 8.507059e+37  ;;  %vm1505_vm0 = vweird.f32 %v8433_v30 }
 0x34d   : > { %v7704_v50 = vpop.eup %7703  ;;  %v1425_v20 = vmul.f32 %v8435_v39, %v1424_v40  ;;  %1998 = vmatpush.bf16.msra.mxu0 %v5962_v61 }
 0x34e   : > { %v8455_v33 = vpop.eup %7705  ;;  %v8459_v28 = vadd.f32 1.0, %v7704_v50 }
 0x34f   : > { %v8461_v47 = vpop.eup %7707  ;;  %v1426_v51 = vadd.f32 %v8435_v39, %v1425_v20  ;;  %v1461_v56 = vmul.f32 %v8455_v33, %v8430_v24  ;;  %v5966_v20 = vor.u32 %v7330_v63, %v5963_v34  ;;  %vm1466_vm10 = vweird.f32 %v8455_v33  ;;  %v1530_v24 = vld [vmem:[#allocation3 + $0x8] sm:$0xff] }
 0x350   : > { %v7710_v35 = vpop.eup %7709  ;;  %v1501_v1 = vmul.f32 %v8461_v47, %v8433_v30  ;;  %7713 = vrcp.f32 %v8459_v28  ;;  %v1484_v40 = vand.u32 2147483647, %v8459_v28  ;;  %v1486_v45 = vand.u32 2147483648, %v8459_v28  ;;  %vm1467_vm12 = vmor %vm1465_vm8, %vm1466_vm10 }
 0x351   : > { %v1430_v43 = vsel %vm8475_vm7, %v8435_v39, %v1426_v51  ;;  %v1462_v49 = vsub.f32 1.0, %v1461_v56  ;;  %7715 = vtanh.f32 %v1412_v18  ;;  %v8487_v31 = vadd.f32 1.0, %v7710_v35  ;;  %v8489_v42 = vpop.eup %7711  ;;  %v5971_v39 = vld [vmem:[#allocation12 + $0xb8] sm:$0xf0]  ;;  %v7328_v18 = vld [vmem:[#allocation12 + $0x8c] sm:$0xf0]  ;;  %2012 = vmatpush.bf16.msra.mxu3 %v5966_v20 }
 0x352   : > { %v1435_v50 = vsel %vm8448_vm4, %v1434_v26, %v1430_v43  ;;  %v1438_v41 = vmul.f32 %v8489_v42, %v8445_v11  ;;  %v5953_v26 = vld [vmem:[#allocation12 + $0x88] sm:$0xf]  ;;  %v1502_v32 = vsub.f32 1.0, %v1501_v1  ;;  %vm1443_vm11 = vweird.f32 %v8489_v42  ;;  %v7327_v51 = vld [vmem:[#allocation12 + $0x8c] sm:$0xf] }
 0x353   : > { %v8495_v37 = vmul.f32 %v7702_v36, %v1435_v50  ;;  %v1463_v23 = vmul.f32 %v8455_v33, %v1462_v49  ;;  %7717 = vrcp.f32 %v8487_v31  ;;  %v7329_v36 = vld [vmem:[#allocation12 + $0x94] sm:$0xf0]  ;;  %v5970_v63 = vor.u32 %v7333_v22, %v5969_v38  ;;  %v5955_v35 = vld [vmem:[#allocation12 + $0x98] sm:$0xf0]  ;;  %vm8532_vm15 = vmor %vm1442_vm9, %vm1443_vm11 }
 0x354   : > { %v1439_v61 = vsub.f32 1.0, %v1438_v41  ;;  %v5974_v34 = vor.u32 %v7331_v15, %v5971_v39  ;;  %v5946_v1 = vor.u32 %v7328_v18, %v5945_v21  ;;  %v5950_v43 = vor.u32 %v7326_v17, %v5947_v25  ;;  %v5931_v41 = vld [vmem:[#allocation12 + $0x70] sm:$0xf0]  ;;  %v7323_v11 = vld [vmem:[#allocation12 + $0x6c] sm:$0xf] }
 0x355   : > { %v1464_v56 = vadd.f32 %v8455_v33, %v1463_v23  ;;  %v5954_v49 = vor.u32 %v7329_v36, %v5953_v26  ;;  %v5958_v50 = vor.u32 %v7327_v51, %v5955_v35  ;;  %2026 = vmatpush.bf16.msrb.mxu1 %v5970_v63  ;;  %v1503_v39 = vmul.f32 %v8461_v47, %v1502_v32  ;;  %v5937_v26 = vld [vmem:[#allocation12 + $0x68] sm:$0xf]  ;;  %v7325_v32 = vld [vmem:[#allocation12 + $0x74] sm:$0xf0]  ;;  %v5913_v63 = vld [vmem:[#allocation12 + $0x40] sm:$0xf] }
 0x356   : > { %v8505_v6 = vpop.eup %7713  ;;  %v1440_v23 = vmul.f32 %v8489_v42, %v1439_v61  ;;  %2040 = vmatpush.bf16.msrb.mxu2 %v5974_v34  ;;  %v1449_v21 = vor.u32 1.1754944e-38, %v1448_v13  ;;  %vm8523_vm14 = vcmp.eq.f32.partialorder %v1484_v40, 8.507059e+37  ;;  %1999 = vmatpush.bf16.msra.mxu0 %v5946_v1  ;;  %v7324_v13 = vld [vmem:[#allocation12 + $0x6c] sm:$0xf0]  ;;  %v7322_v40 = vld [vmem:[#allocation12 + $0x64] sm:$0xf]  ;;  %vm1480_vm2 = vweird.f32 %v8459_v28 }
 0x357   : > { %v7716_v20 = vpop.eup %7715  ;;  %v1468_v16 = vsel %vm1467_vm12, %v8455_v33, %v1464_v56  ;;  %v1476_v22 = vmul.f32 %v8505_v6, %v8459_v28  ;;  %2013 = vmatpush.bf16.msra.mxu3 %v5950_v43  ;;  %vm1481_vm1 = vweird.f32 %v8505_v6  ;;  %v1509_v56 = vand.u32 2147483647, %v8433_v30  ;;  %v5939_v61 = vld [vmem:[#allocation12 + $0x78] sm:$0xf0]  ;;  %v1531_v1 = vld [vmem:[#allocation3] sm:$0xff] }
 0x358   : > { %v1473_v15 = vsel %vm8466_vm6, %v8457_v27, %v1468_v16  ;;  %v1441_v29 = vadd.f32 %v8489_v42, %v1440_v23  ;;  %v1487_v27 = vor.u32 1.1754944e-38, %v1486_v45  ;;  %v8551_v35 = vadd.f32 %v8461_v47, %v1503_v39  ;;  %v7320_v43 = vld [vmem:[#allocation12 + $0x4c] sm:$0xf0]  ;;  %v7318_v23 = vld [vmem:[#allocation12 + $0x44] sm:$0xf]  ;;  %vm8557_vm3 = vmor %vm1480_vm2, %vm1481_vm1 }
 0x359   : > { %v1477_v16 = vsub.f32 1.0, %v1476_v22  ;;  %v8536_v17 = vpop.eup %7717  ;;  %v1532_v25 = vmul.f32 %v1530_v24, %v1473_v15  ;;  %2027 = vmatpush.bf16.msrb.mxu1 %v5954_v49  ;;  %vm1506_vm4 = vweird.f32 %v8461_v47  ;;  %v1511_v28 = vand.u32 2147483648, %v8433_v30  ;;  %v5915_v22 = vld [vmem:[#allocation12 + $0x50] sm:$0xf0]  ;;  %v5921_v24 = vld [vmem:[#allocation12 + $0x48] sm:$0xf] }
 0x35a   : > { %v1445_v36 = vsel %vm8532_vm15, %v8489_v42, %v1441_v29  ;;  %v1516_v51 = vmul.f32 %v8536_v17, %v8487_v31  ;;  %2041 = vmatpush.bf16.msrb.mxu2 %v5958_v50  ;;  %v5930_v39 = vor.u32 %v7324_v13, %v5929_v59  ;;  %v5938_v29 = vor.u32 %v7325_v32, %v5937_v26  ;;  %v7321_v18 = vld [vmem:[#allocation12 + $0x54] sm:$0xf0]  ;;  %vm8576_vm5 = vmor %vm1505_vm0, %vm1506_vm4  ;;  %v5897_v59 = vld [vmem:[#allocation12 + $0x20] sm:$0xf] }
 0x35b   : > { %v1478_v45 = vmul.f32 %v8505_v6, %v1477_v16  ;;  %v1450_v34 = vsel %vm8513_vm13, %v1449_v21, %v1445_v36  ;;  %v8564_v15 = vadd.f32 %v8495_v37, %v1532_v25  ;;  %v5934_v21 = vor.u32 %v7322_v40, %v5931_v41  ;;  %v7319_v16 = vld [vmem:[#allocation12 + $0x4c] sm:$0xf]  ;;  %v5923_v36 = vld [vmem:[#allocation12 + $0x58] sm:$0xf0]  ;;  %v7316_v13 = vld [vmem:[#allocation12 + $0x2c] sm:$0xf0] }
 0x35c   : > { %v1517_v38 = vsub.f32 1.0, %v1516_v51  ;;  %v5942_v19 = vor.u32 %v7323_v11, %v5939_v61  ;;  %2000 = vmatpush.bf16.msra.mxu0 %v5930_v39  ;;  %v5922_v33 = vor.u32 %v7321_v18, %v5921_v24  ;;  %v7314_v41 = vld [vmem:[#allocation12 + $0x24] sm:$0xf]  ;;  %v5899_v25 = vld [vmem:[#allocation12 + $0x30] sm:$0xf0]  ;;  %v1508_v26 = vsel %vm8576_vm5, %v8461_v47, %v8551_v35 }
 0x35d   : > { %v1479_v49 = vadd.f32 %v8505_v6, %v1478_v45  ;;  %v1535_v45 = vmul.f32 %v7716_v20, %v1450_v34  ;;  %7719 = vtanh.f32 %v8564_v15  ;;  %2014 = vmatpush.bf16.msra.mxu3 %v5934_v21  ;;  %v5914_v20 = vor.u32 %v7320_v43, %v5913_v63  ;;  %2028 = vmatpush.bf16.msrb.mxu1 %v5938_v29  ;;  %v5905_v30 = vld [vmem:[#allocation12 + $0x28] sm:$0xf]  ;;  %v7317_v32 = vld [vmem:[#allocation12 + $0x34] sm:$0xf0]  ;;  %v7315_v11 = vld [vmem:[#allocation12 + $0x2c] sm:$0xf] }
 0x35e   : > { %v1518_v42 = vmul.f32 %v8536_v17, %v1517_v38  ;;  %2042 = vmatpush.bf16.msrb.mxu2 %v5942_v19  ;;  %v5907_v61 = vld [vmem:[#allocation12 + $0x38] sm:$0xf0]  ;;  %vm8585_vm6 = vcmp.eq.f32.partialorder %v1509_v56, 8.507059e+37  ;;  %v1526_v19 = vand.u32 2147483648, %v8487_v31  ;;  %vm1521_vm7 = vweird.f32 %v8536_v17  ;;  %v5881_v35 = vld [vmem:[#allocation12] sm:$0xf] }
 0x35f   : > { %v1483_v51 = vsel %vm8557_vm3, %v8505_v6, %v1479_v49  ;;  %v5918_v6 = vor.u32 %v7318_v23, %v5915_v22  ;;  %v5898_v43 = vor.u32 %v7316_v13, %v5897_v59  ;;  %v5902_v47 = vor.u32 %v7314_v41, %v5899_v25  ;;  %v7312_v23 = vld [vmem:[#allocation12 + $0xc] sm:$0xf0]  ;;  %v7310_v50 = vld [vmem:[#allocation12 + $0x4] sm:$0xf]  ;;  %v5883_v38 = vld [vmem:[#allocation12 + $0x10] sm:$0xf0] }
 0x360   : > { %v1488_v4 = vsel %vm8523_vm14, %v1487_v27, %v1483_v51  ;;  %v5926_v27 = vor.u32 %v7319_v16, %v5923_v36  ;;  %2001 = vmatpush.bf16.msra.mxu0 %v5914_v20  ;;  %v5906_v56 = vor.u32 %v7317_v32, %v5905_v30  ;;  %v5910_v49 = vor.u32 %v7315_v11, %v5907_v61  ;;  %v7313_v24 = vld [vmem:[#allocation12 + $0x14] sm:$0xf0]  ;;  %v7311_v39 = vld [vmem:[#allocation12 + $0xc] sm:$0xf]  ;;  %v5891_v21 = vld [vmem:[#allocation12 + $0x18] sm:$0xf0] }
 0x361   : > { %v1533_v40 = vmul.f32 %v1531_v1, %v1488_v4  ;;  %v1512_v4 = vor.u32 1.1754944e-38, %v1511_v28  ;;  %v1519_v1 = vadd.f32 %v8536_v17, %v1518_v42  ;;  %2015 = vmatpush.bf16.msra.mxu3 %v5918_v6  ;;  %2029 = vmatpush.bf16.msrb.mxu1 %v5922_v33  ;;  %v5889_v28 = vld [vmem:[#allocation12 + $0x8] sm:$0xf]  ;;  %vm1520_vm8 = vweird.f32 %v8487_v31  ;;  %v1802_v33 = vld [vmem:[#allocation4] sm:$0xff] }
 0x362   : > { %2043 = vmatpush.bf16.msrb.mxu2 %v5926_v27  ;;  %vm1522_vm9 = vmor %vm1520_vm8, %vm1521_vm7  ;;  %v5882_v16 = vor.u32 %v7312_v23, %v5881_v35  ;;  %v5886_v36 = vor.u32 %v7310_v50, %v5883_v38  ;;  %v5890_v51 = vor.u32 %v7313_v24, %v5889_v28  ;;  %v5894_v37 = vor.u32 %v7311_v39, %v5891_v21  ;;  %v1575_v30 = vld [vmem:[%s9438_s9] sm:$0xf] }
 0x363   : > { %v8590_v34 = vadd.f32 %v1535_v45, %v1533_v40  ;;  %v7720_v22 = vpop.eup %7719  ;;  %v1513_v42 = vsel %vm8585_vm6, %v1512_v4, %v1508_v26  ;;  %v1523_v18 = vsel %vm1522_vm9, %v8536_v17, %v1519_v1  ;;  %v1527_v45 = vor.u32 1.1754944e-38, %v1526_v19  ;;  %v1801_v40 = vld [vmem:[#allocation4 + $0x8] sm:$0xff] }
 0x364   : > { %v8600_v29 = vmul.f32 %v7720_v22, %v1513_v42  ;;  %2002 = vmatpush.bf16.msra.mxu0 %v5898_v43  ;;  %v9463_v20 = vand.u32 2147483647, %v8487_v31  ;;  %v1803_v27 = vpack.c.bf16 %v1802_v33, %v1801_v40  ;;  %v1577_v32 = vperm.slane %v1575_v30, 0 }
 0x365   : > { %7721 = vtanh.f32 %v8590_v34  ;;  %2016 = vmatpush.bf16.msra.mxu3 %v5902_v47  ;;  %2030 = vmatpush.bf16.msrb.mxu1 %v5906_v56  ;;  %v1578_v1 = vperm.slane %v1575_v30, 1  ;;  %v1580_v47 = vperm.slane %v1575_v30, 3 }
 0x366   : > { %2044 = vmatpush.bf16.msrb.mxu2 %v5910_v49  ;;  %vm1525_vm10 = vcmp.eq.f32.partialorder %v9463_v20, 8.507059e+37 }
 0x367   : > { %v1528_v59 = vsel %vm1525_vm10, %v1527_v45, %v1523_v18 }
 0x368   : > { %2003 = vmatpush.bf16.msra.mxu0 %v5882_v16 }
 0x369   : > { %2017 = vmatpush.bf16.msra.mxu3 %v5886_v36  ;;  %2031 = vmatpush.bf16.msrb.mxu1 %v5890_v51 }
 0x36a   : > { %2045 = vmatpush.bf16.msrb.mxu2 %v5894_v37 }
 0x36b   : > { %v7722_v6 = vpop.eup %7721 }
 0x36c   : > { %v8605_v13 = vmul.f32 %v7722_v6, %v1528_v59 }
 0x36e   : > { %v1542_v17 = vpack.c.bf16 %v8605_v13, %v8600_v29 }
 0x370   : > { %1753 = vmatmul.bf16.vlgmr.msrb.gmra.mxu0 %v1542_v17  ;;  %1767 = vmatmul.bf16.vlgmr.msrb.gmra.mxu3 %v1542_v17 }
 0x371   : > { %1781 = vmatmul.bf16.vlgmr.msra.gmra.mxu1 %v1542_v17  ;;  %1795 = vmatmul.bf16.vlgmr.msra.gmra.mxu2 %v1542_v17 }
 0x380   : > { %2004 = vmatmul.bf16.vlgmr.msra.gmra.mxu0 %v1803_v27  ;;  %2018 = vmatmul.bf16.vlgmr.msra.gmra.mxu3 %v1803_v27 }
 0x381   : > { %2032 = vmatmul.bf16.vlgmr.msrb.gmra.mxu1 %v1803_v27  ;;  %2046 = vmatmul.bf16.vlgmr.msrb.gmra.mxu2 %v1803_v27 }
 0x3ed   : > { %v1754_v31 = vpop.f32.mrf.mxu0 }
 0x3ee   : > { %v1782_v11 = vpop.f32.mrf.mxu1  ;;  %v1755_v63 = vadd.f32 %v1754_v31, %v1577_v32 }
 0x3f3   : > { %v1768_v41 = vpop.f32.mrf.mxu3 }
 0x3f4   : > { %v1796_v25 = vpop.f32.mrf.mxu2  ;;  %v1769_v23 = vadd.f32 %v1768_v41, %v1578_v1 }
 0x3f5   : > { %v1756_v26 = vpop.f32.mrf.mxu0  ;;  %v1797_v49 = vadd.f32 %v1796_v25, %v1580_v47 }
 0x3f6   : > { %v1784_v56 = vpop.f32.mrf.mxu1  ;;  %v1757_v38 = vadd.f32 %v1756_v26, %v1577_v32 }
 0x3fb   : > { %v1770_v61 = vpop.f32.mrf.mxu3 }
 0x3fc   : > { %v1798_v4 = vpop.f32.mrf.mxu2  ;;  %v1771_v51 = vadd.f32 %v1770_v61, %v1578_v1 }
 0x3fd   : > { %v2005_v19 = vpop.f32.mrf.mxu0  ;;  %v1799_v37 = vadd.f32 %v1798_v4, %v1580_v47 }
 0x3fe   : > { %v2052_v43 = vadd.f32 %v2005_v19, %v1755_v63  ;;  %v2033_v6 = vpop.f32.mrf.mxu1  ;;  %v1579_v19 = vperm.slane %v1575_v30, 2 }
 0x400   : > { %v6007_v35 = vmul.f32 -1.442695, %v2052_v43  ;;  %v1783_v43 = vadd.f32 %v1782_v11, %v1579_v19 }
 0x402   : > { %7723 = vpow2.f32 %v6007_v35 }
 0x403   : > { %v2019_v50 = vpop.f32.mrf.mxu3 }
 0x404   : > { %v2053_v28 = vadd.f32 %v2019_v50, %v1769_v23  ;;  %v2047_v22 = vpop.f32.mrf.mxu2  ;;  %v1785_v50 = vadd.f32 %v1784_v56, %v1579_v19 }
 0x405   : > { %v2055_v42 = vadd.f32 %v2047_v22, %v1797_v49  ;;  %v2007_v24 = vpop.f32.mrf.mxu0 }
 0x406   : > { %v6009_v39 = vmul.f32 -1.442695, %v2053_v28  ;;  %v2056_v21 = vadd.f32 %v2007_v24, %v1757_v38  ;;  %v2035_v23 = vpop.f32.mrf.mxu1  ;;  %v2054_v38 = vadd.f32 %v2033_v6, %v1783_v43 }
 0x407   : > { %v6011_v18 = vmul.f32 -1.442695, %v2055_v42  ;;  %v2058_v11 = vadd.f32 %v2035_v23, %v1785_v50 }
 0x408   : > { %v7724_v16 = vpop.eup %7723  ;;  %7725 = vpow2.f32 %v6009_v39  ;;  %v6008_v36 = vmul.f32 -1.442695, %v2056_v21 }
 0x409   : > { %v2066_v45 = vadd.f32 1.0, %v7724_v16  ;;  %7727 = vpow2.f32 %v6011_v18 }
 0x40a   : > { %7729 = vpow2.f32 %v6008_v36 }
 0x40b   : > { %7731 = vrcp.f32 %v2066_v45  ;;  %v2021_v20 = vpop.f32.mrf.mxu3  ;;  %v2079_v24 = vand.u32 2147483648, %v2066_v45  ;;  %vm2073_vm12 = vweird.f32 %v2066_v45  ;;  %v2077_v18 = vand.u32 2147483647, %v2066_v45 }
 0x40c   : > { %v2057_v59 = vadd.f32 %v2021_v20, %v1771_v51  ;;  %v2049_v17 = vpop.f32.mrf.mxu2 }
 0x40d   : > { %v2059_v40 = vadd.f32 %v2049_v17, %v1799_v37  ;;  %v2080_v17 = vor.u32 1.1754944e-38, %v2079_v24  ;;  %vm2078_vm15 = vcmp.eq.f32.partialorder %v2077_v18, 8.507059e+37 }
 0x40e   : > { %v7726_v33 = vpop.eup %7725  ;;  %v6010_v27 = vmul.f32 -1.442695, %v2057_v59 }
 0x40f   : > { %v7728_v31 = vpop.eup %7727  ;;  %v2104_v41 = vadd.f32 1.0, %v7726_v33  ;;  %v6012_v32 = vmul.f32 -1.442695, %v2059_v40 }
 0x410   : > { %v7730_v25 = vpop.eup %7729  ;;  %v8612_v26 = vadd.f32 1.0, %v7728_v31  ;;  %7733 = vpow2.f32 %v6010_v27 }
 0x411   : > { %v7732_v63 = vpop.eup %7731  ;;  %7735 = vrcp.f32 %v2104_v41  ;;  %v8615_v1 = vadd.f32 1.0, %v7730_v25  ;;  %v2115_v36 = vand.u32 2147483647, %v2104_v41  ;;  %v2117_v51 = vand.u32 2147483648, %v2104_v41 }
 0x412   : > { %v2069_v61 = vmul.f32 %v7732_v63, %v2066_v45  ;;  %7737 = vrcp.f32 %v8612_v26  ;;  %vm2074_vm11 = vweird.f32 %v7732_v63  ;;  %vm2111_vm0 = vweird.f32 %v2104_v41 }
 0x413   : > { %7739 = vpow2.f32 %v6012_v32  ;;  %vm8625_vm13 = vmor %vm2073_vm12, %vm2074_vm11  ;;  %vm2116_vm2 = vcmp.eq.f32.partialorder %v2115_v36, 8.507059e+37  ;;  %v2118_v25 = vor.u32 1.1754944e-38, %v2117_v51  ;;  %v2176_v32 = vld [vmem:[#allocation5] sm:$0xff]  ;;  %vm2151_vm3 = vweird.f32 %v8612_v26 }
 0x414   : > { %v2070_v4 = vsub.f32 1.0, %v2069_v61  ;;  %7741 = vrcp.f32 %v8615_v1  ;;  %v2157_v61 = vand.u32 2147483648, %v8612_v26  ;;  %vm2088_vm6 = vweird.f32 %v8615_v1 }
 0x416   : > { %v7734_v47 = vpop.eup %7733  ;;  %v2071_v35 = vmul.f32 %v7732_v63, %v2070_v4  ;;  %v2094_v4 = vand.u32 2147483648, %v8615_v1 }
 0x417   : > { %v7736_v49 = vpop.eup %7735  ;;  %v8618_v28 = vadd.f32 1.0, %v7734_v47 }
 0x418   : > { %v8620_v30 = vpop.eup %7737  ;;  %v2072_v22 = vadd.f32 %v7732_v63, %v2071_v35  ;;  %v2107_v42 = vmul.f32 %v7736_v49, %v2104_v41  ;;  %vm2112_vm14 = vweird.f32 %v7736_v49  ;;  %v2095_v51 = vor.u32 1.1754944e-38, %v2094_v4 }
 0x419   : > { %v2147_v39 = vmul.f32 %v8620_v30, %v8612_v26  ;;  %7743 = vrcp.f32 %v8618_v28  ;;  %v7740_v21 = vpop.eup %7739  ;;  %vm2113_vm1 = vmor %vm2111_vm0, %vm2112_vm14  ;;  %vm2152_vm5 = vweird.f32 %v8620_v30  ;;  %vm2126_vm10 = vweird.f32 %v8618_v28 }
 0x41a   : > { %v2108_v16 = vsub.f32 1.0, %v2107_v42  ;;  %7745 = vtanh.f32 %v2054_v38  ;;  %v8629_v37 = vadd.f32 1.0, %v7740_v21  ;;  %v7742_v20 = vpop.eup %7741  ;;  %v2076_v6 = vsel %vm8625_vm13, %v7732_v63, %v2072_v22  ;;  %vm2153_vm12 = vmor %vm2151_vm3, %vm2152_vm5 }
 0x41b   : > { %v2148_v40 = vsub.f32 1.0, %v2147_v39  ;;  %v2084_v45 = vmul.f32 %v7742_v20, %v8615_v1  ;;  %7747 = vtanh.f32 %v2058_v11  ;;  %v2081_v31 = vsel %vm2078_vm15, %v2080_v17, %v2076_v6 }
 0x41c   : > { %v2109_v59 = vmul.f32 %v7736_v49, %v2108_v16  ;;  %7749 = vrcp.f32 %v8629_v37  ;;  %vm2089_vm4 = vweird.f32 %v7742_v20  ;;  %v2092_v22 = vand.u32 2147483647, %v8615_v1 }
 0x41d   : > { %v2085_v63 = vsub.f32 1.0, %v2084_v45  ;;  %v2149_v35 = vmul.f32 %v8620_v30, %v2148_v40  ;;  %v2132_v39 = vand.u32 2147483648, %v8618_v28  ;;  %vm2090_vm7 = vmor %vm2088_vm6, %vm2089_vm4  ;;  %v2130_v16 = vand.u32 2147483647, %v8618_v28  ;;  %v2177_v45 = vld [vmem:[#allocation5 + $0x8] sm:$0xff] }
 0x41e   : > { %v2110_v33 = vadd.f32 %v7736_v49, %v2109_v59  ;;  %vm2093_vm9 = vcmp.eq.f32.partialorder %v2092_v22, 8.507059e+37  ;;  %v2155_v1 = vand.u32 2147483647, %v8612_v26  ;;  %v2172_v26 = vand.u32 2147483648, %v8629_v37 }
 0x41f   : > { %v7744_v27 = vpop.eup %7743  ;;  %v2086_v23 = vmul.f32 %v7742_v20, %v2085_v63  ;;  %v2150_v56 = vadd.f32 %v8620_v30, %v2149_v35  ;;  %v2133_v40 = vor.u32 1.1754944e-38, %v2132_v39  ;;  %vm2131_vm13 = vcmp.eq.f32.partialorder %v2130_v16, 8.507059e+37 }
 0x420   : > { %v2114_v19 = vsel %vm2113_vm1, %v7736_v49, %v2110_v33  ;;  %v2122_v43 = vmul.f32 %v7744_v27, %v8618_v28  ;;  %v7746_v47 = vpop.eup %7745  ;;  %vm2127_vm8 = vweird.f32 %v7744_v27  ;;  %v2158_v63 = vor.u32 1.1754944e-38, %v2157_v61 }
 0x421   : > { %v2119_v41 = vsel %vm2116_vm2, %v2118_v25, %v2114_v19  ;;  %v2180_v50 = vmul.f32 %v7746_v47, %v2081_v31  ;;  %v7748_v24 = vpop.eup %7747  ;;  %v2087_v49 = vadd.f32 %v7742_v20, %v2086_v23  ;;  %vm2128_vm11 = vmor %vm2126_vm10, %vm2127_vm8  ;;  %v2154_v31 = vsel %vm2153_vm12, %v8620_v30, %v2150_v56 }
 0x422   : > { %v2178_v38 = vmul.f32 %v2176_v32, %v2119_v41  ;;  %v2123_v42 = vsub.f32 1.0, %v2122_v43  ;;  %v7750_v11 = vpop.eup %7749  ;;  %vm2156_vm14 = vcmp.eq.f32.partialorder %v2155_v1, 8.507059e+37  ;;  %vm2166_vm0 = vweird.f32 %v8629_v37 }
 0x423   : > { %v2091_v36 = vsel %vm2090_vm7, %v7742_v20, %v2087_v49  ;;  %v2162_v6 = vmul.f32 %v7750_v11, %v8629_v37  ;;  %v2159_v43 = vsel %vm2156_vm14, %v2158_v63, %v2154_v31  ;;  %vm2167_vm15 = vweird.f32 %v7750_v11 }
 0x424   : > { %v2182_v21 = vadd.f32 %v2180_v50, %v2178_v38  ;;  %v2124_v18 = vmul.f32 %v7744_v27, %v2123_v42  ;;  %v2096_v17 = vsel %vm2093_vm9, %v2095_v51, %v2091_v36  ;;  %vm2168_vm1 = vmor %vm2166_vm0, %vm2167_vm15  ;;  %v2173_v23 = vor.u32 1.1754944e-38, %v2172_v26 }
 0x425   : > { %v2163_v33 = vsub.f32 1.0, %v2162_v6  ;;  %v2181_v28 = vmul.f32 %v7748_v24, %v2096_v17 }
 0x426   : > { %7751 = vtanh.f32 %v2182_v21  ;;  %v2125_v59 = vadd.f32 %v7744_v27, %v2124_v18 }
 0x427   : > { %v2164_v32 = vmul.f32 %v7750_v11, %v2163_v33 }
 0x428   : > { %v2129_v20 = vsel %vm2128_vm11, %v7744_v27, %v2125_v59  ;;  %v2170_v27 = vand.u32 2147483647, %v8629_v37 }
 0x429   : > { %v2134_v25 = vsel %vm2131_vm13, %v2133_v40, %v2129_v20  ;;  %v2165_v35 = vadd.f32 %v7750_v11, %v2164_v32 }
 0x42a   : > { %v2179_v19 = vmul.f32 %v2177_v45, %v2134_v25  ;;  %vm2171_vm2 = vcmp.eq.f32.partialorder %v2170_v27, 8.507059e+37 }
 0x42b   : > { %v2169_v30 = vsel %vm2168_vm1, %v7750_v11, %v2165_v35 }
 0x42c   : > { %v7752_v4 = vpop.eup %7751  ;;  %v2183_v47 = vadd.f32 %v2181_v28, %v2179_v19  ;;  %v2174_v50 = vsel %vm2171_vm2, %v2173_v23, %v2169_v30 }
 0x42d   : > { %v2186_v41 = vmul.f32 %v7752_v4, %v2159_v43 }
 0x42e   : > { %7753 = vtanh.f32 %v2183_v47 }
 0x431   : > { %2192 = sbr.rel (%p6014_p8) target bundleno = 1086 (0x43e), region = 84 }
 0x434   : > { %v7754_v61 = vpop.eup %7753 }
 0x435   : > { %v2187_v38 = vmul.f32 %v7754_v61, %v2174_v50 }
 0x436   : > { %2193 = vst [vmem:[#allocation2] sm:$0xff] %v8600_v29 }
 0x437   : > { %2194 = vst [vmem:[#allocation2 + $0x8] sm:$0xff] %v8605_v13 }
 0x438   : > { %2195 = vst [vmem:[#allocation3 + $0x8] sm:$0xff] %v8564_v15 }
 0x439   : > { %2196 = vst [vmem:[#allocation3] sm:$0xff] %v8590_v34 }
 0x43a   : > { %2197 = vst [vmem:[#allocation4 + $0x8] sm:$0xff] %v2186_v41 }
 0x43b   : > { %2198 = vst [vmem:[#allocation4] sm:$0xff] %v2187_v38 }
 0x43c   : > { %2199 = vst [vmem:[#allocation5] sm:$0xff] %v2182_v21 }
 0x43d   : > { %2200 = vst [vmem:[#allocation5 + $0x8] sm:$0xff] %v2183_v47 }
 0x43e PF: > { %v6129_v37 = vld [vmem:[#allocation9 + $0xe0] sm:$0xf]  ;;  %v7372_v22 = vld [vmem:[#allocation9 + $0xec] sm:$0xf0]  ;;  %v7370_v42 = vld [vmem:[#allocation9 + $0xe4] sm:$0xf] }
 0x43f   : > { %v6130_v24 = vor.u32 %v7372_v22, %v6129_v37  ;;  %v6131_v49 = vld [vmem:[#allocation9 + $0xf0] sm:$0xf0]  ;;  %v7371_v39 = vld [vmem:[#allocation9 + $0xec] sm:$0xf]  ;;  %v6139_v11 = vld [vmem:[#allocation9 + $0xf8] sm:$0xf0] }
 0x440   : > { %v6134_v18 = vor.u32 %v7370_v42, %v6131_v49  ;;  %v6142_v29 = vor.u32 %v7371_v39, %v6139_v11  ;;  %v6113_v16 = vld [vmem:[#allocation9 + $0xc0] sm:$0xf]  ;;  %v7368_v13 = vld [vmem:[#allocation9 + $0xcc] sm:$0xf0]  ;;  %v7366_v56 = vld [vmem:[#allocation9 + $0xc4] sm:$0xf] }
 0x441   : > { %2396 = vmatpush.bf16.msrb.mxu0 %v6130_v24  ;;  %v6114_v15 = vor.u32 %v7368_v13, %v6113_v16  ;;  %v6115_v34 = vld [vmem:[#allocation9 + $0xd0] sm:$0xf0]  ;;  %v7367_v36 = vld [vmem:[#allocation9 + $0xcc] sm:$0xf]  ;;  %v6123_v51 = vld [vmem:[#allocation9 + $0xd8] sm:$0xf0] }
 0x442   : > { %2410 = vmatpush.bf16.msrb.mxu3 %v6134_v18  ;;  %2438 = vmatpush.bf16.msra.mxu2 %v6142_v29  ;;  %v6118_v21 = vor.u32 %v7366_v56, %v6115_v34  ;;  %v6126_v6 = vor.u32 %v7367_v36, %v6123_v51  ;;  %v6097_v59 = vld [vmem:[#allocation9 + $0xa0] sm:$0xf]  ;;  %v7364_v1 = vld [vmem:[#allocation9 + $0xac] sm:$0xf0]  ;;  %v7362_v17 = vld [vmem:[#allocation9 + $0xa4] sm:$0xf] }
 0x443   : > { %v6099_v40 = vld [vmem:[#allocation9 + $0xb0] sm:$0xf0]  ;;  %v7363_v45 = vld [vmem:[#allocation9 + $0xac] sm:$0xf]  ;;  %v6107_v33 = vld [vmem:[#allocation9 + $0xb8] sm:$0xf0]  ;;  %v6098_v20 = vor.u32 %v7364_v1, %v6097_v59 }
 0x444   : > { %v6102_v31 = vor.u32 %v7362_v17, %v6099_v40  ;;  %v6110_v25 = vor.u32 %v7363_v45, %v6107_v33  ;;  %v6081_v32 = vld [vmem:[#allocation9 + $0x80] sm:$0xf]  ;;  %v7360_v63 = vld [vmem:[#allocation9 + $0x8c] sm:$0xf0]  ;;  %v7358_v28 = vld [vmem:[#allocation9 + $0x84] sm:$0xf] }
 0x445   : > { %2397 = vmatpush.bf16.msrb.mxu0 %v6114_v15  ;;  %v6083_v19 = vld [vmem:[#allocation9 + $0x90] sm:$0xf0]  ;;  %v7359_v4 = vld [vmem:[#allocation9 + $0x8c] sm:$0xf]  ;;  %v6091_v43 = vld [vmem:[#allocation9 + $0x98] sm:$0xf0]  ;;  %v6082_v35 = vor.u32 %v7360_v63, %v6081_v32 }
 0x446   : > { %2411 = vmatpush.bf16.msrb.mxu3 %v6118_v21  ;;  %2439 = vmatpush.bf16.msra.mxu2 %v6126_v6  ;;  %v6137_v47 = vld [vmem:[#allocation9 + $0xe8] sm:$0xf]  ;;  %v7373_v41 = vld [vmem:[#allocation9 + $0xf4] sm:$0xf0]  ;;  %v6065_v26 = vld [vmem:[#allocation9 + $0x60] sm:$0xf]  ;;  %v6086_v23 = vor.u32 %v7358_v28, %v6083_v19  ;;  %v6094_v61 = vor.u32 %v7359_v4, %v6091_v43 }
 0x447   : > { %v7356_v27 = vld [vmem:[#allocation9 + $0x6c] sm:$0xf0]  ;;  %v6138_v30 = vor.u32 %v7373_v41, %v6137_v47  ;;  %v7354_v50 = vld [vmem:[#allocation9 + $0x64] sm:$0xf]  ;;  %v6067_v38 = vld [vmem:[#allocation9 + $0x70] sm:$0xf0] }
 0x448   : > { %v6121_v37 = vld [vmem:[#allocation9 + $0xc8] sm:$0xf]  ;;  %v7355_v22 = vld [vmem:[#allocation9 + $0x6c] sm:$0xf]  ;;  %v6075_v42 = vld [vmem:[#allocation9 + $0x78] sm:$0xf0]  ;;  %v6066_v39 = vor.u32 %v7356_v27, %v6065_v26  ;;  %v6070_v29 = vor.u32 %v7354_v50, %v6067_v38 }
 0x449   : > { %2398 = vmatpush.bf16.msrb.mxu0 %v6098_v20  ;;  %2424 = vmatpush.bf16.msra.mxu1 %v6138_v30  ;;  %v7369_v24 = vld [vmem:[#allocation9 + $0xd4] sm:$0xf0]  ;;  %v6105_v11 = vld [vmem:[#allocation9 + $0xa8] sm:$0xf]  ;;  %v6078_v16 = vor.u32 %v7355_v22, %v6075_v42  ;;  %v6049_v13 = vld [vmem:[#allocation9 + $0x40] sm:$0xf] }
 0x44a   : > { %2412 = vmatpush.bf16.msrb.mxu3 %v6102_v31  ;;  %2440 = vmatpush.bf16.msra.mxu2 %v6110_v25  ;;  %v6122_v49 = vor.u32 %v7369_v24, %v6121_v37  ;;  %v7365_v18 = vld [vmem:[#allocation9 + $0xb4] sm:$0xf0]  ;;  %v7352_v56 = vld [vmem:[#allocation9 + $0x4c] sm:$0xf0]  ;;  %v7350_v15 = vld [vmem:[#allocation9 + $0x44] sm:$0xf] }
 0x44b   : > { %v6051_v34 = vld [vmem:[#allocation9 + $0x50] sm:$0xf0]  ;;  %v7351_v36 = vld [vmem:[#allocation9 + $0x4c] sm:$0xf]  ;;  %v6059_v51 = vld [vmem:[#allocation9 + $0x58] sm:$0xf0]  ;;  %v6106_v21 = vor.u32 %v7365_v18, %v6105_v11  ;;  %v6050_v59 = vor.u32 %v7352_v56, %v6049_v13 }
 0x44c   : > { %v6089_v6 = vld [vmem:[#allocation9 + $0x88] sm:$0xf]  ;;  %v7361_v1 = vld [vmem:[#allocation9 + $0x94] sm:$0xf0]  ;;  %v6054_v17 = vor.u32 %v7350_v15, %v6051_v34  ;;  %v6062_v40 = vor.u32 %v7351_v36, %v6059_v51  ;;  %v6033_v45 = vld [vmem:[#allocation9 + $0x20] sm:$0xf] }
 0x44d   : > { %2399 = vmatpush.bf16.msrb.mxu0 %v6082_v35  ;;  %2425 = vmatpush.bf16.msra.mxu1 %v6122_v49  ;;  %v7348_v33 = vld [vmem:[#allocation9 + $0x2c] sm:$0xf0]  ;;  %v7346_v20 = vld [vmem:[#allocation9 + $0x24] sm:$0xf]  ;;  %v6035_v31 = vld [vmem:[#allocation9 + $0x30] sm:$0xf0]  ;;  %v6090_v63 = vor.u32 %v7361_v1, %v6089_v6 }
 0x44e   : > { %2413 = vmatpush.bf16.msrb.mxu3 %v6086_v23  ;;  %2441 = vmatpush.bf16.msra.mxu2 %v6094_v61  ;;  %v7347_v25 = vld [vmem:[#allocation9 + $0x2c] sm:$0xf]  ;;  %v6043_v32 = vld [vmem:[#allocation9 + $0x38] sm:$0xf0]  ;;  %v6073_v28 = vld [vmem:[#allocation9 + $0x68] sm:$0xf]  ;;  %v6034_v4 = vor.u32 %v7348_v33, %v6033_v45  ;;  %v6038_v43 = vor.u32 %v7346_v20, %v6035_v31 }
 0x44f   : > { %v7357_v19 = vld [vmem:[#allocation9 + $0x74] sm:$0xf0]  ;;  %v6046_v47 = vor.u32 %v7347_v25, %v6043_v32  ;;  %v6017_v41 = vld [vmem:[#allocation9] sm:$0xf]  ;;  %v7344_v35 = vld [vmem:[#allocation9 + $0xc] sm:$0xf0] }
 0x450   : > { %v7342_v26 = vld [vmem:[#allocation9 + $0x4] sm:$0xf]  ;;  %v6019_v27 = vld [vmem:[#allocation9 + $0x10] sm:$0xf0]  ;;  %v7343_v30 = vld [vmem:[#allocation9 + $0xc] sm:$0xf]  ;;  %v6074_v61 = vor.u32 %v7357_v19, %v6073_v28  ;;  %v6018_v37 = vor.u32 %v7344_v35, %v6017_v41 }
 0x451   : > { %2400 = vmatpush.bf16.msrb.mxu0 %v6066_v39  ;;  %2426 = vmatpush.bf16.msra.mxu1 %v6106_v21  ;;  %v6027_v23 = vld [vmem:[#allocation9 + $0x18] sm:$0xf0]  ;;  %v6057_v50 = vld [vmem:[#allocation9 + $0x48] sm:$0xf]  ;;  %v7353_v38 = vld [vmem:[#allocation9 + $0x54] sm:$0xf0]  ;;  %v6022_v24 = vor.u32 %v7342_v26, %v6019_v27 }
 0x452   : > { %2414 = vmatpush.bf16.msrb.mxu3 %v6070_v29  ;;  %2442 = vmatpush.bf16.msra.mxu2 %v6078_v16  ;;  %v2201_v22 = vld [vmem:[#allocation2] sm:$0xff]  ;;  %v2202_v42 = vld [vmem:[#allocation2 + $0x8] sm:$0xff]  ;;  %v6030_v49 = vor.u32 %v7343_v30, %v6027_v23  ;;  %v6058_v39 = vor.u32 %v7353_v38, %v6057_v50  ;;  %v7349_v29 = vld [vmem:[#allocation9 + $0x34] sm:$0xf0]  ;;  %s3234_s25 = sadd.s32 1, %s8243_s17 }
 0x453   : > { %v2203_v11 = vpack.c.bf16 %v2202_v42, %v2201_v22  ;;  %v6041_v18 = vld [vmem:[#allocation9 + $0x28] sm:$0xf]  ;;  %v7345_v56 = vld [vmem:[#allocation9 + $0x14] sm:$0xf0]  ;;  %v6263_v34 = vld [vmem:[#allocation11 + $0xe0] sm:$0xf] }
 0x454   : > { %v6042_v16 = vor.u32 %v7349_v29, %v6041_v18  ;;  %v6025_v13 = vld [vmem:[#allocation9 + $0x8] sm:$0xf]  ;;  %v7404_v36 = vld [vmem:[#allocation11 + $0xec] sm:$0xf0]  ;;  %v7402_v51 = vld [vmem:[#allocation11 + $0xe4] sm:$0xf] }
 0x455   : > { %2401 = vmatpush.bf16.msrb.mxu0 %v6050_v59  ;;  %2427 = vmatpush.bf16.msra.mxu1 %v6090_v63  ;;  %v6026_v15 = vor.u32 %v7345_v56, %v6025_v13  ;;  %v6264_v21 = vor.u32 %v7404_v36, %v6263_v34  ;;  %v6265_v6 = vld [vmem:[#allocation11 + $0xf0] sm:$0xf0]  ;;  %v6271_v59 = vld [vmem:[#allocation11 + $0xe8] sm:$0xf]  ;;  %v7405_v1 = vld [vmem:[#allocation11 + $0xf4] sm:$0xf0] }
 0x456   : > { %2415 = vmatpush.bf16.msrb.mxu3 %v6054_v17  ;;  %2443 = vmatpush.bf16.msra.mxu2 %v6062_v40  ;;  %v6268_v17 = vor.u32 %v7402_v51, %v6265_v6  ;;  %v6272_v40 = vor.u32 %v7405_v1, %v6271_v59  ;;  %v7403_v45 = vld [vmem:[#allocation11 + $0xec] sm:$0xf]  ;;  %v6273_v33 = vld [vmem:[#allocation11 + $0xf8] sm:$0xf0]  ;;  %v6247_v31 = vld [vmem:[#allocation11 + $0xc0] sm:$0xf] }
 0x457   : > { %v6276_v20 = vor.u32 %v7403_v45, %v6273_v33  ;;  %v7400_v25 = vld [vmem:[#allocation11 + $0xcc] sm:$0xf0]  ;;  %v7398_v32 = vld [vmem:[#allocation11 + $0xc4] sm:$0xf]  ;;  %v6249_v28 = vld [vmem:[#allocation11 + $0xd0] sm:$0xf0] }
 0x458   : > { %v6248_v63 = vor.u32 %v7400_v25, %v6247_v31  ;;  %v6255_v19 = vld [vmem:[#allocation11 + $0xc8] sm:$0xf]  ;;  %v7399_v41 = vld [vmem:[#allocation11 + $0xcc] sm:$0xf]  ;;  %v6257_v35 = vld [vmem:[#allocation11 + $0xd8] sm:$0xf0] }
 0x459   : > { %2402 = vmatpush.bf16.msrb.mxu0 %v6034_v4  ;;  %2428 = vmatpush.bf16.msra.mxu1 %v6074_v61  ;;  %v7401_v4 = vld [vmem:[#allocation11 + $0xd4] sm:$0xf0]  ;;  %v6260_v26 = vor.u32 %v7399_v41, %v6257_v35  ;;  %v6231_v27 = vld [vmem:[#allocation11 + $0xa0] sm:$0xf]  ;;  %v7396_v30 = vld [vmem:[#allocation11 + $0xac] sm:$0xf0] }
 0x45a   : > { %2416 = vmatpush.bf16.msrb.mxu3 %v6038_v43  ;;  %2444 = vmatpush.bf16.msra.mxu2 %v6046_v47  ;;  %v6252_v43 = vor.u32 %v7398_v32, %v6249_v28  ;;  %v6256_v47 = vor.u32 %v7401_v4, %v6255_v19  ;;  %v7394_v23 = vld [vmem:[#allocation11 + $0xa4] sm:$0xf]  ;;  %v6232_v61 = vor.u32 %v7396_v30, %v6231_v27  ;;  %v6233_v50 = vld [vmem:[#allocation11 + $0xb0] sm:$0xf0]  ;;  %v6239_v38 = vld [vmem:[#allocation11 + $0xa8] sm:$0xf] }
 0x45b   : > { %v6236_v22 = vor.u32 %v7394_v23, %v6233_v50  ;;  %v7392_v18 = vld [vmem:[#allocation11 + $0x8c] sm:$0xf0]  ;;  %v7390_v29 = vld [vmem:[#allocation11 + $0x84] sm:$0xf]  ;;  %v6217_v13 = vld [vmem:[#allocation11 + $0x90] sm:$0xf0] }
 0x45c   : > { %v6223_v56 = vld [vmem:[#allocation11 + $0x88] sm:$0xf]  ;;  %v6220_v34 = vor.u32 %v7390_v29, %v6217_v13  ;;  %v7391_v51 = vld [vmem:[#allocation11 + $0x8c] sm:$0xf]  ;;  %v7386_v45 = vld [vmem:[#allocation11 + $0x64] sm:$0xf] }
 0x45d   : > { %2403 = vmatpush.bf16.msrb.mxu0 %v6018_v37  ;;  %2429 = vmatpush.bf16.msra.mxu1 %v6058_v39  ;;  %v7397_v37 = vld [vmem:[#allocation11 + $0xb4] sm:$0xf0]  ;;  %v6207_v31 = vld [vmem:[#allocation11 + $0x68] sm:$0xf]  ;;  %v7387_v19 = vld [vmem:[#allocation11 + $0x6c] sm:$0xf] }
 0x45e   : > { %2417 = vmatpush.bf16.msrb.mxu3 %v6022_v24  ;;  %2445 = vmatpush.bf16.msra.mxu2 %v6030_v49  ;;  %v6240_v42 = vor.u32 %v7397_v37, %v6239_v38  ;;  %v7395_v24 = vld [vmem:[#allocation11 + $0xac] sm:$0xf]  ;;  %v6241_v49 = vld [vmem:[#allocation11 + $0xb8] sm:$0xf0]  ;;  %v7389_v25 = vld [vmem:[#allocation11 + $0x74] sm:$0xf0] }
 0x45f   : > { %v6244_v39 = vor.u32 %v7395_v24, %v6241_v49  ;;  %v6208_v28 = vor.u32 %v7389_v25, %v6207_v31  ;;  %v6209_v4 = vld [vmem:[#allocation11 + $0x78] sm:$0xf0]  ;;  %v7382_v41 = vld [vmem:[#allocation11 + $0x44] sm:$0xf]  ;;  %v6191_v27 = vld [vmem:[#allocation11 + $0x48] sm:$0xf] }
 0x460   : > { %2404 = vmatmul.bf16.vlgmr.msrb.gmra.mxu0 %v2203_v11  ;;  %v7385_v30 = vld [vmem:[#allocation11 + $0x54] sm:$0xf0]  ;;  %v7383_v37 = vld [vmem:[#allocation11 + $0x4c] sm:$0xf]  ;;  %v7380_v29 = vld [vmem:[#allocation11 + $0x2c] sm:$0xf0] }
 0x461   : > { %2418 = vmatmul.bf16.vlgmr.msrb.gmra.mxu3 %v2203_v11  ;;  %2446 = vmatmul.bf16.vlgmr.msra.gmra.mxu2 %v2203_v11  ;;  %v6192_v38 = vor.u32 %v7385_v30, %v6191_v27  ;;  %v6391_v27 = vld [vmem:[#allocation12 + $0xe0] sm:$0xf]  ;;  %v7436_v30 = vld [vmem:[#allocation12 + $0xec] sm:$0xf0]  ;;  %p6411_p9 = scmp.ge.s32.totalorder %s3234_s25, 6 }
 0x462   : > { %2430 = vmatpush.bf16.msra.mxu1 %v6042_v16  ;;  %2791 = vmatpush.bf16.msra.mxu0 %v6264_v21  ;;  %v6225_v21 = vld [vmem:[#allocation11 + $0x98] sm:$0xf0] }
 0x463   : > { %2805 = vmatpush.bf16.msra.mxu3 %v6268_v17  ;;  %2833 = vmatpush.bf16.msrb.mxu2 %v6276_v20  ;;  %v6228_v59 = vor.u32 %v7391_v51, %v6225_v21  ;;  %v6199_v17 = vld [vmem:[#allocation11 + $0x60] sm:$0xf]  ;;  %v6201_v20 = vld [vmem:[#allocation11 + $0x70] sm:$0xf0]  ;;  %v6175_v21 = vld [vmem:[#allocation11 + $0x28] sm:$0xf] }
 0x466   : > { %2431 = vmatpush.bf16.msra.mxu1 %v6026_v15  ;;  %2792 = vmatpush.bf16.msra.mxu0 %v6248_v63  ;;  %v7393_v15 = vld [vmem:[#allocation11 + $0x94] sm:$0xf0]  ;;  %v6204_v63 = vor.u32 %v7386_v45, %v6201_v20  ;;  %v6151_v45 = vld [vmem:[#allocation11] sm:$0xf]  ;;  %v7374_v20 = vld [vmem:[#allocation11 + $0x4] sm:$0xf] }
 0x467   : > { %2806 = vmatpush.bf16.msra.mxu3 %v6252_v43  ;;  %2834 = vmatpush.bf16.msrb.mxu2 %v6260_v26  ;;  %v6224_v36 = vor.u32 %v7393_v15, %v6223_v56  ;;  %v6212_v43 = vor.u32 %v7387_v19, %v6209_v4  ;;  %v6185_v26 = vld [vmem:[#allocation11 + $0x50] sm:$0xf0]  ;;  %v7377_v19 = vld [vmem:[#allocation11 + $0x14] sm:$0xf0] }
 0x468   : > { %v6188_v50 = vor.u32 %v7382_v41, %v6185_v26 }
 0x469   : > { %2432 = vmatmul.bf16.vlgmr.msra.gmra.mxu1 %v2203_v11  ;;  %v6215_v11 = vld [vmem:[#allocation11 + $0x80] sm:$0xf] }
 0x46a   : > { %2819 = vmatpush.bf16.msrb.mxu1 %v6272_v40  ;;  %2793 = vmatpush.bf16.msra.mxu0 %v6232_v61  ;;  %v6216_v16 = vor.u32 %v7392_v18, %v6215_v11  ;;  %v7388_v40 = vld [vmem:[#allocation11 + $0x6c] sm:$0xf0]  ;;  %v6167_v18 = vld [vmem:[#allocation11 + $0x20] sm:$0xf] }
 0x46b   : > { %2807 = vmatpush.bf16.msra.mxu3 %v6236_v22  ;;  %2835 = vmatpush.bf16.msrb.mxu2 %v6244_v39  ;;  %v6200_v33 = vor.u32 %v7388_v40, %v6199_v17  ;;  %v6193_v22 = vld [vmem:[#allocation11 + $0x58] sm:$0xf0]  ;;  %v6168_v15 = vor.u32 %v7380_v29, %v6167_v18 }
 0x46c   : > { %v6196_v39 = vor.u32 %v7383_v37, %v6193_v22  ;;  %v6392_v37 = vor.u32 %v7436_v30, %v6391_v27  ;;  %v6393_v22 = vld [vmem:[#allocation12 + $0xf0] sm:$0xf0] }
 0x46e   : > { %2820 = vmatpush.bf16.msrb.mxu1 %v6256_v47  ;;  %2794 = vmatpush.bf16.msra.mxu0 %v6216_v16  ;;  %v7384_v47 = vld [vmem:[#allocation11 + $0x4c] sm:$0xf0]  ;;  %v7378_v16 = vld [vmem:[#allocation11 + $0x24] sm:$0xf] }
 0x46f   : > { %2808 = vmatpush.bf16.msra.mxu3 %v6220_v34  ;;  %2836 = vmatpush.bf16.msrb.mxu2 %v6228_v59  ;;  %v6169_v34 = vld [vmem:[#allocation11 + $0x30] sm:$0xf0]  ;;  %v7379_v59 = vld [vmem:[#allocation11 + $0x2c] sm:$0xf] }
 0x472   : > { %2821 = vmatpush.bf16.msrb.mxu1 %v6240_v42  ;;  %2795 = vmatpush.bf16.msra.mxu0 %v6200_v33  ;;  %v7376_v33 = vld [vmem:[#allocation11 + $0xc] sm:$0xf0] }
 0x473   : > { %2809 = vmatpush.bf16.msra.mxu3 %v6204_v63  ;;  %2837 = vmatpush.bf16.msrb.mxu2 %v6212_v43  ;;  %v6153_v63 = vld [vmem:[#allocation11 + $0x10] sm:$0xf0] }
 0x474   : > { %v6156_v41 = vor.u32 %v7374_v20, %v6153_v63  ;;  %v7433_v20 = vld [vmem:[#allocation12 + $0xd4] sm:$0xf0] }
 0x476   : > { %2822 = vmatpush.bf16.msrb.mxu1 %v6224_v36 }
 0x477   : > { %2810 = vmatpush.bf16.msra.mxu3 %v6188_v50  ;;  %2838 = vmatpush.bf16.msrb.mxu2 %v6196_v39 }
 0x47a   : > { %2823 = vmatpush.bf16.msrb.mxu1 %v6208_v28  ;;  %v6159_v28 = vld [vmem:[#allocation11 + $0x8] sm:$0xf] }
 0x47e   : > { %2824 = vmatpush.bf16.msrb.mxu1 %v6192_v38 }
 0x4dd   : > { %v2405_v6 = vpop.f32.mrf.mxu0 }
 0x4de   : > { %v2452_v1 = vadd.f32 %v2405_v6, %v8337_v46  ;;  %v6183_v46 = vld [vmem:[#allocation11 + $0x40] sm:$0xf] }
 0x4df   : > { %v6184_v35 = vor.u32 %v7384_v47, %v6183_v46  ;;  %v7375_v46 = vld [vmem:[#allocation11 + $0xc] sm:$0xf]  ;;  %v6161_v47 = vld [vmem:[#allocation11 + $0x18] sm:$0xf0] }
 0x4e0   : > { %v6143_v32 = vmul.f32 -1.442695, %v2452_v1  ;;  %v6177_v1 = vld [vmem:[#allocation11 + $0x38] sm:$0xf0]  ;;  %v6164_v26 = vor.u32 %v7375_v46, %v6161_v47  ;;  %v6359_v46 = vld [vmem:[#allocation12 + $0xa0] sm:$0xf] }
 0x4e1   : > { %2796 = vmatpush.bf16.msra.mxu0 %v6184_v35  ;;  %v6180_v40 = vor.u32 %v7379_v59, %v6177_v1  ;;  %v6160_v35 = vor.u32 %v7377_v19, %v6159_v28  ;;  %v7430_v59 = vld [vmem:[#allocation12 + $0xc4] sm:$0xf]  ;;  %v6377_v1 = vld [vmem:[#allocation12 + $0xd0] sm:$0xf0]  ;;  %v7431_v28 = vld [vmem:[#allocation12 + $0xcc] sm:$0xf] }
 0x4e2   : > { %7755 = vpow2.f32 %v6143_v32  ;;  %v6152_v32 = vor.u32 %v7376_v33, %v6151_v45  ;;  %v6383_v33 = vld [vmem:[#allocation12 + $0xc8] sm:$0xf]  ;;  %v6385_v19 = vld [vmem:[#allocation12 + $0xd8] sm:$0xf0]  ;;  %v7428_v47 = vld [vmem:[#allocation12 + $0xac] sm:$0xf0] }
 0x4e3   : > { %2839 = vmatpush.bf16.msrb.mxu2 %v6180_v40  ;;  %v6384_v27 = vor.u32 %v7433_v20, %v6383_v33  ;;  %v6388_v30 = vor.u32 %v7431_v28, %v6385_v19  ;;  %v7425_v33 = vld [vmem:[#allocation12 + $0x94] sm:$0xf0]  ;;  %v7423_v28 = vld [vmem:[#allocation12 + $0x8c] sm:$0xf]  ;;  %v6353_v19 = vld [vmem:[#allocation12 + $0x98] sm:$0xf0] }
 0x4e4   : > { %v2419_v23 = vpop.f32.mrf.mxu3  ;;  %v2447_v61 = vpop.f32.mrf.mxu2 }
 0x4e5   : > { %v2453_v42 = vadd.f32 %v2419_v23, %v8347_v52  ;;  %v2455_v24 = vadd.f32 %v2447_v61, %v8350_v54  ;;  %v2407_v49 = vpop.f32.mrf.mxu0  ;;  %v6172_v52 = vor.u32 %v7378_v16, %v6169_v34  ;;  %v7381_v54 = vld [vmem:[#allocation11 + $0x34] sm:$0xf0]  ;;  %2797 = vmatpush.bf16.msra.mxu0 %v6168_v15  ;;  %v7434_v23 = vld [vmem:[#allocation12 + $0xe4] sm:$0xf]  ;;  %v7435_v15 = vld [vmem:[#allocation12 + $0xec] sm:$0xf] }
 0x4e6   : > { %v2456_v11 = vadd.f32 %v2407_v49, %v8353_v8  ;;  %v6176_v8 = vor.u32 %v7381_v54, %v6175_v21  ;;  %v8668_v17 = vpop.f32.mrf.mxu1  ;;  %v7437_v49 = vld [vmem:[#allocation12 + $0xf4] sm:$0xf0]  ;;  %v6401_v34 = vld [vmem:[#allocation12 + $0xf8] sm:$0xf0] }
 0x4e7   : > { %v6145_v13 = vmul.f32 -1.442695, %v2453_v42  ;;  %v6147_v56 = vmul.f32 -1.442695, %v2455_v24  ;;  %2811 = vmatpush.bf16.msra.mxu3 %v6172_v52  ;;  %2840 = vmatpush.bf16.msrb.mxu2 %v6164_v26  ;;  %v7432_v52 = vld [vmem:[#allocation12 + $0xcc] sm:$0xf0]  ;;  %v2454_v40 = vadd.f32 %v8668_v17, %v8340_v48  ;;  %v6404_v63 = vor.u32 %v7435_v15, %v6401_v34 }
 0x4e8   : > { %v7756_v36 = vpop.eup %7755  ;;  %v6144_v51 = vmul.f32 -1.442695, %v2456_v11  ;;  %2825 = vmatpush.bf16.msrb.mxu1 %v6176_v8 }
 0x4e9   : > { %v8666_v6 = vadd.f32 1.0, %v7756_v36  ;;  %7757 = vpow2.f32 %v6145_v13  ;;  %2798 = vmatpush.bf16.msra.mxu0 %v6152_v32 }
 0x4ea   : > { %7759 = vpow2.f32 %v6147_v56 }
 0x4eb   : > { %7761 = vrcp.f32 %v8666_v6  ;;  %2812 = vmatpush.bf16.msra.mxu3 %v6156_v41  ;;  %v2477_v18 = vand.u32 2147483647, %v8666_v6  ;;  %v2479_v56 = vand.u32 2147483648, %v8666_v6  ;;  %vm2473_vm3 = vweird.f32 %v8666_v6  ;;  %3084 = vmatpush.bf16.msra.mxu2 %v6404_v63 }
 0x4ec   : > { %7763 = vpow2.f32 %v6144_v51  ;;  %v2421_v31 = vpop.f32.mrf.mxu3  ;;  %v2449_v25 = vpop.f32.mrf.mxu2  ;;  %2826 = vmatpush.bf16.msrb.mxu1 %v6160_v35  ;;  %v6375_v51 = vld [vmem:[#allocation12 + $0xc0] sm:$0xf] }
 0x4ed   : > { %v2457_v4 = vadd.f32 %v2421_v31, %v8359_v60  ;;  %v2459_v43 = vadd.f32 %v2449_v25, %v8362_v62  ;;  %v6396_v60 = vor.u32 %v7434_v23, %v6393_v22  ;;  %v6399_v62 = vld [vmem:[#allocation12 + $0xe8] sm:$0xf]  ;;  %3042 = vmatpush.bf16.msrb.mxu0 %v6392_v37  ;;  %v8694_v25 = vor.u32 1.1754944e-38, %v2479_v56  ;;  %v7426_v23 = vld [vmem:[#allocation12 + $0xa4] sm:$0xf] }
 0x4ee   : > { %v6400_v29 = vor.u32 %v7437_v49, %v6399_v62  ;;  %v2435_v8 = vpop.f32.mrf.mxu1  ;;  %v6376_v17 = vor.u32 %v7432_v52, %v6375_v51  ;;  %vm8709_vm5 = vcmp.eq.f32.partialorder %v2477_v18, 8.507059e+37  ;;  %v6360_v22 = vor.u32 %v7428_v47, %v6359_v46  ;;  %v6367_v18 = vld [vmem:[#allocation12 + $0xa8] sm:$0xf]  ;;  %v7427_v51 = vld [vmem:[#allocation12 + $0xac] sm:$0xf] }
 0x4ef   : > { %v7758_v61 = vpop.eup %7757  ;;  %v6146_v50 = vmul.f32 -1.442695, %v2457_v4  ;;  %v6148_v38 = vmul.f32 -1.442695, %v2459_v43  ;;  %3056 = vmatpush.bf16.msrb.mxu3 %v6396_v60  ;;  %v2458_v48 = vadd.f32 %v2435_v8, %v8356_v57  ;;  %v6380_v43 = vor.u32 %v7430_v59, %v6377_v1  ;;  %v6369_v52 = vld [vmem:[#allocation12 + $0xb8] sm:$0xf0]  ;;  %3085 = vmatpush.bf16.msra.mxu2 %v6388_v30 }
 0x4f0   : > { %v7760_v42 = vpop.eup %7759  ;;  %v8673_v24 = vadd.f32 1.0, %v7758_v61  ;;  %3070 = vmatpush.bf16.msra.mxu1 %v6400_v29  ;;  %v6361_v61 = vld [vmem:[#allocation12 + $0xb0] sm:$0xf0]  ;;  %v7424_v8 = vld [vmem:[#allocation12 + $0x8c] sm:$0xf0] }
 0x4f1   : > { %v8675_v39 = vpop.eup %7761  ;;  %v8677_v11 = vadd.f32 1.0, %v7760_v42  ;;  %7765 = vpow2.f32 %v6146_v50  ;;  %3043 = vmatpush.bf16.msrb.mxu0 %v6376_v17  ;;  %v6364_v42 = vor.u32 %v7426_v23, %v6361_v61  ;;  %v7422_v59 = vld [vmem:[#allocation12 + $0x84] sm:$0xf]  ;;  %v6372_v17 = vor.u32 %v7427_v51, %v6369_v52 }
 0x4f2   : > { %v7764_v16 = vpop.eup %7763  ;;  %v2469_v13 = vmul.f32 %v8675_v39, %v8666_v6  ;;  %7767 = vrcp.f32 %v8673_v24  ;;  %v2517_v54 = vand.u32 2147483648, %v8673_v24  ;;  %v2515_v45 = vand.u32 2147483647, %v8673_v24  ;;  %v7418_v49 = vld [vmem:[#allocation12 + $0x64] sm:$0xf] }
 0x4f3   : > { %7769 = vrcp.f32 %v8677_v11  ;;  %v8685_v36 = vadd.f32 1.0, %v7764_v16  ;;  %vm2474_vm4 = vweird.f32 %v8675_v39  ;;  %3057 = vmatpush.bf16.msrb.mxu3 %v6380_v43  ;;  %v7429_v16 = vld [vmem:[#allocation12 + $0xb4] sm:$0xf0]  ;;  %vm2511_vm8 = vweird.f32 %v8673_v24  ;;  %3086 = vmatpush.bf16.msra.mxu2 %v6372_v17  ;;  %v6313_v17 = vld [vmem:[#allocation12 + $0x50] sm:$0xf0] }
 0x4f4   : > { %v2470_v21 = vsub.f32 1.0, %v2469_v13  ;;  %7771 = vpow2.f32 %v6148_v38  ;;  %v8701_v35 = vor.u32 1.1754944e-38, %v2517_v54  ;;  %vm8716_vm6 = vcmp.eq.f32.partialorder %v2515_v45, 8.507059e+37  ;;  %3071 = vmatpush.bf16.msra.mxu1 %v6384_v27  ;;  %vm8730_vm7 = vmor %vm2473_vm3, %vm2474_vm4  ;;  %v6343_v54 = vld [vmem:[#allocation12 + $0x80] sm:$0xf] }
 0x4f5   : > { %7773 = vrcp.f32 %v8685_v36  ;;  %v2494_v32 = vand.u32 2147483648, %v8685_v36  ;;  %v2492_v37 = vand.u32 2147483647, %v8685_v36  ;;  %vm2488_vm10 = vweird.f32 %v8685_v36  ;;  %3044 = vmatpush.bf16.msrb.mxu0 %v6360_v22  ;;  %v6351_v45 = vld [vmem:[#allocation12 + $0x88] sm:$0xf] }
 0x4f6   : > { %v2471_v31 = vmul.f32 %v8675_v39, %v2470_v21  ;;  %v6344_v43 = vor.u32 %v7424_v8, %v6343_v54  ;;  %v6352_v30 = vor.u32 %v7425_v33, %v6351_v45  ;;  %v6356_v22 = vor.u32 %v7423_v28, %v6353_v19  ;;  %v6327_v38 = vld [vmem:[#allocation12 + $0x60] sm:$0xf]  ;;  %v6329_v54 = vld [vmem:[#allocation12 + $0x70] sm:$0xf0]  ;;  %v6335_v8 = vld [vmem:[#allocation12 + $0x68] sm:$0xf] }
 0x4f7   : > { %v7766_v4 = vpop.eup %7765  ;;  %v8720_v29 = vor.u32 1.1754944e-38, %v2494_v32  ;;  %vm8741_vm11 = vcmp.eq.f32.partialorder %v2492_v37, 8.507059e+37  ;;  %3058 = vmatpush.bf16.msrb.mxu3 %v6364_v42  ;;  %v2576_v37 = vld [vmem:[#allocation3 + $0x8] sm:$0xff]  ;;  %v6311_v33 = vld [vmem:[#allocation12 + $0x40] sm:$0xf]  ;;  %vm2551_vm3 = vweird.f32 %v8677_v11  ;;  %v6332_v6 = vor.u32 %v7418_v49, %v6329_v54 }
 0x4f8   : > { %v8699_v41 = vpop.eup %7767  ;;  %v8703_v26 = vadd.f32 1.0, %v7766_v4  ;;  %v2472_v62 = vadd.f32 %v8675_v39, %v2471_v31  ;;  %3087 = vmatpush.bf16.msra.mxu2 %v6356_v22  ;;  %v6337_v45 = vld [vmem:[#allocation12 + $0x78] sm:$0xf0]  ;;  %v7416_v28 = vld [vmem:[#allocation12 + $0x4c] sm:$0xf0] }
 0x4f9   : > { %v8705_v50 = vpop.eup %7769  ;;  %v2507_v57 = vmul.f32 %v8699_v41, %v8673_v24  ;;  %vm2512_vm9 = vweird.f32 %v8699_v41  ;;  %3045 = vmatpush.bf16.msrb.mxu0 %v6344_v43  ;;  %v6319_v43 = vld [vmem:[#allocation12 + $0x48] sm:$0xf] }
 0x4fa   : > { %v7772_v60 = vpop.eup %7771  ;;  %7775 = vrcp.f32 %v8703_v26  ;;  %v2547_v20 = vmul.f32 %v8705_v50, %v8677_v11  ;;  %v2532_v32 = vand.u32 2147483648, %v8703_v26  ;;  %v2476_v63 = vsel %vm8730_vm7, %v8675_v39, %v2472_v62  ;;  %vm8758_vm12 = vmor %vm2511_vm8, %vm2512_vm9  ;;  %v6303_v49 = vld [vmem:[#allocation12 + $0x28] sm:$0xf] }
 0x4fb   : > { %v8722_v13 = vpop.eup %7773  ;;  %v2508_v56 = vsub.f32 1.0, %v2507_v57  ;;  %v8724_v15 = vadd.f32 1.0, %v7772_v60  ;;  %7777 = vtanh.f32 %v2454_v40  ;;  %v6345_v40 = vld [vmem:[#allocation12 + $0x90] sm:$0xf0]  ;;  %v2530_v24 = vand.u32 2147483647, %v8703_v26 }
 0x4fc   : > { %v2484_v21 = vmul.f32 %v8722_v13, %v8685_v36  ;;  %7779 = vtanh.f32 %v2458_v48  ;;  %v6368_v48 = vor.u32 %v7429_v16, %v6367_v18  ;;  %vm2489_vm13 = vweird.f32 %v8722_v13 }
 0x4fd   : > { %v2509_v1 = vmul.f32 %v8699_v41, %v2508_v56  ;;  %7781 = vrcp.f32 %v8724_v15  ;;  %v6348_v39 = vor.u32 %v7422_v59, %v6345_v40  ;;  %v2548_v60 = vsub.f32 1.0, %v2547_v20  ;;  %vm8784_vm15 = vmor %vm2488_vm10, %vm2489_vm13  ;;  %v7421_v59 = vld [vmem:[#allocation12 + $0x74] sm:$0xf0]  ;;  %v7419_v40 = vld [vmem:[#allocation12 + $0x6c] sm:$0xf] }
 0x4fe   : > { %v2485_v31 = vsub.f32 1.0, %v2484_v21  ;;  %3072 = vmatpush.bf16.msra.mxu1 %v6368_v48  ;;  %v2481_v62 = vsel %vm8709_vm5, %v8694_v25, %v2476_v63  ;;  %v2533_v34 = vor.u32 1.1754944e-38, %v2532_v32  ;;  %vm2526_vm0 = vweird.f32 %v8703_v26  ;;  %v7414_v48 = vld [vmem:[#allocation12 + $0x44] sm:$0xf]  ;;  %v7408_v20 = vld [vmem:[#allocation12 + $0xc] sm:$0xf0] }
 0x4ff   : > { %v2510_v4 = vadd.f32 %v8699_v41, %v2509_v1  ;;  %3059 = vmatpush.bf16.msrb.mxu3 %v6348_v39  ;;  %vm8804_vm2 = vcmp.eq.f32.partialorder %v2530_v24, 8.507059e+37  ;;  %v2555_v63 = vand.u32 2147483647, %v8677_v11  ;;  %v2549_v19 = vmul.f32 %v8705_v50, %v2548_v60  ;;  %v7417_v39 = vld [vmem:[#allocation12 + $0x54] sm:$0xf0] }
 0x500   : > { %v8752_v46 = vpop.eup %7775  ;;  %v2486_v27 = vmul.f32 %v8722_v13, %v2485_v31  ;;  %v6340_v24 = vor.u32 %v7419_v40, %v6337_v45  ;;  %v2557_v60 = vand.u32 2147483648, %v8677_v11  ;;  %vm2552_vm4 = vweird.f32 %v8705_v50  ;;  %v7406_v32 = vld [vmem:[#allocation12 + $0x4] sm:$0xf]  ;;  %v2847_v11 = vld [vmem:[#allocation4 + $0x8] sm:$0xff] }
 0x501   : > { %v7778_v23 = vpop.eup %7777  ;;  %v2522_v61 = vmul.f32 %v8752_v46, %v8703_v26  ;;  %v2514_v57 = vsel %vm8758_vm12, %v8699_v41, %v2510_v4  ;;  %vm2527_vm14 = vweird.f32 %v8752_v46  ;;  %v2577_v26 = vld [vmem:[#allocation3] sm:$0xff]  ;;  %vm2566_vm7 = vweird.f32 %v8724_v15 }
 0x502   : > { %v7780_v42 = vpop.eup %7779  ;;  %v2519_v18 = vsel %vm8716_vm6, %v8701_v35, %v2514_v57  ;;  %v2487_v16 = vadd.f32 %v8722_v13, %v2486_v27  ;;  %v7420_v35 = vld [vmem:[#allocation12 + $0x6c] sm:$0xf0]  ;;  %v2580_v1 = vmul.f32 %v7778_v23, %v2481_v62  ;;  %3073 = vmatpush.bf16.msra.mxu1 %v6352_v30  ;;  %vm8797_vm1 = vmor %vm2526_vm0, %vm2527_vm14  ;;  %v6336_v27 = vor.u32 %v7421_v59, %v6335_v8  ;;  %v7415_v30 = vld [vmem:[#allocation12 + $0x4c] sm:$0xf] }
 0x503   : > { %v8777_v41 = vpop.eup %7781  ;;  %v2523_v56 = vsub.f32 1.0, %v2522_v61  ;;  %v2578_v52 = vmul.f32 %v2576_v37, %v2519_v18  ;;  %v6321_v23 = vld [vmem:[#allocation12 + $0x58] sm:$0xf0]  ;;  %3060 = vmatpush.bf16.msrb.mxu3 %v6332_v6  ;;  %v6312_v62 = vor.u32 %v7416_v28, %v6311_v33  ;;  %v6316_v18 = vor.u32 %v7414_v48, %v6313_v17  ;;  %3088 = vmatpush.bf16.msra.mxu2 %v6340_v24  ;;  %vm8832_vm6 = vmor %vm2551_vm3, %vm2552_vm4  ;;  %v6279_v33 = vld [vmem:[#allocation12] sm:$0xf] }
 0x504   : > { %v2562_v51 = vmul.f32 %v8777_v41, %v8724_v15  ;;  %v2491_v21 = vsel %vm8784_vm15, %v8722_v13, %v2487_v16  ;;  %v6295_v16 = vld [vmem:[#allocation12 + $0x20] sm:$0xf]  ;;  %vm2567_vm5 = vweird.f32 %v8777_v41  ;;  %v2570_v8 = vand.u32 2147483647, %v8724_v15  ;;  %v6287_v28 = vld [vmem:[#allocation12 + $0x8] sm:$0xf] }
 0x505   : > { %v2524_v36 = vmul.f32 %v8752_v46, %v2523_v56  ;;  %v2496_v31 = vsel %vm8741_vm11, %v8720_v29, %v2491_v21  ;;  %v8812_v47 = vadd.f32 %v2580_v1, %v2578_v52  ;;  %v6328_v29 = vor.u32 %v7420_v35, %v6327_v38  ;;  %v7412_v56 = vld [vmem:[#allocation12 + $0x2c] sm:$0xf0]  ;;  %v6297_v35 = vld [vmem:[#allocation12 + $0x30] sm:$0xf0]  ;;  %v7411_v52 = vld [vmem:[#allocation12 + $0x2c] sm:$0xf] }
 0x506   : > { %v2563_v13 = vsub.f32 1.0, %v2562_v51  ;;  %v2581_v37 = vmul.f32 %v7780_v42, %v2496_v31  ;;  %3074 = vmatpush.bf16.msra.mxu1 %v6336_v27  ;;  %v6320_v38 = vor.u32 %v7417_v39, %v6319_v43  ;;  %v7410_v42 = vld [vmem:[#allocation12 + $0x24] sm:$0xf]  ;;  %v7413_v51 = vld [vmem:[#allocation12 + $0x34] sm:$0xf0]  ;;  %v2572_v1 = vand.u32 2147483648, %v8724_v15  ;;  %vm8845_vm8 = vmor %vm2566_vm7, %vm2567_vm5 }
 0x507   : > { %v2525_v4 = vadd.f32 %v8752_v46, %v2524_v36  ;;  %3046 = vmatpush.bf16.msrb.mxu0 %v6328_v29  ;;  %v6305_v21 = vld [vmem:[#allocation12 + $0x38] sm:$0xf0]  ;;  %7783 = vtanh.f32 %v8812_v47  ;;  %3061 = vmatpush.bf16.msrb.mxu3 %v6316_v18  ;;  %v6296_v40 = vor.u32 %v7412_v56, %v6295_v16  ;;  %v6300_v45 = vor.u32 %v7410_v42, %v6297_v35  ;;  %v2621_v56 = vld [vmem:[%s9438_s9] sm:$0xf] }
 0x508   : > { %v2564_v61 = vmul.f32 %v8777_v41, %v2563_v13  ;;  %v6304_v13 = vor.u32 %v7413_v51, %v6303_v49  ;;  %v6308_v31 = vor.u32 %v7411_v52, %v6305_v21  ;;  %v6289_v48 = vld [vmem:[#allocation12 + $0x18] sm:$0xf0]  ;;  %v2558_v43 = vor.u32 1.1754944e-38, %v2557_v60 }
 0x509   : > { %v2529_v57 = vsel %vm8797_vm1, %v8752_v46, %v2525_v4  ;;  %v6324_v46 = vor.u32 %v7415_v30, %v6321_v23  ;;  %v7407_v4 = vld [vmem:[#allocation12 + $0xc] sm:$0xf]  ;;  %v6280_v15 = vor.u32 %v7408_v20, %v6279_v33  ;;  %v2573_v30 = vor.u32 1.1754944e-38, %v2572_v1 }
 0x50a   : > { %v2534_v22 = vsel %vm8804_vm2, %v2533_v34, %v2529_v57  ;;  %v2550_v34 = vadd.f32 %v8705_v50, %v2549_v19  ;;  %v2565_v36 = vadd.f32 %v8777_v41, %v2564_v61  ;;  %3075 = vmatpush.bf16.msra.mxu1 %v6320_v38  ;;  %v7409_v19 = vld [vmem:[#allocation12 + $0x14] sm:$0xf0]  ;;  %v6292_v23 = vor.u32 %v7407_v4, %v6289_v48 }
 0x50b   : > { %v2579_v25 = vmul.f32 %v2577_v26, %v2534_v22  ;;  %3047 = vmatpush.bf16.msrb.mxu0 %v6312_v62  ;;  %3089 = vmatpush.bf16.msra.mxu2 %v6324_v46  ;;  %v6281_v26 = vld [vmem:[#allocation12 + $0x10] sm:$0xf0]  ;;  %vm2556_vm9 = vcmp.eq.f32.partialorder %v2555_v63, 8.507059e+37  ;;  %vm2571_vm10 = vcmp.eq.f32.partialorder %v2570_v8, 8.507059e+37  ;;  %v2848_v63 = vld [vmem:[#allocation4] sm:$0xff]  ;;  %v2623_v38 = vperm.slane %v2621_v56, 0 }
 0x50c   : > { %v2554_v17 = vsel %vm8832_vm6, %v8705_v50, %v2550_v34  ;;  %v2569_v6 = vsel %vm8845_vm8, %v8777_v41, %v2565_v36  ;;  %3062 = vmatpush.bf16.msrb.mxu3 %v6300_v45  ;;  %v6284_v27 = vor.u32 %v7406_v32, %v6281_v26  ;;  %v6288_v50 = vor.u32 %v7409_v19, %v6287_v28 }
 0x50d   : > { %v8824_v54 = vadd.f32 %v2581_v37, %v2579_v25  ;;  %v7784_v39 = vpop.eup %7783  ;;  %v2559_v57 = vsel %vm2556_vm9, %v2558_v43, %v2554_v17  ;;  %v2574_v37 = vsel %vm2571_vm10, %v2573_v30, %v2569_v6  ;;  %v2849_v60 = vpack.c.bf16 %v2848_v63, %v2847_v11 }
 0x50e   : > { %3076 = vmatpush.bf16.msra.mxu1 %v6304_v13  ;;  %v8854_v24 = vmul.f32 %v7784_v39, %v2559_v57  ;;  %v2624_v51 = vperm.slane %v2621_v56, 1  ;;  %v2626_v21 = vperm.slane %v2621_v56, 3  ;;  %v2625_v63 = vperm.slane %v2621_v56, 2 }
 0x50f   : > { %7785 = vtanh.f32 %v8824_v54  ;;  %3048 = vmatpush.bf16.msrb.mxu0 %v6296_v40  ;;  %3090 = vmatpush.bf16.msra.mxu2 %v6308_v31 }
 0x510   : > { %3063 = vmatpush.bf16.msrb.mxu3 %v6284_v27 }
 0x512   : > { %3077 = vmatpush.bf16.msra.mxu1 %v6288_v50 }
 0x513   : > { %3049 = vmatpush.bf16.msrb.mxu0 %v6280_v15  ;;  %3091 = vmatpush.bf16.msra.mxu2 %v6292_v23 }
 0x515   : > { %v7786_v61 = vpop.eup %7785 }
 0x516   : > { %v8856_v41 = vmul.f32 %v7786_v61, %v2574_v37 }
 0x518   : > { %v2588_v22 = vpack.c.bf16 %v8856_v41, %v8854_v24 }
 0x51a   : > { %2799 = vmatmul.bf16.vlgmr.msra.gmra.mxu0 %v2588_v22  ;;  %2813 = vmatmul.bf16.vlgmr.msra.gmra.mxu3 %v2588_v22 }
 0x51b   : > { %2827 = vmatmul.bf16.vlgmr.msrb.gmra.mxu1 %v2588_v22  ;;  %2841 = vmatmul.bf16.vlgmr.msrb.gmra.mxu2 %v2588_v22 }
 0x52a   : > { %3050 = vmatmul.bf16.vlgmr.msrb.gmra.mxu0 %v2849_v60  ;;  %3064 = vmatmul.bf16.vlgmr.msrb.gmra.mxu3 %v2849_v60 }
 0x52b   : > { %3078 = vmatmul.bf16.vlgmr.msra.gmra.mxu1 %v2849_v60  ;;  %3092 = vmatmul.bf16.vlgmr.msra.gmra.mxu2 %v2849_v60 }
 0x597   : > { %v2800_v62 = vpop.f32.mrf.mxu0 }
 0x598   : > { %v2828_v46 = vpop.f32.mrf.mxu1  ;;  %v2801_v35 = vadd.f32 %v2800_v62, %v2623_v38 }
 0x59d   : > { %v2814_v18 = vpop.f32.mrf.mxu3 }
 0x59e   : > { %v2842_v16 = vpop.f32.mrf.mxu2  ;;  %v2815_v59 = vadd.f32 %v2814_v18, %v2624_v51 }
 0x59f   : > { %v2802_v25 = vpop.f32.mrf.mxu0  ;;  %v2843_v1 = vadd.f32 %v2842_v16, %v2626_v21  ;;  %v2829_v16 = vadd.f32 %v2828_v46, %v2625_v63 }
 0x5a0   : > { %v2830_v36 = vpop.f32.mrf.mxu1  ;;  %v2803_v45 = vadd.f32 %v2802_v25, %v2623_v38 }
 0x5a5   : > { %v2816_v42 = vpop.f32.mrf.mxu3 }
 0x5a6   : > { %v2844_v49 = vpop.f32.mrf.mxu2  ;;  %v2817_v17 = vadd.f32 %v2816_v42, %v2624_v51 }
 0x5a7   : > { %v3051_v34 = vpop.f32.mrf.mxu0  ;;  %v2845_v43 = vadd.f32 %v2844_v49, %v2626_v21  ;;  %v2831_v49 = vadd.f32 %v2830_v36, %v2625_v63 }
 0x5a8   : > { %v3098_v52 = vadd.f32 %v3051_v34, %v2801_v35  ;;  %v3079_v6 = vpop.f32.mrf.mxu1 }
 0x5a9   : > { %v3100_v34 = vadd.f32 %v3079_v6, %v2829_v16  ;;  %v3222_v6 = vld [vmem:[#allocation5] sm:$0xff] }
 0x5aa   : > { %v6405_v8 = vmul.f32 -1.442695, %v3098_v52 }
 0x5ac   : > { %7787 = vpow2.f32 %v6405_v8 }
 0x5ad   : > { %v3065_v40 = vpop.f32.mrf.mxu3 }
 0x5ae   : > { %v3099_v33 = vadd.f32 %v3065_v40, %v2815_v59  ;;  %v3093_v20 = vpop.f32.mrf.mxu2 }
 0x5af   : > { %v3101_v13 = vadd.f32 %v3093_v20, %v2843_v1  ;;  %v3053_v31 = vpop.f32.mrf.mxu0 }
 0x5b0   : > { %v6407_v32 = vmul.f32 -1.442695, %v3099_v33  ;;  %v3102_v26 = vadd.f32 %v3053_v31, %v2803_v45  ;;  %v3081_v42 = vpop.f32.mrf.mxu1 }
 0x5b1   : > { %v6409_v28 = vmul.f32 -1.442695, %v3101_v13  ;;  %v3104_v46 = vadd.f32 %v3081_v42, %v2831_v49 }
 0x5b2   : > { %v7788_v19 = vpop.eup %7787  ;;  %7789 = vpow2.f32 %v6407_v32  ;;  %v6406_v4 = vmul.f32 -1.442695, %v3102_v26 }
 0x5b3   : > { %v3112_v48 = vadd.f32 1.0, %v7788_v19  ;;  %7791 = vpow2.f32 %v6409_v28 }
 0x5b4   : > { %7793 = vpow2.f32 %v6406_v4 }
 0x5b5   : > { %7795 = vrcp.f32 %v3112_v48  ;;  %v3067_v29 = vpop.f32.mrf.mxu3  ;;  %v3125_v8 = vand.u32 2147483648, %v3112_v48  ;;  %vm3119_vm12 = vweird.f32 %v3112_v48  ;;  %v3123_v40 = vand.u32 2147483647, %v3112_v48 }
 0x5b6   : > { %v3103_v15 = vadd.f32 %v3067_v29, %v2817_v17  ;;  %v3095_v27 = vpop.f32.mrf.mxu2 }
 0x5b7   : > { %v3105_v39 = vadd.f32 %v3095_v27, %v2845_v43  ;;  %v3126_v28 = vor.u32 1.1754944e-38, %v3125_v8  ;;  %vm3124_vm15 = vcmp.eq.f32.partialorder %v3123_v40, 8.507059e+37 }
 0x5b8   : > { %v7790_v30 = vpop.eup %7789  ;;  %v6408_v50 = vmul.f32 -1.442695, %v3103_v15 }
 0x5b9   : > { %v7792_v23 = vpop.eup %7791  ;;  %v3150_v61 = vadd.f32 1.0, %v7790_v30  ;;  %v6410_v22 = vmul.f32 -1.442695, %v3105_v39 }
 0x5ba   : > { %v7794_v57 = vpop.eup %7793  ;;  %v8864_v37 = vadd.f32 1.0, %v7792_v23  ;;  %7797 = vpow2.f32 %v6408_v50 }
 0x5bb   : > { %v7796_v11 = vpop.eup %7795  ;;  %7799 = vrcp.f32 %v3150_v61  ;;  %v8867_v18 = vadd.f32 1.0, %v7794_v57  ;;  %v3161_v33 = vand.u32 2147483647, %v3150_v61  ;;  %v3163_v20 = vand.u32 2147483648, %v3150_v61 }
 0x5bc   : > { %v3115_v60 = vmul.f32 %v7796_v11, %v3112_v48  ;;  %7801 = vrcp.f32 %v8864_v37  ;;  %vm3120_vm11 = vweird.f32 %v7796_v11  ;;  %vm3157_vm0 = vweird.f32 %v3150_v61 }
 0x5bd   : > { %7803 = vpow2.f32 %v6410_v22  ;;  %vm8877_vm13 = vmor %vm3119_vm12, %vm3120_vm11  ;;  %vm3162_vm2 = vcmp.eq.f32.partialorder %v3161_v33, 8.507059e+37  ;;  %v3164_v29 = vor.u32 1.1754944e-38, %v3163_v20  ;;  %vm3197_vm3 = vweird.f32 %v8864_v37 }
 0x5be   : > { %v3116_v62 = vsub.f32 1.0, %v3115_v60  ;;  %7805 = vrcp.f32 %v8867_v18  ;;  %v3203_v39 = vand.u32 2147483648, %v8864_v37  ;;  %v3140_v30 = vand.u32 2147483648, %v8867_v18 }
 0x5bf   : > { %v3138_v60 = vand.u32 2147483647, %v8867_v18  ;;  %vm3134_vm6 = vweird.f32 %v8867_v18 }
 0x5c0   : > { %v7798_v25 = vpop.eup %7797  ;;  %v3117_v38 = vmul.f32 %v7796_v11, %v3116_v62  ;;  %v3141_v8 = vor.u32 1.1754944e-38, %v3140_v30 }
 0x5c1   : > { %v7800_v35 = vpop.eup %7799  ;;  %v8870_v51 = vadd.f32 1.0, %v7798_v25  ;;  %vm3139_vm9 = vcmp.eq.f32.partialorder %v3138_v60, 8.507059e+37 }
 0x5c2   : > { %v8872_v56 = vpop.eup %7801  ;;  %v3118_v52 = vadd.f32 %v7796_v11, %v3117_v38  ;;  %v3153_v21 = vmul.f32 %v7800_v35, %v3150_v61  ;;  %vm3158_vm14 = vweird.f32 %v7800_v35 }
 0x5c3   : > { %v3193_v59 = vmul.f32 %v8872_v56, %v8864_v37  ;;  %7807 = vrcp.f32 %v8870_v51  ;;  %v7804_v1 = vpop.eup %7803  ;;  %vm3159_vm1 = vmor %vm3157_vm0, %vm3158_vm14  ;;  %vm3198_vm5 = vweird.f32 %v8872_v56  ;;  %v3178_v38 = vand.u32 2147483648, %v8870_v51 }
 0x5c4   : > { %v3154_v45 = vsub.f32 1.0, %v3153_v21  ;;  %7809 = vtanh.f32 %v3100_v34  ;;  %v8881_v13 = vadd.f32 1.0, %v7804_v1  ;;  %v7806_v31 = vpop.eup %7805  ;;  %v3122_v32 = vsel %vm8877_vm13, %v7796_v11, %v3118_v52  ;;  %vm3199_vm12 = vmor %vm3197_vm3, %vm3198_vm5 }
 0x5c5   : > { %v3194_v19 = vsub.f32 1.0, %v3193_v59  ;;  %v3130_v4 = vmul.f32 %v7806_v31, %v8867_v18  ;;  %7811 = vtanh.f32 %v3104_v46  ;;  %v3127_v43 = vsel %vm3124_vm15, %v3126_v28, %v3122_v32 }
 0x5c6   : > { %v3155_v26 = vmul.f32 %v7800_v35, %v3154_v45  ;;  %7813 = vrcp.f32 %v8881_v13  ;;  %vm3135_vm4 = vweird.f32 %v7806_v31  ;;  %v3176_v34 = vand.u32 2147483647, %v8870_v51  ;;  %v3223_v45 = vld [vmem:[#allocation5 + $0x8] sm:$0xff] }
 0x5c7   : > { %v3131_v15 = vsub.f32 1.0, %v3130_v4  ;;  %v3195_v57 = vmul.f32 %v8872_v56, %v3194_v19  ;;  %vm3136_vm7 = vmor %vm3134_vm6, %vm3135_vm4  ;;  %vm3172_vm10 = vweird.f32 %v8870_v51  ;;  %v3201_v18 = vand.u32 2147483647, %v8864_v37 }
 0x5c8   : > { %v3156_v48 = vadd.f32 %v7800_v35, %v3155_v26  ;;  %v3179_v40 = vor.u32 1.1754944e-38, %v3178_v38  ;;  %vm3177_vm13 = vcmp.eq.f32.partialorder %v3176_v34, 8.507059e+37  ;;  %v3204_v26 = vor.u32 1.1754944e-38, %v3203_v39 }
 0x5c9   : > { %v7808_v17 = vpop.eup %7807  ;;  %v3132_v22 = vmul.f32 %v7806_v31, %v3131_v15  ;;  %v3196_v52 = vadd.f32 %v8872_v56, %v3195_v57  ;;  %vm3202_vm14 = vcmp.eq.f32.partialorder %v3201_v18, 8.507059e+37  ;;  %v3218_v37 = vand.u32 2147483648, %v8881_v13 }
 0x5ca   : > { %v3160_v27 = vsel %vm3159_vm1, %v7800_v35, %v3156_v48  ;;  %v3168_v50 = vmul.f32 %v7808_v17, %v8870_v51  ;;  %v7810_v23 = vpop.eup %7809  ;;  %vm3173_vm8 = vweird.f32 %v7808_v17  ;;  %vm3212_vm0 = vweird.f32 %v8881_v13 }
 0x5cb   : > { %v3165_v61 = vsel %vm3162_vm2, %v3164_v29, %v3160_v27  ;;  %v3226_v11 = vmul.f32 %v7810_v23, %v3127_v43  ;;  %v7812_v16 = vpop.eup %7811  ;;  %v3133_v25 = vadd.f32 %v7806_v31, %v3132_v22  ;;  %vm3174_vm11 = vmor %vm3172_vm10, %vm3173_vm8  ;;  %v3200_v20 = vsel %vm3199_vm12, %v8872_v56, %v3196_v52 }
 0x5cc   : > { %v3224_v63 = vmul.f32 %v3222_v6, %v3165_v61  ;;  %v3169_v62 = vsub.f32 1.0, %v3168_v50  ;;  %v7814_v42 = vpop.eup %7813  ;;  %v3205_v4 = vsel %vm3202_vm14, %v3204_v26, %v3200_v20  ;;  %v3219_v6 = vor.u32 1.1754944e-38, %v3218_v37 }
 0x5cd   : > { %v3137_v21 = vsel %vm3136_vm7, %v7806_v31, %v3133_v25  ;;  %v3208_v59 = vmul.f32 %v7814_v42, %v8881_v13  ;;  %vm3213_vm15 = vweird.f32 %v7814_v42 }
 0x5ce   : > { %v3228_v35 = vadd.f32 %v3226_v11, %v3224_v63  ;;  %v3170_v49 = vmul.f32 %v7808_v17, %v3169_v62  ;;  %v3142_v1 = vsel %vm3139_vm9, %v3141_v8, %v3137_v21  ;;  %vm3214_vm1 = vmor %vm3212_vm0, %vm3213_vm15 }
 0x5cf   : > { %v3209_v36 = vsub.f32 1.0, %v3208_v59  ;;  %v3227_v51 = vmul.f32 %v7812_v16, %v3142_v1 }
 0x5d0   : > { %7815 = vtanh.f32 %v3228_v35  ;;  %v3171_v46 = vadd.f32 %v7808_v17, %v3170_v49 }
 0x5d1   : > { %v3210_v32 = vmul.f32 %v7814_v42, %v3209_v36 }
 0x5d2   : > { %v3175_v33 = vsel %vm3174_vm11, %v7808_v17, %v3171_v46  ;;  %v3216_v17 = vand.u32 2147483647, %v8881_v13 }
 0x5d3   : > { %v3180_v31 = vsel %vm3177_vm13, %v3179_v40, %v3175_v33  ;;  %v3211_v29 = vadd.f32 %v7814_v42, %v3210_v32 }
 0x5d4   : > { %v3225_v28 = vmul.f32 %v3223_v45, %v3180_v31  ;;  %vm3217_vm2 = vcmp.eq.f32.partialorder %v3216_v17, 8.507059e+37 }
 0x5d5   : > { %v3215_v56 = vsel %vm3214_vm1, %v7814_v42, %v3211_v29 }
 0x5d6   : > { %v7816_v19 = vpop.eup %7815  ;;  %v3229_v48 = vadd.f32 %v3227_v51, %v3225_v28  ;;  %v3220_v27 = vsel %vm3217_vm2, %v3219_v6, %v3215_v56 }
 0x5d7   : > { %v3232_v43 = vmul.f32 %v7816_v19, %v3205_v4 }
 0x5d8   : > { %7817 = vtanh.f32 %v3229_v48 }
 0x5db   : > { %3238 = sbr.rel (%p6411_p9) target bundleno = 1512 (0x5e8), region = 88 }
 0x5de   : > { %v7818_v15 = vpop.eup %7817 }
 0x5df   : > { %v3233_v39 = vmul.f32 %v7818_v15, %v3220_v27 }
 0x5e0   : > { %3239 = vst [vmem:[#allocation2] sm:$0xff] %v8854_v24 }
 0x5e1   : > { %3240 = vst [vmem:[#allocation2 + $0x8] sm:$0xff] %v8856_v41 }
 0x5e2   : > { %3241 = vst [vmem:[#allocation3 + $0x8] sm:$0xff] %v8812_v47 }
 0x5e3   : > { %3242 = vst [vmem:[#allocation3] sm:$0xff] %v8824_v54 }
 0x5e4   : > { %3243 = vst [vmem:[#allocation4 + $0x8] sm:$0xff] %v3232_v43 }
 0x5e5   : > { %3244 = vst [vmem:[#allocation4] sm:$0xff] %v3233_v39 }
 0x5e6   : > { %3245 = vst [vmem:[#allocation5] sm:$0xff] %v3228_v35 }
 0x5e7   : > { %3246 = vst [vmem:[#allocation5 + $0x8] sm:$0xff] %v3229_v48 }
 0x5e8 PF: > { %v6526_v13 = vld [vmem:[#allocation9 + $0xe0] sm:$0xf]  ;;  %v7468_v30 = vld [vmem:[#allocation9 + $0xec] sm:$0xf0]  ;;  %v7466_v50 = vld [vmem:[#allocation9 + $0xe4] sm:$0xf] }
 0x5e9   : > { %v6527_v23 = vor.u32 %v7468_v30, %v6526_v13  ;;  %v6528_v61 = vld [vmem:[#allocation9 + $0xf0] sm:$0xf0]  ;;  %v7467_v57 = vld [vmem:[#allocation9 + $0xec] sm:$0xf]  ;;  %v6536_v22 = vld [vmem:[#allocation9 + $0xf8] sm:$0xf0] }
 0x5ea   : > { %v6531_v11 = vor.u32 %v7466_v50, %v6528_v61  ;;  %v6539_v24 = vor.u32 %v7467_v57, %v6536_v22  ;;  %v6510_v63 = vld [vmem:[#allocation9 + $0xc0] sm:$0xf]  ;;  %v7464_v41 = vld [vmem:[#allocation9 + $0xcc] sm:$0xf0]  ;;  %v7462_v60 = vld [vmem:[#allocation9 + $0xc4] sm:$0xf] }
 0x5eb   : > { %3442 = vmatpush.bf16.msra.mxu0 %v6527_v23  ;;  %v6511_v47 = vor.u32 %v7464_v41, %v6510_v63  ;;  %v6512_v54 = vld [vmem:[#allocation9 + $0xd0] sm:$0xf0]  ;;  %v7463_v62 = vld [vmem:[#allocation9 + $0xcc] sm:$0xf]  ;;  %v6520_v16 = vld [vmem:[#allocation9 + $0xd8] sm:$0xf0] }
 0x5ec   : > { %3456 = vmatpush.bf16.msra.mxu3 %v6531_v11  ;;  %3484 = vmatpush.bf16.msrb.mxu2 %v6539_v24  ;;  %v6515_v25 = vor.u32 %v7462_v60, %v6512_v54  ;;  %v6523_v38 = vor.u32 %v7463_v62, %v6520_v16  ;;  %v6494_v42 = vld [vmem:[#allocation9 + $0xa0] sm:$0xf]  ;;  %v7460_v35 = vld [vmem:[#allocation9 + $0xac] sm:$0xf0]  ;;  %v7458_v49 = vld [vmem:[#allocation9 + $0xa4] sm:$0xf] }
 0x5ed   : > { %v6496_v34 = vld [vmem:[#allocation9 + $0xb0] sm:$0xf0]  ;;  %v7459_v52 = vld [vmem:[#allocation9 + $0xac] sm:$0xf]  ;;  %v6504_v21 = vld [vmem:[#allocation9 + $0xb8] sm:$0xf0]  ;;  %v6495_v8 = vor.u32 %v7460_v35, %v6494_v42 }
 0x5ee   : > { %v6499_v59 = vor.u32 %v7458_v49, %v6496_v34  ;;  %v6507_v46 = vor.u32 %v7459_v52, %v6504_v21  ;;  %v6478_v18 = vld [vmem:[#allocation9 + $0x80] sm:$0xf]  ;;  %v7456_v1 = vld [vmem:[#allocation9 + $0x8c] sm:$0xf0]  ;;  %v7454_v40 = vld [vmem:[#allocation9 + $0x84] sm:$0xf] }
 0x5ef   : > { %3443 = vmatpush.bf16.msra.mxu0 %v6511_v47  ;;  %v6480_v45 = vld [vmem:[#allocation9 + $0x90] sm:$0xf0]  ;;  %v7455_v36 = vld [vmem:[#allocation9 + $0x8c] sm:$0xf]  ;;  %v6488_v33 = vld [vmem:[#allocation9 + $0x98] sm:$0xf0]  ;;  %v6479_v32 = vor.u32 %v7456_v1, %v6478_v18 }
 0x5f0   : > { %3457 = vmatpush.bf16.msra.mxu3 %v6515_v25  ;;  %3485 = vmatpush.bf16.msrb.mxu2 %v6523_v38  ;;  %v6534_v20 = vld [vmem:[#allocation9 + $0xe8] sm:$0xf]  ;;  %v7469_v31 = vld [vmem:[#allocation9 + $0xf4] sm:$0xf0]  ;;  %v6462_v26 = vld [vmem:[#allocation9 + $0x60] sm:$0xf]  ;;  %v6483_v19 = vor.u32 %v7454_v40, %v6480_v45  ;;  %v6491_v4 = vor.u32 %v7455_v36, %v6488_v33 }
 0x5f1   : > { %v7452_v51 = vld [vmem:[#allocation9 + $0x6c] sm:$0xf0]  ;;  %v6535_v28 = vor.u32 %v7469_v31, %v6534_v20  ;;  %v7450_v48 = vld [vmem:[#allocation9 + $0x64] sm:$0xf]  ;;  %v6464_v43 = vld [vmem:[#allocation9 + $0x70] sm:$0xf0] }
 0x5f2   : > { %v6518_v29 = vld [vmem:[#allocation9 + $0xc8] sm:$0xf]  ;;  %v7451_v37 = vld [vmem:[#allocation9 + $0x6c] sm:$0xf]  ;;  %v6472_v17 = vld [vmem:[#allocation9 + $0x78] sm:$0xf0]  ;;  %v6463_v15 = vor.u32 %v7452_v51, %v6462_v26  ;;  %v6467_v13 = vor.u32 %v7450_v48, %v6464_v43 }
 0x5f3   : > { %3444 = vmatpush.bf16.msra.mxu0 %v6495_v8  ;;  %3470 = vmatpush.bf16.msrb.mxu1 %v6535_v28  ;;  %v7465_v56 = vld [vmem:[#allocation9 + $0xd4] sm:$0xf0]  ;;  %v6502_v27 = vld [vmem:[#allocation9 + $0xa8] sm:$0xf]  ;;  %v6475_v30 = vor.u32 %v7451_v37, %v6472_v17  ;;  %v6446_v50 = vld [vmem:[#allocation9 + $0x40] sm:$0xf] }
 0x5f4   : > { %3458 = vmatpush.bf16.msra.mxu3 %v6499_v59  ;;  %3486 = vmatpush.bf16.msrb.mxu2 %v6507_v46  ;;  %v6519_v6 = vor.u32 %v7465_v56, %v6518_v29  ;;  %v7461_v39 = vld [vmem:[#allocation9 + $0xb4] sm:$0xf0]  ;;  %v7448_v23 = vld [vmem:[#allocation9 + $0x4c] sm:$0xf0]  ;;  %v7446_v61 = vld [vmem:[#allocation9 + $0x44] sm:$0xf] }
 0x5f5   : > { %v6448_v57 = vld [vmem:[#allocation9 + $0x50] sm:$0xf0]  ;;  %v7447_v22 = vld [vmem:[#allocation9 + $0x4c] sm:$0xf]  ;;  %v6456_v11 = vld [vmem:[#allocation9 + $0x58] sm:$0xf0]  ;;  %v6503_v24 = vor.u32 %v7461_v39, %v6502_v27  ;;  %v6447_v41 = vor.u32 %v7448_v23, %v6446_v50 }
 0x5f6   : > { %v6486_v63 = vld [vmem:[#allocation9 + $0x88] sm:$0xf]  ;;  %v7457_v60 = vld [vmem:[#allocation9 + $0x94] sm:$0xf0]  ;;  %v6451_v47 = vor.u32 %v7446_v61, %v6448_v57  ;;  %v6459_v54 = vor.u32 %v7447_v22, %v6456_v11  ;;  %v6430_v62 = vld [vmem:[#allocation9 + $0x20] sm:$0xf] }
 0x5f7   : > { %3445 = vmatpush.bf16.msra.mxu0 %v6479_v32  ;;  %3471 = vmatpush.bf16.msrb.mxu1 %v6519_v6  ;;  %v7444_v16 = vld [vmem:[#allocation9 + $0x2c] sm:$0xf0]  ;;  %v7442_v25 = vld [vmem:[#allocation9 + $0x24] sm:$0xf]  ;;  %v6432_v38 = vld [vmem:[#allocation9 + $0x30] sm:$0xf0]  ;;  %v6487_v49 = vor.u32 %v7457_v60, %v6486_v63 }
 0x5f8   : > { %3459 = vmatpush.bf16.msra.mxu3 %v6483_v19  ;;  %3487 = vmatpush.bf16.msrb.mxu2 %v6491_v4  ;;  %v7443_v42 = vld [vmem:[#allocation9 + $0x2c] sm:$0xf]  ;;  %v6440_v35 = vld [vmem:[#allocation9 + $0x38] sm:$0xf0]  ;;  %v6470_v34 = vld [vmem:[#allocation9 + $0x68] sm:$0xf]  ;;  %v6431_v21 = vor.u32 %v7444_v16, %v6430_v62  ;;  %v6435_v8 = vor.u32 %v7442_v25, %v6432_v38 }
 0x5f9   : > { %v7453_v52 = vld [vmem:[#allocation9 + $0x74] sm:$0xf0]  ;;  %v6443_v59 = vor.u32 %v7443_v42, %v6440_v35  ;;  %v6414_v46 = vld [vmem:[#allocation9] sm:$0xf]  ;;  %v7440_v18 = vld [vmem:[#allocation9 + $0xc] sm:$0xf0] }
 0x5fa   : > { %v7438_v1 = vld [vmem:[#allocation9 + $0x4] sm:$0xf]  ;;  %v6416_v40 = vld [vmem:[#allocation9 + $0x10] sm:$0xf0]  ;;  %v7439_v45 = vld [vmem:[#allocation9 + $0xc] sm:$0xf]  ;;  %v6471_v33 = vor.u32 %v7453_v52, %v6470_v34  ;;  %v6415_v32 = vor.u32 %v7440_v18, %v6414_v46 }
 0x5fb   : > { %3446 = vmatpush.bf16.msra.mxu0 %v6463_v15  ;;  %3472 = vmatpush.bf16.msrb.mxu1 %v6503_v24  ;;  %v6424_v36 = vld [vmem:[#allocation9 + $0x18] sm:$0xf0]  ;;  %v6454_v20 = vld [vmem:[#allocation9 + $0x48] sm:$0xf]  ;;  %v7449_v31 = vld [vmem:[#allocation9 + $0x54] sm:$0xf0]  ;;  %v6419_v28 = vor.u32 %v7438_v1, %v6416_v40 }
 0x5fc   : > { %3460 = vmatpush.bf16.msra.mxu3 %v6467_v13  ;;  %3488 = vmatpush.bf16.msrb.mxu2 %v6475_v30  ;;  %v3247_v26 = vld [vmem:[#allocation2] sm:$0xff]  ;;  %v3248_v51 = vld [vmem:[#allocation2 + $0x8] sm:$0xff]  ;;  %v6427_v19 = vor.u32 %v7439_v45, %v6424_v36  ;;  %v6455_v4 = vor.u32 %v7449_v31, %v6454_v20  ;;  %v7445_v29 = vld [vmem:[#allocation9 + $0x34] sm:$0xf0]  ;;  %s4280_s23 = sadd.s32 2, %s8243_s17 }
 0x5fd   : > { %v3249_v48 = vpack.c.bf16 %v3248_v51, %v3247_v26  ;;  %v6438_v43 = vld [vmem:[#allocation9 + $0x28] sm:$0xf]  ;;  %v7441_v56 = vld [vmem:[#allocation9 + $0x14] sm:$0xf0]  ;;  %v6660_v15 = vld [vmem:[#allocation11 + $0xe0] sm:$0xf] }
 0x5fe   : > { %v6439_v37 = vor.u32 %v7445_v29, %v6438_v43  ;;  %v6422_v17 = vld [vmem:[#allocation9 + $0x8] sm:$0xf]  ;;  %v7500_v27 = vld [vmem:[#allocation11 + $0xec] sm:$0xf0]  ;;  %v7498_v39 = vld [vmem:[#allocation11 + $0xe4] sm:$0xf] }
 0x5ff   : > { %3447 = vmatpush.bf16.msra.mxu0 %v6447_v41  ;;  %3473 = vmatpush.bf16.msrb.mxu1 %v6487_v49  ;;  %v6423_v6 = vor.u32 %v7441_v56, %v6422_v17  ;;  %v6661_v13 = vor.u32 %v7500_v27, %v6660_v15  ;;  %v6662_v30 = vld [vmem:[#allocation11 + $0xf0] sm:$0xf0]  ;;  %v6668_v50 = vld [vmem:[#allocation11 + $0xe8] sm:$0xf]  ;;  %v7501_v23 = vld [vmem:[#allocation11 + $0xf4] sm:$0xf0] }
 0x600   : > { %3461 = vmatpush.bf16.msra.mxu3 %v6451_v47  ;;  %3489 = vmatpush.bf16.msrb.mxu2 %v6459_v54  ;;  %v6665_v61 = vor.u32 %v7498_v39, %v6662_v30  ;;  %v6669_v57 = vor.u32 %v7501_v23, %v6668_v50  ;;  %v7499_v22 = vld [vmem:[#allocation11 + $0xec] sm:$0xf]  ;;  %v6670_v11 = vld [vmem:[#allocation11 + $0xf8] sm:$0xf0]  ;;  %v6644_v63 = vld [vmem:[#allocation11 + $0xc0] sm:$0xf] }
 0x601   : > { %v6673_v24 = vor.u32 %v7499_v22, %v6670_v11  ;;  %v7496_v41 = vld [vmem:[#allocation11 + $0xcc] sm:$0xf0]  ;;  %v7494_v60 = vld [vmem:[#allocation11 + $0xc4] sm:$0xf]  ;;  %v6646_v54 = vld [vmem:[#allocation11 + $0xd0] sm:$0xf0] }
 0x602   : > { %v6645_v47 = vor.u32 %v7496_v41, %v6644_v63  ;;  %v6652_v62 = vld [vmem:[#allocation11 + $0xc8] sm:$0xf]  ;;  %v7497_v16 = vld [vmem:[#allocation11 + $0xd4] sm:$0xf0]  ;;  %v6649_v25 = vor.u32 %v7494_v60, %v6646_v54  ;;  %v7495_v42 = vld [vmem:[#allocation11 + $0xcc] sm:$0xf] }
 0x603   : > { %3448 = vmatpush.bf16.msra.mxu0 %v6431_v21  ;;  %3474 = vmatpush.bf16.msrb.mxu1 %v6471_v33  ;;  %v6653_v38 = vor.u32 %v7497_v16, %v6652_v62  ;;  %v6654_v35 = vld [vmem:[#allocation11 + $0xd8] sm:$0xf0]  ;;  %v6628_v34 = vld [vmem:[#allocation11 + $0xa0] sm:$0xf]  ;;  %v7492_v52 = vld [vmem:[#allocation11 + $0xac] sm:$0xf0] }
 0x604   : > { %3462 = vmatpush.bf16.msra.mxu3 %v6435_v8  ;;  %3490 = vmatpush.bf16.msrb.mxu2 %v6443_v59  ;;  %v6657_v49 = vor.u32 %v7495_v42, %v6654_v35  ;;  %v7490_v21 = vld [vmem:[#allocation11 + $0xa4] sm:$0xf]  ;;  %v6629_v8 = vor.u32 %v7492_v52, %v6628_v34  ;;  %v6630_v59 = vld [vmem:[#allocation11 + $0xb0] sm:$0xf0]  ;;  %v6636_v46 = vld [vmem:[#allocation11 + $0xa8] sm:$0xf] }
 0x605   : > { %v7493_v18 = vld [vmem:[#allocation11 + $0xb4] sm:$0xf0]  ;;  %v6633_v1 = vor.u32 %v7490_v21, %v6630_v59  ;;  %v7491_v45 = vld [vmem:[#allocation11 + $0xac] sm:$0xf]  ;;  %v6638_v36 = vld [vmem:[#allocation11 + $0xb8] sm:$0xf0] }
 0x606   : > { %v6637_v40 = vor.u32 %v7493_v18, %v6636_v46  ;;  %v6641_v33 = vor.u32 %v7491_v45, %v6638_v36  ;;  %v6612_v20 = vld [vmem:[#allocation11 + $0x80] sm:$0xf]  ;;  %v7488_v31 = vld [vmem:[#allocation11 + $0x8c] sm:$0xf0]  ;;  %v6614_v51 = vld [vmem:[#allocation11 + $0x90] sm:$0xf0] }
 0x607   : > { %3449 = vmatpush.bf16.msra.mxu0 %v6415_v32  ;;  %3475 = vmatpush.bf16.msrb.mxu1 %v6455_v4  ;;  %v7486_v32 = vld [vmem:[#allocation11 + $0x84] sm:$0xf]  ;;  %v6613_v26 = vor.u32 %v7488_v31, %v6612_v20  ;;  %v7487_v43 = vld [vmem:[#allocation11 + $0x8c] sm:$0xf]  ;;  %v6622_v29 = vld [vmem:[#allocation11 + $0x98] sm:$0xf0] }
 0x608   : > { %3463 = vmatpush.bf16.msra.mxu3 %v6419_v28  ;;  %3491 = vmatpush.bf16.msrb.mxu2 %v6427_v19  ;;  %v6620_v28 = vld [vmem:[#allocation11 + $0x88] sm:$0xf]  ;;  %v7489_v19 = vld [vmem:[#allocation11 + $0x94] sm:$0xf0]  ;;  %v6617_v4 = vor.u32 %v7486_v32, %v6614_v51  ;;  %v6625_v17 = vor.u32 %v7487_v43, %v6622_v29  ;;  %v7484_v15 = vld [vmem:[#allocation11 + $0x6c] sm:$0xf0] }
 0x609   : > { %v7482_v27 = vld [vmem:[#allocation11 + $0x64] sm:$0xf]  ;;  %v6604_v30 = vld [vmem:[#allocation11 + $0x68] sm:$0xf]  ;;  %v7485_v50 = vld [vmem:[#allocation11 + $0x74] sm:$0xf0] }
 0x60a   : > { %3450 = vmatmul.bf16.vlgmr.msra.gmra.mxu0 %v3249_v48  ;;  %v7483_v22 = vld [vmem:[#allocation11 + $0x6c] sm:$0xf]  ;;  %v6606_v11 = vld [vmem:[#allocation11 + $0x78] sm:$0xf0]  ;;  %v7480_v63 = vld [vmem:[#allocation11 + $0x4c] sm:$0xf0] }
 0x60b   : > { %3464 = vmatmul.bf16.vlgmr.msra.gmra.mxu3 %v3249_v48  ;;  %3492 = vmatmul.bf16.vlgmr.msrb.gmra.mxu2 %v3249_v48  ;;  %v7478_v41 = vld [vmem:[#allocation11 + $0x44] sm:$0xf]  ;;  %v6588_v54 = vld [vmem:[#allocation11 + $0x48] sm:$0xf]  ;;  %v7481_v62 = vld [vmem:[#allocation11 + $0x54] sm:$0xf0] }
 0x60c   : > { %3476 = vmatpush.bf16.msrb.mxu1 %v6439_v37  ;;  %3837 = vmatpush.bf16.msrb.mxu0 %v6661_v13  ;;  %v6598_v13 = vld [vmem:[#allocation11 + $0x70] sm:$0xf0]  ;;  %v6589_v42 = vor.u32 %v7481_v62, %v6588_v54  ;;  %v7479_v35 = vld [vmem:[#allocation11 + $0x4c] sm:$0xf]  ;;  %v6564_v46 = vld [vmem:[#allocation11 + $0x20] sm:$0xf] }
 0x60d   : > { %3851 = vmatpush.bf16.msrb.mxu3 %v6665_v61  ;;  %3879 = vmatpush.bf16.msra.mxu2 %v6673_v24  ;;  %v6601_v61 = vor.u32 %v7482_v27, %v6598_v13  ;;  %v6609_v24 = vor.u32 %v7483_v22, %v6606_v11  ;;  %v7476_v18 = vld [vmem:[#allocation11 + $0x2c] sm:$0xf0]  ;;  %v6572_v32 = vld [vmem:[#allocation11 + $0x28] sm:$0xf]  ;;  %v7475_v51 = vld [vmem:[#allocation11 + $0x2c] sm:$0xf] }
 0x60e   : > { %v6565_v36 = vor.u32 %v7476_v18, %v6564_v46  ;;  %v7472_v43 = vld [vmem:[#allocation11 + $0xc] sm:$0xf0]  ;;  %v7470_v29 = vld [vmem:[#allocation11 + $0x4] sm:$0xf]  ;;  %v7473_v27 = vld [vmem:[#allocation11 + $0x14] sm:$0xf0] }
 0x60f   : > { %v6788_v22 = vld [vmem:[#allocation12 + $0xe0] sm:$0xf]  ;;  %v7532_v11 = vld [vmem:[#allocation12 + $0xec] sm:$0xf0]  ;;  %p6808_p10 = scmp.ge.s32.totalorder %s4280_s23, 6 }
 0x610   : > { %3477 = vmatpush.bf16.msrb.mxu1 %v6423_v6  ;;  %3838 = vmatpush.bf16.msrb.mxu0 %v6645_v47  ;;  %v6596_v6 = vld [vmem:[#allocation11 + $0x60] sm:$0xf]  ;;  %v6582_v47 = vld [vmem:[#allocation11 + $0x50] sm:$0xf0]  ;;  %v7528_v18 = vld [vmem:[#allocation12 + $0xcc] sm:$0xf0] }
 0x611   : > { %3852 = vmatpush.bf16.msrb.mxu3 %v6649_v25  ;;  %3880 = vmatpush.bf16.msra.mxu2 %v6657_v49  ;;  %v6597_v39 = vor.u32 %v7484_v15, %v6596_v6  ;;  %v6590_v49 = vld [vmem:[#allocation11 + $0x58] sm:$0xf0]  ;;  %v6550_v6 = vld [vmem:[#allocation11 + $0x10] sm:$0xf0]  ;;  %v6556_v15 = vld [vmem:[#allocation11 + $0x8] sm:$0xf] }
 0x612   : > { %v6772_v46 = vld [vmem:[#allocation12 + $0xc0] sm:$0xf] }
 0x613   : > { %3478 = vmatmul.bf16.vlgmr.msrb.gmra.mxu1 %v3249_v48  ;;  %v6621_v48 = vor.u32 %v7489_v19, %v6620_v28  ;;  %v6574_v28 = vld [vmem:[#allocation11 + $0x38] sm:$0xf0] }
 0x614   : > { %3865 = vmatpush.bf16.msra.mxu1 %v6669_v57  ;;  %3839 = vmatpush.bf16.msrb.mxu0 %v6629_v8  ;;  %v6605_v57 = vor.u32 %v7485_v50, %v6604_v30  ;;  %v6593_v8 = vor.u32 %v7479_v35, %v6590_v49  ;;  %v7471_v30 = vld [vmem:[#allocation11 + $0xc] sm:$0xf]  ;;  %v6558_v50 = vld [vmem:[#allocation11 + $0x18] sm:$0xf0] }
 0x615   : > { %3853 = vmatpush.bf16.msrb.mxu3 %v6633_v1  ;;  %3881 = vmatpush.bf16.msra.mxu2 %v6641_v33  ;;  %v7474_v1 = vld [vmem:[#allocation11 + $0x24] sm:$0xf]  ;;  %v6566_v33 = vld [vmem:[#allocation11 + $0x30] sm:$0xf0] }
 0x618   : > { %3866 = vmatpush.bf16.msra.mxu1 %v6653_v38  ;;  %3840 = vmatpush.bf16.msrb.mxu0 %v6613_v26  ;;  %v6585_v38 = vor.u32 %v7478_v41, %v6582_v47  ;;  %v6790_v47 = vld [vmem:[#allocation12 + $0xf0] sm:$0xf0] }
 0x619   : > { %3854 = vmatpush.bf16.msrb.mxu3 %v6617_v4  ;;  %3882 = vmatpush.bf16.msra.mxu2 %v6625_v17  ;;  %v6577_v4 = vor.u32 %v7475_v51, %v6574_v28 }
 0x61c   : > { %3867 = vmatpush.bf16.msra.mxu1 %v6637_v40  ;;  %3841 = vmatpush.bf16.msrb.mxu0 %v6597_v39 }
 0x61d   : > { %3855 = vmatpush.bf16.msrb.mxu3 %v6601_v61  ;;  %3883 = vmatpush.bf16.msra.mxu2 %v6609_v24  ;;  %v6557_v61 = vor.u32 %v7473_v27, %v6556_v15  ;;  %v7530_v24 = vld [vmem:[#allocation12 + $0xe4] sm:$0xf] }
 0x620   : > { %3868 = vmatpush.bf16.msra.mxu1 %v6621_v48  ;;  %v6548_v48 = vld [vmem:[#allocation11] sm:$0xf] }
 0x621   : > { %3856 = vmatpush.bf16.msrb.mxu3 %v6585_v38  ;;  %3884 = vmatpush.bf16.msra.mxu2 %v6593_v8  ;;  %v6798_v8 = vld [vmem:[#allocation12 + $0xf8] sm:$0xf0] }
 0x624   : > { %3869 = vmatpush.bf16.msra.mxu1 %v6605_v57  ;;  %v6561_v57 = vor.u32 %v7471_v30, %v6558_v50  ;;  %v6758_v30 = vld [vmem:[#allocation12 + $0xb0] sm:$0xf0] }
 0x625   : > { %3885 = vmatpush.bf16.msra.mxu2 %v6577_v4  ;;  %v7527_v4 = vld [vmem:[#allocation12 + $0xcc] sm:$0xf] }
 0x628   : > { %3870 = vmatpush.bf16.msra.mxu1 %v6589_v42 }
 0x629   : > { %3886 = vmatpush.bf16.msra.mxu2 %v6561_v57 }
 0x687   : > { %v3451_v37 = vpop.f32.mrf.mxu0 }
 0x688   : > { %v3498_v56 = vadd.f32 %v3451_v37, %v8365_v0  ;;  %v6580_v0 = vld [vmem:[#allocation11 + $0x40] sm:$0xf] }
 0x689   : > { %v6581_v60 = vor.u32 %v7480_v63, %v6580_v0 }
 0x68a   : > { %v6540_v23 = vmul.f32 -1.442695, %v3498_v56  ;;  %v6549_v56 = vor.u32 %v7472_v43, %v6548_v48  ;;  %v6782_v48 = vld [vmem:[#allocation12 + $0xd8] sm:$0xf0] }
 0x68b   : > { %3842 = vmatpush.bf16.msrb.mxu0 %v6581_v60  ;;  %v6789_v60 = vor.u32 %v7532_v11, %v6788_v22 }
 0x68c   : > { %7819 = vpow2.f32 %v6540_v23  ;;  %v6553_v23 = vor.u32 %v7470_v29, %v6550_v6 }
 0x68e   : > { %v3465_v16 = vpop.f32.mrf.mxu3  ;;  %v3493_v25 = vpop.f32.mrf.mxu2 }
 0x68f   : > { %v3499_v34 = vadd.f32 %v3465_v16, %v8371_v44  ;;  %v3501_v52 = vadd.f32 %v3493_v25, %v8374_v5  ;;  %v3453_v21 = vpop.f32.mrf.mxu0  ;;  %v6569_v44 = vor.u32 %v7474_v1, %v6566_v33  ;;  %v7477_v5 = vld [vmem:[#allocation11 + $0x34] sm:$0xf0]  ;;  %3843 = vmatpush.bf16.msrb.mxu0 %v6565_v36  ;;  %v7526_v36 = vld [vmem:[#allocation12 + $0xc4] sm:$0xf]  ;;  %v6774_v33 = vld [vmem:[#allocation12 + $0xd0] sm:$0xf0] }
 0x690   : > { %v3502_v59 = vadd.f32 %v3453_v21, %v8377_v7  ;;  %v6573_v7 = vor.u32 %v7477_v5, %v6572_v32  ;;  %v8921_v19 = vpop.f32.mrf.mxu1  ;;  %v7533_v16 = vld [vmem:[#allocation12 + $0xf4] sm:$0xf0]  ;;  %v7531_v21 = vld [vmem:[#allocation12 + $0xec] sm:$0xf]  ;;  %v6777_v29 = vor.u32 %v7526_v36, %v6774_v33 }
 0x691   : > { %v6542_v40 = vmul.f32 -1.442695, %v3499_v34  ;;  %v6544_v45 = vmul.f32 -1.442695, %v3501_v52  ;;  %3857 = vmatpush.bf16.msrb.mxu3 %v6569_v44  ;;  %v6780_v44 = vld [vmem:[#allocation12 + $0xc8] sm:$0xf]  ;;  %v6801_v28 = vor.u32 %v7531_v21, %v6798_v8 }
 0x692   : > { %v7820_v20 = vpop.eup %7819  ;;  %v6541_v31 = vmul.f32 -1.442695, %v3502_v59  ;;  %3871 = vmatpush.bf16.msra.mxu1 %v6573_v7  ;;  %v7529_v32 = vld [vmem:[#allocation12 + $0xd4] sm:$0xf0]  ;;  %v6742_v8 = vld [vmem:[#allocation12 + $0x90] sm:$0xf0] }
 0x693   : > { %v8919_v26 = vadd.f32 1.0, %v7820_v20  ;;  %7821 = vpow2.f32 %v6542_v40  ;;  %3844 = vmatpush.bf16.msrb.mxu0 %v6549_v56  ;;  %v3500_v20 = vadd.f32 %v8921_v19, %v8368_v2  ;;  %v6773_v19 = vor.u32 %v7528_v18, %v6772_v46  ;;  %4130 = vmatpush.bf16.msrb.mxu2 %v6801_v28  ;;  %v6748_v46 = vld [vmem:[#allocation12 + $0x88] sm:$0xf]  ;;  %v7521_v18 = vld [vmem:[#allocation12 + $0x94] sm:$0xf0] }
 0x694   : > { %7823 = vpow2.f32 %v6544_v45  ;;  %v6781_v27 = vor.u32 %v7529_v32, %v6780_v44  ;;  %v7519_v33 = vld [vmem:[#allocation12 + $0x8c] sm:$0xf] }
 0x695   : > { %7825 = vrcp.f32 %v8919_v26  ;;  %3858 = vmatpush.bf16.msrb.mxu3 %v6553_v23  ;;  %v3523_v42 = vand.u32 2147483647, %v8919_v26  ;;  %v3525_v52 = vand.u32 2147483648, %v8919_v26  ;;  %vm3519_vm3 = vweird.f32 %v8919_v26  ;;  %v6724_v23 = vld [vmem:[#allocation12 + $0x60] sm:$0xf] }
 0x696   : > { %7827 = vpow2.f32 %v6541_v31  ;;  %v3467_v37 = vpop.f32.mrf.mxu3  ;;  %v3495_v17 = vpop.f32.mrf.mxu2  ;;  %3872 = vmatpush.bf16.msra.mxu1 %v6557_v61 }
 0x697   : > { %v3503_v39 = vadd.f32 %v3467_v37, %v8383_v12  ;;  %v3505_v13 = vadd.f32 %v3495_v17, %v8386_v58  ;;  %v6793_v12 = vor.u32 %v7530_v24, %v6790_v47  ;;  %v6796_v58 = vld [vmem:[#allocation12 + $0xe8] sm:$0xf]  ;;  %4088 = vmatpush.bf16.msra.mxu0 %v6789_v60  ;;  %v8947_v7 = vor.u32 1.1754944e-38, %v3525_v52  ;;  %v6756_v37 = vld [vmem:[#allocation12 + $0xa0] sm:$0xf] }
 0x698   : > { %v6797_v35 = vor.u32 %v7533_v16, %v6796_v58  ;;  %v3481_v45 = vpop.f32.mrf.mxu1  ;;  %v7524_v17 = vld [vmem:[#allocation12 + $0xac] sm:$0xf0]  ;;  %vm8962_vm5 = vcmp.eq.f32.partialorder %v3523_v42, 8.507059e+37  ;;  %v7525_v60 = vld [vmem:[#allocation12 + $0xb4] sm:$0xf0] }
 0x699   : > { %v7822_v0 = vpop.eup %7821  ;;  %v6543_v63 = vmul.f32 -1.442695, %v3503_v39  ;;  %v6545_v41 = vmul.f32 -1.442695, %v3505_v13  ;;  %4102 = vmatpush.bf16.msra.mxu3 %v6793_v12  ;;  %v3504_v2 = vadd.f32 %v3481_v45, %v8380_v10  ;;  %v6785_v39 = vor.u32 %v7527_v4, %v6782_v48  ;;  %v7522_v13 = vld [vmem:[#allocation12 + $0xa4] sm:$0xf] }
 0x69a   : > { %v7824_v54 = vpop.eup %7823  ;;  %v8926_v62 = vadd.f32 1.0, %v7822_v0  ;;  %4116 = vmatpush.bf16.msrb.mxu1 %v6797_v35  ;;  %v6757_v57 = vor.u32 %v7524_v17, %v6756_v37  ;;  %v6761_v22 = vor.u32 %v7522_v13, %v6758_v30  ;;  %v7523_v16 = vld [vmem:[#allocation12 + $0xac] sm:$0xf]  ;;  %v6766_v42 = vld [vmem:[#allocation12 + $0xb8] sm:$0xf0]  ;;  %v6749_v48 = vor.u32 %v7521_v18, %v6748_v46 }
 0x69b   : > { %v8928_v25 = vpop.eup %7825  ;;  %v8930_v38 = vadd.f32 1.0, %v7824_v54  ;;  %7829 = vpow2.f32 %v6543_v63  ;;  %4089 = vmatpush.bf16.msra.mxu0 %v6773_v19  ;;  %4131 = vmatpush.bf16.msrb.mxu2 %v6785_v39  ;;  %v7518_v52 = vld [vmem:[#allocation12 + $0x84] sm:$0xf]  ;;  %v6769_v32 = vor.u32 %v7523_v16, %v6766_v42  ;;  %v6726_v0 = vld [vmem:[#allocation12 + $0x70] sm:$0xf0] }
 0x69c   : > { %v7828_v49 = vpop.eup %7827  ;;  %v3515_v34 = vmul.f32 %v8928_v25, %v8919_v26  ;;  %7831 = vrcp.f32 %v8926_v62  ;;  %v3563_v40 = vand.u32 2147483648, %v8926_v62  ;;  %v3561_v31 = vand.u32 2147483647, %v8926_v62  ;;  %v7515_v58 = vld [vmem:[#allocation12 + $0x6c] sm:$0xf] }
 0x69d   : > { %7833 = vrcp.f32 %v8930_v38  ;;  %v8938_v59 = vadd.f32 1.0, %v7828_v49  ;;  %vm3520_vm4 = vweird.f32 %v8928_v25  ;;  %4103 = vmatpush.bf16.msra.mxu3 %v6777_v29  ;;  %vm3557_vm8 = vweird.f32 %v8926_v62  ;;  %v6740_v49 = vld [vmem:[#allocation12 + $0x80] sm:$0xf]  ;;  %v3622_v29 = vld [vmem:[#allocation3 + $0x8] sm:$0xff]  ;;  %v7510_v18 = vld [vmem:[#allocation12 + $0x44] sm:$0xf] }
 0x69e   : > { %v3516_v1 = vsub.f32 1.0, %v3515_v34  ;;  %7835 = vpow2.f32 %v6545_v41  ;;  %v8954_v6 = vor.u32 1.1754944e-38, %v3563_v40  ;;  %vm8969_vm6 = vcmp.eq.f32.partialorder %v3561_v31, 8.507059e+37  ;;  %4117 = vmatpush.bf16.msrb.mxu1 %v6781_v27  ;;  %v6764_v41 = vld [vmem:[#allocation12 + $0xa8] sm:$0xf]  ;;  %vm8983_vm7 = vmor %vm3519_vm3, %vm3520_vm4 }
 0x69f   : > { %7837 = vrcp.f32 %v8938_v59  ;;  %v3540_v51 = vand.u32 2147483648, %v8938_v59  ;;  %v3538_v61 = vand.u32 2147483647, %v8938_v59  ;;  %v7520_v34 = vld [vmem:[#allocation12 + $0x8c] sm:$0xf0]  ;;  %vm3534_vm10 = vweird.f32 %v8938_v59  ;;  %4090 = vmatpush.bf16.msra.mxu0 %v6757_v57  ;;  %4132 = vmatpush.bf16.msrb.mxu2 %v6769_v32 }
 0x6a0   : > { %v3517_v5 = vmul.f32 %v8928_v25, %v3516_v1  ;;  %v6765_v44 = vor.u32 %v7525_v60, %v6764_v41  ;;  %v7514_v57 = vld [vmem:[#allocation12 + $0x64] sm:$0xf]  ;;  %v6732_v41 = vld [vmem:[#allocation12 + $0x68] sm:$0xf]  ;;  %v7517_v60 = vld [vmem:[#allocation12 + $0x74] sm:$0xf0]  ;;  %vm3597_vm3 = vweird.f32 %v8930_v38 }
 0x6a1   : > { %v7830_v43 = vpop.eup %7829  ;;  %v8973_v63 = vor.u32 1.1754944e-38, %v3540_v51  ;;  %vm8994_vm11 = vcmp.eq.f32.partialorder %v3538_v61, 8.507059e+37  ;;  %4104 = vmatpush.bf16.msra.mxu3 %v6761_v22  ;;  %v6734_v16 = vld [vmem:[#allocation12 + $0x78] sm:$0xf0]  ;;  %v6708_v42 = vld [vmem:[#allocation12 + $0x40] sm:$0xf]  ;;  %v6729_v26 = vor.u32 %v7514_v57, %v6726_v0 }
 0x6a2   : > { %v8952_v56 = vpop.eup %7831  ;;  %v8956_v15 = vadd.f32 1.0, %v7830_v43  ;;  %v3518_v24 = vadd.f32 %v8928_v25, %v3517_v5  ;;  %v6741_v5 = vor.u32 %v7520_v34, %v6740_v49  ;;  %4118 = vmatpush.bf16.msrb.mxu1 %v6765_v44  ;;  %v6737_v28 = vor.u32 %v7515_v58, %v6734_v16  ;;  %v7504_v0 = vld [vmem:[#allocation12 + $0xc] sm:$0xf0]  ;;  %v6684_v58 = vld [vmem:[#allocation12 + $0x8] sm:$0xf] }
 0x6a3   : > { %v8958_v50 = vpop.eup %7833  ;;  %v3553_v10 = vmul.f32 %v8952_v56, %v8926_v62  ;;  %vm3558_vm9 = vweird.f32 %v8952_v56  ;;  %v7505_v16 = vld [vmem:[#allocation12 + $0x14] sm:$0xf0] }
 0x6a4   : > { %v7836_v11 = vpop.eup %7835  ;;  %7839 = vrcp.f32 %v8956_v15  ;;  %v3593_v1 = vmul.f32 %v8958_v50, %v8930_v38  ;;  %v3578_v45 = vand.u32 2147483648, %v8956_v15  ;;  %v3522_v36 = vsel %vm8983_vm7, %v8928_v25, %v3518_v24  ;;  %vm9011_vm12 = vmor %vm3557_vm8, %vm3558_vm9  ;;  %4091 = vmatpush.bf16.msra.mxu0 %v6741_v5 }
 0x6a5   : > { %v8975_v47 = vpop.eup %7837  ;;  %v3554_v54 = vsub.f32 1.0, %v3553_v10  ;;  %v8977_v12 = vadd.f32 1.0, %v7836_v11  ;;  %7841 = vtanh.f32 %v3500_v20  ;;  %v6750_v20 = vld [vmem:[#allocation12 + $0x98] sm:$0xf0]  ;;  %v6745_v25 = vor.u32 %v7518_v52, %v6742_v8 }
 0x6a6   : > { %v3530_v35 = vmul.f32 %v8975_v47, %v8938_v59  ;;  %7843 = vtanh.f32 %v3504_v2  ;;  %vm3535_vm13 = vweird.f32 %v8975_v47  ;;  %v3576_v62 = vand.u32 2147483647, %v8956_v15  ;;  %4119 = vmatpush.bf16.msrb.mxu1 %v6749_v48 }
 0x6a7   : > { %v3555_v21 = vmul.f32 %v8952_v56, %v3554_v54  ;;  %7845 = vrcp.f32 %v8977_v12  ;;  %v6753_v37 = vor.u32 %v7519_v33, %v6750_v20  ;;  %v3594_v27 = vsub.f32 1.0, %v3593_v1  ;;  %4105 = vmatpush.bf16.msra.mxu3 %v6745_v25  ;;  %vm9037_vm15 = vmor %vm3534_vm10, %vm3535_vm13  ;;  %v6710_v1 = vld [vmem:[#allocation12 + $0x50] sm:$0xf0]  ;;  %v7513_v33 = vld [vmem:[#allocation12 + $0x54] sm:$0xf0] }
 0x6a8   : > { %v3531_v40 = vsub.f32 1.0, %v3530_v35  ;;  %v3527_v39 = vsel %vm8962_vm5, %v8947_v7, %v3522_v36  ;;  %v3579_v61 = vor.u32 1.1754944e-38, %v3578_v45  ;;  %vm3572_vm0 = vweird.f32 %v8956_v15  ;;  %v7511_v20 = vld [vmem:[#allocation12 + $0x4c] sm:$0xf]  ;;  %v6686_v35 = vld [vmem:[#allocation12 + $0x18] sm:$0xf0] }
 0x6a9   : > { %v3556_v31 = vadd.f32 %v8952_v56, %v3555_v21  ;;  %4133 = vmatpush.bf16.msrb.mxu2 %v6753_v37  ;;  %vm9057_vm2 = vcmp.eq.f32.partialorder %v3576_v62, 8.507059e+37  ;;  %v3601_v52 = vand.u32 2147483647, %v8930_v38  ;;  %v7512_v21 = vld [vmem:[#allocation12 + $0x4c] sm:$0xf0]  ;;  %v3595_v8 = vmul.f32 %v8958_v50, %v3594_v27 }
 0x6aa   : > { %v9005_v51 = vpop.eup %7839  ;;  %v3532_v4 = vmul.f32 %v8975_v47, %v3531_v40  ;;  %v6716_v40 = vld [vmem:[#allocation12 + $0x48] sm:$0xf]  ;;  %v6733_v36 = vor.u32 %v7517_v60, %v6732_v41  ;;  %v3603_v25 = vand.u32 2147483648, %v8930_v38  ;;  %v6709_v48 = vor.u32 %v7512_v21, %v6708_v42  ;;  %v7506_v37 = vld [vmem:[#allocation12 + $0x24] sm:$0xf] }
 0x6ab   : > { %v7842_v43 = vpop.eup %7841  ;;  %v3568_v2 = vmul.f32 %v9005_v51, %v8956_v15  ;;  %v3560_v19 = vsel %vm9011_vm12, %v8952_v56, %v3556_v31  ;;  %vm3573_vm14 = vweird.f32 %v9005_v51  ;;  %v3623_v15 = vld [vmem:[#allocation3] sm:$0xff]  ;;  %v6718_v31 = vld [vmem:[#allocation12 + $0x58] sm:$0xf0]  ;;  %4106 = vmatpush.bf16.msra.mxu3 %v6729_v26  ;;  %vm3598_vm4 = vweird.f32 %v8958_v50  ;;  %v6700_v27 = vld [vmem:[#allocation12 + $0x28] sm:$0xf] }
 0x6ac   : > { %v7844_v17 = vpop.eup %7843  ;;  %v3565_v13 = vsel %vm8969_vm6, %v8954_v6, %v3560_v19  ;;  %v3533_v30 = vadd.f32 %v8975_v47, %v3532_v4  ;;  %v7516_v6 = vld [vmem:[#allocation12 + $0x6c] sm:$0xf0]  ;;  %v3626_v54 = vmul.f32 %v7842_v43, %v3527_v39  ;;  %vm9050_vm1 = vmor %vm3572_vm0, %vm3573_vm14  ;;  %v6713_v43 = vor.u32 %v7510_v18, %v6710_v1  ;;  %4120 = vmatpush.bf16.msrb.mxu1 %v6733_v36  ;;  %v7503_v42 = vld [vmem:[#allocation12 + $0xc] sm:$0xf] }
 0x6ad   : > { %v9030_v56 = vpop.eup %7845  ;;  %v3569_v10 = vsub.f32 1.0, %v3568_v2  ;;  %v3624_v11 = vmul.f32 %v3622_v29, %v3565_v13  ;;  %v6692_v2 = vld [vmem:[#allocation12 + $0x20] sm:$0xf]  ;;  %v7508_v19 = vld [vmem:[#allocation12 + $0x2c] sm:$0xf0]  ;;  %4134 = vmatpush.bf16.msrb.mxu2 %v6737_v28  ;;  %v6717_v62 = vor.u32 %v7513_v33, %v6716_v40  ;;  %v3596_v39 = vadd.f32 %v8958_v50, %v3595_v8  ;;  %vm9085_vm6 = vmor %vm3597_vm3, %vm3598_vm4 }
 0x6ae   : > { %v3608_v22 = vmul.f32 %v9030_v56, %v8977_v12  ;;  %v3537_v24 = vsel %vm9037_vm15, %v8975_v47, %v3533_v30  ;;  %v7509_v13 = vld [vmem:[#allocation12 + $0x34] sm:$0xf0]  ;;  %v7507_v30 = vld [vmem:[#allocation12 + $0x2c] sm:$0xf]  ;;  %vm3613_vm5 = vweird.f32 %v9030_v56  ;;  %v3616_v7 = vand.u32 2147483647, %v8977_v12 }
 0x6af   : > { %v3570_v59 = vmul.f32 %v9005_v51, %v3569_v10  ;;  %v3542_v49 = vsel %vm8994_vm11, %v8973_v63, %v3537_v24  ;;  %v9065_v45 = vadd.f32 %v3626_v54, %v3624_v11  ;;  %v6725_v63 = vor.u32 %v7516_v6, %v6724_v23  ;;  %v6702_v10 = vld [vmem:[#allocation12 + $0x38] sm:$0xf0]  ;;  %4107 = vmatpush.bf16.msra.mxu3 %v6713_v43  ;;  %v6676_v24 = vld [vmem:[#allocation12] sm:$0xf]  ;;  %v6678_v54 = vld [vmem:[#allocation12 + $0x10] sm:$0xf0] }
 0x6b0   : > { %v3609_v47 = vsub.f32 1.0, %v3608_v22  ;;  %v3627_v5 = vmul.f32 %v7844_v17, %v3542_v49  ;;  %v6694_v17 = vld [vmem:[#allocation12 + $0x30] sm:$0xf0]  ;;  %v3618_v57 = vand.u32 2147483648, %v8977_v12  ;;  %v6693_v22 = vor.u32 %v7508_v19, %v6692_v2  ;;  %4121 = vmatpush.bf16.msrb.mxu1 %v6717_v62  ;;  %v3893_v38 = vld [vmem:[#allocation4 + $0x8] sm:$0xff] }
 0x6b1   : > { %v3571_v46 = vadd.f32 %v9005_v51, %v3570_v59  ;;  %4092 = vmatpush.bf16.msra.mxu0 %v6725_v63  ;;  %7847 = vtanh.f32 %v9065_v45  ;;  %v6697_v11 = vor.u32 %v7506_v37, %v6694_v17  ;;  %v6701_v41 = vor.u32 %v7509_v13, %v6700_v27  ;;  %v7502_v59 = vld [vmem:[#allocation12 + $0x4] sm:$0xf] }
 0x6b2   : > { %v3610_v44 = vmul.f32 %v9030_v56, %v3609_v47  ;;  %v6705_v60 = vor.u32 %v7507_v30, %v6702_v10  ;;  %vm3612_vm7 = vweird.f32 %v8977_v12  ;;  %v3600_v47 = vsel %vm9085_vm6, %v8958_v50, %v3596_v39 }
 0x6b3   : > { %v3575_v32 = vsel %vm9050_vm1, %v9005_v51, %v3571_v46  ;;  %v6721_v51 = vor.u32 %v7511_v20, %v6718_v31  ;;  %v3604_v49 = vor.u32 1.1754944e-38, %v3603_v25  ;;  %vm9098_vm8 = vmor %vm3612_vm7, %vm3613_vm5  ;;  %4108 = vmatpush.bf16.msra.mxu3 %v6697_v11  ;;  %v6677_v12 = vor.u32 %v7504_v0, %v6676_v24 }
 0x6b4   : > { %v3580_v4 = vsel %vm9057_vm2, %v3579_v61, %v3575_v32  ;;  %v3611_v6 = vadd.f32 %v9030_v56, %v3610_v44  ;;  %v6681_v21 = vor.u32 %v7502_v59, %v6678_v54  ;;  %v3619_v46 = vor.u32 1.1754944e-38, %v3618_v57  ;;  %4122 = vmatpush.bf16.msrb.mxu1 %v6701_v41  ;;  %v3667_v32 = vld [vmem:[%s9438_s9] sm:$0xf] }
 0x6b5   : > { %v3625_v29 = vmul.f32 %v3623_v15, %v3580_v4  ;;  %4093 = vmatpush.bf16.msra.mxu0 %v6709_v48  ;;  %4135 = vmatpush.bf16.msrb.mxu2 %v6721_v51  ;;  %v6685_v50 = vor.u32 %v7505_v16, %v6684_v58  ;;  %v6689_v18 = vor.u32 %v7503_v42, %v6686_v35  ;;  %vm3602_vm9 = vcmp.eq.f32.partialorder %v3601_v52, 8.507059e+37  ;;  %v3894_v52 = vld [vmem:[#allocation4] sm:$0xff] }
 0x6b6   : > { %v3615_v15 = vsel %vm9098_vm8, %v9030_v56, %v3611_v6  ;;  %vm3617_vm10 = vcmp.eq.f32.partialorder %v3616_v7, 8.507059e+37  ;;  %v3605_v40 = vsel %vm3602_vm9, %v3604_v49, %v3600_v47  ;;  %v3895_v33 = vpack.c.bf16 %v3894_v52, %v3893_v38 }
 0x6b7   : > { %v9077_v61 = vadd.f32 %v3627_v5, %v3625_v29  ;;  %v7848_v8 = vpop.eup %7847  ;;  %v3620_v63 = vsel %vm3617_vm10, %v3619_v46, %v3615_v15  ;;  %4109 = vmatpush.bf16.msra.mxu3 %v6681_v21  ;;  %v3669_v28 = vperm.slane %v3667_v32, 0  ;;  %v3670_v19 = vperm.slane %v3667_v32, 1 }
 0x6b8   : > { %v9107_v26 = vmul.f32 %v7848_v8, %v3605_v40  ;;  %4123 = vmatpush.bf16.msrb.mxu1 %v6685_v50  ;;  %v3672_v62 = vperm.slane %v3667_v32, 3  ;;  %v3671_v46 = vperm.slane %v3667_v32, 2 }
 0x6b9   : > { %7849 = vtanh.f32 %v9077_v61  ;;  %4094 = vmatpush.bf16.msra.mxu0 %v6693_v22  ;;  %4136 = vmatpush.bf16.msrb.mxu2 %v6705_v60 }
 0x6bd   : > { %4095 = vmatpush.bf16.msra.mxu0 %v6677_v12  ;;  %4137 = vmatpush.bf16.msrb.mxu2 %v6689_v18 }
 0x6bf   : > { %v7850_v1 = vpop.eup %7849 }
 0x6c0   : > { %v9109_v56 = vmul.f32 %v7850_v1, %v3620_v63 }
 0x6c2   : > { %v3634_v36 = vpack.c.bf16 %v9109_v56, %v9107_v26 }
 0x6c4   : > { %3845 = vmatmul.bf16.vlgmr.msrb.gmra.mxu0 %v3634_v36  ;;  %3859 = vmatmul.bf16.vlgmr.msrb.gmra.mxu3 %v3634_v36 }
 0x6c5   : > { %3873 = vmatmul.bf16.vlgmr.msra.gmra.mxu1 %v3634_v36  ;;  %3887 = vmatmul.bf16.vlgmr.msra.gmra.mxu2 %v3634_v36 }
 0x6d4   : > { %4096 = vmatmul.bf16.vlgmr.msra.gmra.mxu0 %v3895_v33  ;;  %4110 = vmatmul.bf16.vlgmr.msra.gmra.mxu3 %v3895_v33 }
 0x6d5   : > { %4124 = vmatmul.bf16.vlgmr.msrb.gmra.mxu1 %v3895_v33  ;;  %4138 = vmatmul.bf16.vlgmr.msrb.gmra.mxu2 %v3895_v33 }
 0x741   : > { %v3846_v20 = vpop.f32.mrf.mxu0 }
 0x742   : > { %v3874_v4 = vpop.f32.mrf.mxu1  ;;  %v3847_v48 = vadd.f32 %v3846_v20, %v3669_v28 }
 0x743   : > { %v3875_v40 = vadd.f32 %v3874_v4, %v3671_v46 }
 0x747   : > { %v3860_v31 = vpop.f32.mrf.mxu3 }
 0x748   : > { %v3888_v44 = vpop.f32.mrf.mxu2  ;;  %v3861_v37 = vadd.f32 %v3860_v31, %v3670_v19 }
 0x749   : > { %v3848_v5 = vpop.f32.mrf.mxu0  ;;  %v3889_v27 = vadd.f32 %v3888_v44, %v3672_v62 }
 0x74a   : > { %v3876_v17 = vpop.f32.mrf.mxu1  ;;  %v3849_v13 = vadd.f32 %v3848_v5, %v3669_v28 }
 0x74b   : > { %v3877_v33 = vadd.f32 %v3876_v17, %v3671_v46 }
 0x74f   : > { %v3862_v25 = vpop.f32.mrf.mxu3 }
 0x750   : > { %v3890_v43 = vpop.f32.mrf.mxu2  ;;  %v3863_v41 = vadd.f32 %v3862_v25, %v3670_v19 }
 0x751   : > { %v4097_v2 = vpop.f32.mrf.mxu0  ;;  %v3891_v60 = vadd.f32 %v3890_v43, %v3672_v62 }
 0x752   : > { %v4144_v29 = vadd.f32 %v4097_v2, %v3847_v48  ;;  %v4125_v54 = vpop.f32.mrf.mxu1 }
 0x753   : > { %v4146_v20 = vadd.f32 %v4125_v54, %v3875_v40 }
 0x754   : > { %v6802_v51 = vmul.f32 -1.442695, %v4144_v29 }
 0x756   : > { %7851 = vpow2.f32 %v6802_v51 }
 0x757   : > { %v4111_v39 = vpop.f32.mrf.mxu3 }
 0x758   : > { %v4145_v30 = vadd.f32 %v4111_v39, %v3861_v37  ;;  %v4139_v10 = vpop.f32.mrf.mxu2 }
 0x759   : > { %v4147_v7 = vadd.f32 %v4139_v10, %v3889_v27  ;;  %v4099_v23 = vpop.f32.mrf.mxu0 }
 0x75a   : > { %v6804_v6 = vmul.f32 -1.442695, %v4145_v30  ;;  %v4148_v57 = vadd.f32 %v4099_v23, %v3849_v13  ;;  %v4127_v38 = vpop.f32.mrf.mxu1 }
 0x75b   : > { %v6806_v22 = vmul.f32 -1.442695, %v4147_v7  ;;  %v4150_v4 = vadd.f32 %v4127_v38, %v3877_v33 }
 0x75c   : > { %v7852_v11 = vpop.eup %7851  ;;  %7853 = vpow2.f32 %v6804_v6  ;;  %v6803_v24 = vmul.f32 -1.442695, %v4148_v57  ;;  %v4268_v57 = vld [vmem:[#allocation5] sm:$0xff] }
 0x75d   : > { %v4158_v0 = vadd.f32 1.0, %v7852_v11  ;;  %7855 = vpow2.f32 %v6806_v22 }
 0x75e   : > { %7857 = vpow2.f32 %v6803_v24 }
 0x75f   : > { %7859 = vrcp.f32 %v4158_v0  ;;  %v4113_v59 = vpop.f32.mrf.mxu3  ;;  %v4171_v28 = vand.u32 2147483648, %v4158_v0  ;;  %vm4165_vm12 = vweird.f32 %v4158_v0  ;;  %v4169_v43 = vand.u32 2147483647, %v4158_v0 }
 0x760   : > { %v4149_v58 = vadd.f32 %v4113_v59, %v3863_v41  ;;  %v4141_v16 = vpop.f32.mrf.mxu2 }
 0x761   : > { %v4151_v42 = vadd.f32 %v4141_v16, %v3891_v60  ;;  %v4172_v39 = vor.u32 1.1754944e-38, %v4171_v28  ;;  %vm4170_vm15 = vcmp.eq.f32.partialorder %v4169_v43, 8.507059e+37 }
 0x762   : > { %v7854_v35 = vpop.eup %7853  ;;  %v6805_v47 = vmul.f32 -1.442695, %v4149_v58 }
 0x763   : > { %v7856_v49 = vpop.eup %7855  ;;  %v4196_v34 = vadd.f32 1.0, %v7854_v35  ;;  %v6807_v21 = vmul.f32 -1.442695, %v4151_v42 }
 0x764   : > { %v7858_v15 = vpop.eup %7857  ;;  %v9117_v12 = vadd.f32 1.0, %v7856_v49  ;;  %7861 = vpow2.f32 %v6805_v47 }
 0x765   : > { %v7860_v8 = vpop.eup %7859  ;;  %7863 = vrcp.f32 %v4196_v34  ;;  %v9120_v1 = vadd.f32 1.0, %v7858_v15  ;;  %v4207_v29 = vand.u32 2147483647, %v4196_v34  ;;  %v4209_v62 = vand.u32 2147483648, %v4196_v34 }
 0x766   : > { %v4161_v50 = vmul.f32 %v7860_v8, %v4158_v0  ;;  %7865 = vrcp.f32 %v9117_v12  ;;  %vm4166_vm11 = vweird.f32 %v7860_v8  ;;  %vm4203_vm0 = vweird.f32 %v4196_v34 }
 0x767   : > { %7867 = vpow2.f32 %v6807_v21  ;;  %vm9130_vm13 = vmor %vm4165_vm12, %vm4166_vm11  ;;  %vm4208_vm2 = vcmp.eq.f32.partialorder %v4207_v29, 8.507059e+37  ;;  %v4210_v6 = vor.u32 1.1754944e-38, %v4209_v62  ;;  %vm4243_vm3 = vweird.f32 %v9117_v12 }
 0x768   : > { %v4162_v18 = vsub.f32 1.0, %v4161_v50  ;;  %7869 = vrcp.f32 %v9120_v1  ;;  %v4249_v24 = vand.u32 2147483648, %v9117_v12  ;;  %v4186_v0 = vand.u32 2147483648, %v9120_v1 }
 0x769   : > { %v4184_v35 = vand.u32 2147483647, %v9120_v1  ;;  %vm4180_vm6 = vweird.f32 %v9120_v1 }
 0x76a   : > { %v7862_v63 = vpop.eup %7861  ;;  %v4163_v36 = vmul.f32 %v7860_v8, %v4162_v18 }
 0x76b   : > { %v7864_v52 = vpop.eup %7863  ;;  %v9123_v31 = vadd.f32 1.0, %v7862_v63  ;;  %v4187_v63 = vor.u32 1.1754944e-38, %v4186_v0  ;;  %vm4185_vm9 = vcmp.eq.f32.partialorder %v4184_v35, 8.507059e+37 }
 0x76c   : > { %v9125_v44 = vpop.eup %7865  ;;  %v4164_v32 = vadd.f32 %v7860_v8, %v4163_v36  ;;  %v4199_v5 = vmul.f32 %v7864_v52, %v4196_v34  ;;  %vm4204_vm14 = vweird.f32 %v7864_v52 }
 0x76d   : > { %v4239_v25 = vmul.f32 %v9125_v44, %v9117_v12  ;;  %7871 = vrcp.f32 %v9123_v31  ;;  %v7868_v48 = vpop.eup %7867  ;;  %vm4205_vm1 = vmor %vm4203_vm0, %vm4204_vm14  ;;  %vm4244_vm5 = vweird.f32 %v9125_v44  ;;  %v4224_v15 = vand.u32 2147483648, %v9123_v31 }
 0x76e   : > { %v4200_v2 = vsub.f32 1.0, %v4199_v5  ;;  %7873 = vtanh.f32 %v4146_v20  ;;  %v9134_v51 = vadd.f32 1.0, %v7868_v48  ;;  %v7870_v37 = vpop.eup %7869  ;;  %v4168_v17 = vsel %vm9130_vm13, %v7860_v8, %v4164_v32  ;;  %v4269_v20 = vld [vmem:[#allocation5 + $0x8] sm:$0xff]  ;;  %vm4245_vm12 = vmor %vm4243_vm3, %vm4244_vm5 }
 0x76f   : > { %v4240_v13 = vsub.f32 1.0, %v4239_v25  ;;  %v4176_v30 = vmul.f32 %v7870_v37, %v9120_v1  ;;  %7875 = vtanh.f32 %v4150_v4  ;;  %v4173_v23 = vsel %vm4170_vm15, %v4172_v39, %v4168_v17 }
 0x770   : > { %v4201_v27 = vmul.f32 %v7864_v52, %v4200_v2  ;;  %7877 = vrcp.f32 %v9134_v51  ;;  %vm4181_vm4 = vweird.f32 %v7870_v37  ;;  %v4222_v50 = vand.u32 2147483647, %v9123_v31 }
 0x771   : > { %v4177_v22 = vsub.f32 1.0, %v4176_v30  ;;  %v4241_v54 = vmul.f32 %v9125_v44, %v4240_v13  ;;  %vm4182_vm7 = vmor %vm4180_vm6, %vm4181_vm4  ;;  %vm4218_vm10 = vweird.f32 %v9123_v31  ;;  %v4247_v1 = vand.u32 2147483647, %v9117_v12 }
 0x772   : > { %v4202_v10 = vadd.f32 %v7864_v52, %v4201_v27  ;;  %v4225_v33 = vor.u32 1.1754944e-38, %v4224_v15  ;;  %vm4223_vm13 = vcmp.eq.f32.partialorder %v4222_v50, 8.507059e+37  ;;  %v4250_v48 = vor.u32 1.1754944e-38, %v4249_v24 }
 0x773   : > { %v7872_v7 = vpop.eup %7871  ;;  %v4178_v58 = vmul.f32 %v7870_v37, %v4177_v22  ;;  %v4242_v18 = vadd.f32 %v9125_v44, %v4241_v54  ;;  %vm4248_vm14 = vcmp.eq.f32.partialorder %v4247_v1, 8.507059e+37  ;;  %v4264_v12 = vand.u32 2147483648, %v9134_v51 }
 0x774   : > { %v4206_v11 = vsel %vm4205_vm1, %v7864_v52, %v4202_v10  ;;  %v4214_v41 = vmul.f32 %v7872_v7, %v9123_v31  ;;  %v7874_v60 = vpop.eup %7873  ;;  %vm4219_vm8 = vweird.f32 %v7872_v7  ;;  %vm4258_vm0 = vweird.f32 %v9134_v51 }
 0x775   : > { %v4211_v59 = vsel %vm4208_vm2, %v4210_v6, %v4206_v11  ;;  %v4272_v16 = vmul.f32 %v7874_v60, %v4173_v23  ;;  %v7876_v49 = vpop.eup %7875  ;;  %v4179_v34 = vadd.f32 %v7870_v37, %v4178_v58  ;;  %vm4220_vm11 = vmor %vm4218_vm10, %vm4219_vm8  ;;  %v4246_v28 = vsel %vm4245_vm12, %v9125_v44, %v4242_v18 }
 0x776   : > { %v4270_v42 = vmul.f32 %v4268_v57, %v4211_v59  ;;  %v4215_v47 = vsub.f32 1.0, %v4214_v41  ;;  %v7878_v21 = vpop.eup %7877  ;;  %v4251_v19 = vsel %vm4248_vm14, %v4250_v48, %v4246_v28  ;;  %v4262_v17 = vand.u32 2147483647, %v9134_v51 }
 0x777   : > { %v4183_v40 = vsel %vm4182_vm7, %v7870_v37, %v4179_v34  ;;  %v4254_v36 = vmul.f32 %v7878_v21, %v9134_v51  ;;  %vm4259_vm15 = vweird.f32 %v7878_v21  ;;  %v4265_v27 = vor.u32 1.1754944e-38, %v4264_v12 }
 0x778   : > { %v4274_v8 = vadd.f32 %v4272_v16, %v4270_v42  ;;  %v4216_v46 = vmul.f32 %v7872_v7, %v4215_v47  ;;  %v4188_v52 = vsel %vm4185_vm9, %v4187_v63, %v4183_v40  ;;  %vm4260_vm1 = vmor %vm4258_vm0, %vm4259_vm15  ;;  %vm4263_vm2 = vcmp.eq.f32.partialorder %v4262_v17, 8.507059e+37 }
 0x779   : > { %v4255_v32 = vsub.f32 1.0, %v4254_v36  ;;  %v4273_v31 = vmul.f32 %v7876_v49, %v4188_v52 }
 0x77a   : > { %7879 = vtanh.f32 %v4274_v8  ;;  %v4217_v38 = vadd.f32 %v7872_v7, %v4216_v46 }
 0x77b   : > { %v4256_v4 = vmul.f32 %v7878_v21, %v4255_v32 }
 0x77c   : > { %v4221_v5 = vsel %vm4220_vm11, %v7872_v7, %v4217_v38 }
 0x77d   : > { %v4226_v25 = vsel %vm4223_vm13, %v4225_v33, %v4221_v5  ;;  %v4257_v37 = vadd.f32 %v7878_v21, %v4256_v4 }
 0x77e   : > { %v4271_v43 = vmul.f32 %v4269_v20, %v4226_v25 }
 0x77f   : > { %v4261_v44 = vsel %vm4260_vm1, %v7878_v21, %v4257_v37 }
 0x780   : > { %v7880_v2 = vpop.eup %7879  ;;  %v4275_v29 = vadd.f32 %v4273_v31, %v4271_v43  ;;  %v4266_v13 = vsel %vm4263_vm2, %v4265_v27, %v4261_v44 }
 0x781   : > { %v4278_v62 = vmul.f32 %v7880_v2, %v4251_v19 }
 0x782   : > { %7881 = vtanh.f32 %v4275_v29 }
 0x785   : > { %4284 = sbr.rel (%p6808_p10) target bundleno = 1938 (0x792), region = 92 }
 0x788   : > { %v7882_v39 = vpop.eup %7881 }
 0x789   : > { %v4279_v30 = vmul.f32 %v7882_v39, %v4266_v13 }
 0x78a   : > { %4285 = vst [vmem:[#allocation2] sm:$0xff] %v9107_v26 }
 0x78b   : > { %4286 = vst [vmem:[#allocation2 + $0x8] sm:$0xff] %v9109_v56 }
 0x78c   : > { %4287 = vst [vmem:[#allocation3 + $0x8] sm:$0xff] %v9065_v45 }
 0x78d   : > { %4288 = vst [vmem:[#allocation3] sm:$0xff] %v9077_v61 }
 0x78e   : > { %4289 = vst [vmem:[#allocation4 + $0x8] sm:$0xff] %v4278_v62 }
 0x78f   : > { %4290 = vst [vmem:[#allocation4] sm:$0xff] %v4279_v30 }
 0x790   : > { %4291 = vst [vmem:[#allocation5] sm:$0xff] %v4274_v8 }
 0x791   : > { %4292 = vst [vmem:[#allocation5 + $0x8] sm:$0xff] %v4275_v29 }
 0x792 PF: > { %v6923_v51 = vld [vmem:[#allocation9 + $0xe0] sm:$0xf]  ;;  %v7564_v10 = vld [vmem:[#allocation9 + $0xec] sm:$0xf0]  ;;  %v7562_v7 = vld [vmem:[#allocation9 + $0xe4] sm:$0xf] }
 0x793   : > { %v6924_v23 = vor.u32 %v7564_v10, %v6923_v51  ;;  %v6925_v6 = vld [vmem:[#allocation9 + $0xf0] sm:$0xf0]  ;;  %v7563_v57 = vld [vmem:[#allocation9 + $0xec] sm:$0xf]  ;;  %v6933_v22 = vld [vmem:[#allocation9 + $0xf8] sm:$0xf0] }
 0x794   : > { %v6928_v11 = vor.u32 %v7562_v7, %v6925_v6  ;;  %v6936_v26 = vor.u32 %v7563_v57, %v6933_v22  ;;  %v6907_v24 = vld [vmem:[#allocation9 + $0xc0] sm:$0xf]  ;;  %v7560_v56 = vld [vmem:[#allocation9 + $0xcc] sm:$0xf0]  ;;  %v7558_v0 = vld [vmem:[#allocation9 + $0xc4] sm:$0xf] }
 0x795   : > { %4488 = vmatpush.bf16.msrb.mxu0 %v6924_v23  ;;  %v6908_v45 = vor.u32 %v7560_v56, %v6907_v24  ;;  %v6909_v61 = vld [vmem:[#allocation9 + $0xd0] sm:$0xf0]  ;;  %v7559_v41 = vld [vmem:[#allocation9 + $0xcc] sm:$0xf]  ;;  %v6917_v60 = vld [vmem:[#allocation9 + $0xd8] sm:$0xf0] }
 0x796   : > { %4502 = vmatpush.bf16.msrb.mxu3 %v6928_v11  ;;  %4530 = vmatpush.bf16.msra.mxu2 %v6936_v26  ;;  %v6912_v59 = vor.u32 %v7558_v0, %v6909_v61  ;;  %v6920_v54 = vor.u32 %v7559_v41, %v6917_v60  ;;  %v6891_v58 = vld [vmem:[#allocation9 + $0xa0] sm:$0xf]  ;;  %v7556_v16 = vld [vmem:[#allocation9 + $0xac] sm:$0xf0]  ;;  %v7554_v42 = vld [vmem:[#allocation9 + $0xa4] sm:$0xf] }
 0x797   : > { %v6893_v35 = vld [vmem:[#allocation9 + $0xb0] sm:$0xf0]  ;;  %v7555_v47 = vld [vmem:[#allocation9 + $0xac] sm:$0xf]  ;;  %v6901_v49 = vld [vmem:[#allocation9 + $0xb8] sm:$0xf0]  ;;  %v6892_v34 = vor.u32 %v7556_v16, %v6891_v58 }
 0x798   : > { %v6896_v15 = vor.u32 %v7554_v42, %v6893_v35  ;;  %v6904_v21 = vor.u32 %v7555_v47, %v6901_v49  ;;  %v6875_v8 = vld [vmem:[#allocation9 + $0x80] sm:$0xf]  ;;  %v7552_v46 = vld [vmem:[#allocation9 + $0x8c] sm:$0xf0]  ;;  %v7550_v50 = vld [vmem:[#allocation9 + $0x84] sm:$0xf] }
 0x799   : > { %4489 = vmatpush.bf16.msrb.mxu0 %v6908_v45  ;;  %v6877_v18 = vld [vmem:[#allocation9 + $0x90] sm:$0xf0]  ;;  %v7551_v40 = vld [vmem:[#allocation9 + $0x8c] sm:$0xf]  ;;  %v6885_v63 = vld [vmem:[#allocation9 + $0x98] sm:$0xf0]  ;;  %v6876_v1 = vor.u32 %v7552_v46, %v6875_v8 }
 0x79a   : > { %4503 = vmatpush.bf16.msrb.mxu3 %v6912_v59  ;;  %4531 = vmatpush.bf16.msra.mxu2 %v6920_v54  ;;  %v6931_v36 = vld [vmem:[#allocation9 + $0xe8] sm:$0xf]  ;;  %v7565_v38 = vld [vmem:[#allocation9 + $0xf4] sm:$0xf0]  ;;  %v6859_v52 = vld [vmem:[#allocation9 + $0x60] sm:$0xf]  ;;  %v6880_v32 = vor.u32 %v7550_v50, %v6877_v18  ;;  %v6888_v5 = vor.u32 %v7551_v40, %v6885_v63 }
 0x79b   : > { %v7548_v33 = vld [vmem:[#allocation9 + $0x6c] sm:$0xf0]  ;;  %v6932_v20 = vor.u32 %v7565_v38, %v6931_v36  ;;  %v7546_v28 = vld [vmem:[#allocation9 + $0x64] sm:$0xf]  ;;  %v6861_v25 = vld [vmem:[#allocation9 + $0x70] sm:$0xf0] }
 0x79c   : > { %v6915_v4 = vld [vmem:[#allocation9 + $0xc8] sm:$0xf]  ;;  %v7547_v48 = vld [vmem:[#allocation9 + $0x6c] sm:$0xf]  ;;  %v6869_v31 = vld [vmem:[#allocation9 + $0x78] sm:$0xf0]  ;;  %v6860_v19 = vor.u32 %v7548_v33, %v6859_v52  ;;  %v6864_v37 = vor.u32 %v7546_v28, %v6861_v25 }
 0x79d   : > { %4490 = vmatpush.bf16.msrb.mxu0 %v6892_v34  ;;  %4516 = vmatpush.bf16.msra.mxu1 %v6932_v20  ;;  %v7561_v43 = vld [vmem:[#allocation9 + $0xd4] sm:$0xf0]  ;;  %v6899_v29 = vld [vmem:[#allocation9 + $0xa8] sm:$0xf]  ;;  %v6872_v12 = vor.u32 %v7547_v48, %v6869_v31  ;;  %v6843_v17 = vld [vmem:[#allocation9 + $0x40] sm:$0xf] }
 0x79e   : > { %4504 = vmatpush.bf16.msrb.mxu3 %v6896_v15  ;;  %4532 = vmatpush.bf16.msra.mxu2 %v6904_v21  ;;  %v6916_v2 = vor.u32 %v7561_v43, %v6915_v4  ;;  %v7557_v62 = vld [vmem:[#allocation9 + $0xb4] sm:$0xf0]  ;;  %v7544_v44 = vld [vmem:[#allocation9 + $0x4c] sm:$0xf0]  ;;  %v7542_v27 = vld [vmem:[#allocation9 + $0x44] sm:$0xf] }
 0x79f   : > { %v6845_v39 = vld [vmem:[#allocation9 + $0x50] sm:$0xf0]  ;;  %v7543_v13 = vld [vmem:[#allocation9 + $0x4c] sm:$0xf]  ;;  %v6853_v30 = vld [vmem:[#allocation9 + $0x58] sm:$0xf0]  ;;  %v6900_v51 = vor.u32 %v7557_v62, %v6899_v29  ;;  %v6844_v7 = vor.u32 %v7544_v44, %v6843_v17 }
 0x7a0   : > { %v6883_v10 = vld [vmem:[#allocation9 + $0x88] sm:$0xf]  ;;  %v7553_v23 = vld [vmem:[#allocation9 + $0x94] sm:$0xf0]  ;;  %v6848_v6 = vor.u32 %v7542_v27, %v6845_v39  ;;  %v6856_v57 = vor.u32 %v7543_v13, %v6853_v30  ;;  %v6827_v22 = vld [vmem:[#allocation9 + $0x20] sm:$0xf] }
 0x7a1   : > { %4491 = vmatpush.bf16.msrb.mxu0 %v6876_v1  ;;  %4517 = vmatpush.bf16.msra.mxu1 %v6916_v2  ;;  %v7540_v11 = vld [vmem:[#allocation9 + $0x2c] sm:$0xf0]  ;;  %v7538_v26 = vld [vmem:[#allocation9 + $0x24] sm:$0xf]  ;;  %v6829_v24 = vld [vmem:[#allocation9 + $0x30] sm:$0xf0]  ;;  %v6884_v45 = vor.u32 %v7553_v23, %v6883_v10 }
 0x7a2   : > { %4505 = vmatpush.bf16.msrb.mxu3 %v6880_v32  ;;  %4533 = vmatpush.bf16.msra.mxu2 %v6888_v5  ;;  %v7539_v56 = vld [vmem:[#allocation9 + $0x2c] sm:$0xf]  ;;  %v6837_v0 = vld [vmem:[#allocation9 + $0x38] sm:$0xf0]  ;;  %v6867_v61 = vld [vmem:[#allocation9 + $0x68] sm:$0xf]  ;;  %v6828_v60 = vor.u32 %v7540_v11, %v6827_v22  ;;  %v6832_v59 = vor.u32 %v7538_v26, %v6829_v24 }
 0x7a3   : > { %v7549_v41 = vld [vmem:[#allocation9 + $0x74] sm:$0xf0]  ;;  %v6840_v54 = vor.u32 %v7539_v56, %v6837_v0  ;;  %v6811_v58 = vld [vmem:[#allocation9] sm:$0xf]  ;;  %v7536_v16 = vld [vmem:[#allocation9 + $0xc] sm:$0xf0] }
 0x7a4   : > { %v7534_v42 = vld [vmem:[#allocation9 + $0x4] sm:$0xf]  ;;  %v6813_v35 = vld [vmem:[#allocation9 + $0x10] sm:$0xf0]  ;;  %v7535_v47 = vld [vmem:[#allocation9 + $0xc] sm:$0xf]  ;;  %v6868_v34 = vor.u32 %v7549_v41, %v6867_v61  ;;  %v6812_v8 = vor.u32 %v7536_v16, %v6811_v58 }
 0x7a5   : > { %4492 = vmatpush.bf16.msrb.mxu0 %v6860_v19  ;;  %4518 = vmatpush.bf16.msra.mxu1 %v6900_v51  ;;  %v6821_v49 = vld [vmem:[#allocation9 + $0x18] sm:$0xf0]  ;;  %v6851_v15 = vld [vmem:[#allocation9 + $0x48] sm:$0xf]  ;;  %v7545_v21 = vld [vmem:[#allocation9 + $0x54] sm:$0xf0]  ;;  %v6816_v18 = vor.u32 %v7534_v42, %v6813_v35 }
 0x7a6   : > { %4506 = vmatpush.bf16.msrb.mxu3 %v6864_v37  ;;  %4534 = vmatpush.bf16.msra.mxu2 %v6872_v12  ;;  %v4293_v46 = vld [vmem:[#allocation2] sm:$0xff]  ;;  %v4294_v50 = vld [vmem:[#allocation2 + $0x8] sm:$0xff]  ;;  %v6824_v40 = vor.u32 %v7535_v47, %v6821_v49  ;;  %v6852_v63 = vor.u32 %v7545_v21, %v6851_v15  ;;  %v7541_v1 = vld [vmem:[#allocation9 + $0x34] sm:$0xf0]  ;;  %s5326_s27 = sadd.s32 3, %s8243_s17 }
 0x7a7   : > { %v4295_v36 = vpack.c.bf16 %v4294_v50, %v4293_v46  ;;  %v6835_v38 = vld [vmem:[#allocation9 + $0x28] sm:$0xf]  ;;  %v7537_v20 = vld [vmem:[#allocation9 + $0x14] sm:$0xf0]  ;;  %v7057_v5 = vld [vmem:[#allocation11 + $0xe0] sm:$0xf] }
 0x7a8   : > { %v6836_v52 = vor.u32 %v7541_v1, %v6835_v38  ;;  %v6819_v33 = vld [vmem:[#allocation9 + $0x8] sm:$0xf]  ;;  %v7596_v28 = vld [vmem:[#allocation11 + $0xec] sm:$0xf0]  ;;  %v7594_v25 = vld [vmem:[#allocation11 + $0xe4] sm:$0xf] }
 0x7a9   : > { %4493 = vmatpush.bf16.msrb.mxu0 %v6844_v7  ;;  %4519 = vmatpush.bf16.msra.mxu1 %v6884_v45  ;;  %v6820_v32 = vor.u32 %v7537_v20, %v6819_v33  ;;  %v7058_v4 = vor.u32 %v7596_v28, %v7057_v5  ;;  %v7059_v48 = vld [vmem:[#allocation11 + $0xf0] sm:$0xf0]  ;;  %v7065_v31 = vld [vmem:[#allocation11 + $0xe8] sm:$0xf]  ;;  %v7597_v43 = vld [vmem:[#allocation11 + $0xf4] sm:$0xf0] }
 0x7aa   : > { %4507 = vmatpush.bf16.msrb.mxu3 %v6848_v6  ;;  %4535 = vmatpush.bf16.msra.mxu2 %v6856_v57  ;;  %v7062_v2 = vor.u32 %v7594_v25, %v7059_v48  ;;  %v7066_v19 = vor.u32 %v7597_v43, %v7065_v31  ;;  %v7595_v29 = vld [vmem:[#allocation11 + $0xec] sm:$0xf]  ;;  %v7067_v62 = vld [vmem:[#allocation11 + $0xf8] sm:$0xf0]  ;;  %v7041_v12 = vld [vmem:[#allocation11 + $0xc0] sm:$0xf] }
 0x7ab   : > { %v7070_v37 = vor.u32 %v7595_v29, %v7067_v62  ;;  %v7592_v17 = vld [vmem:[#allocation11 + $0xcc] sm:$0xf0]  ;;  %v7590_v44 = vld [vmem:[#allocation11 + $0xc4] sm:$0xf]  ;;  %v7043_v39 = vld [vmem:[#allocation11 + $0xd0] sm:$0xf0] }
 0x7ac   : > { %v7042_v27 = vor.u32 %v7592_v17, %v7041_v12  ;;  %v7049_v13 = vld [vmem:[#allocation11 + $0xc8] sm:$0xf]  ;;  %v7593_v30 = vld [vmem:[#allocation11 + $0xd4] sm:$0xf0]  ;;  %v7046_v51 = vor.u32 %v7590_v44, %v7043_v39  ;;  %v7591_v7 = vld [vmem:[#allocation11 + $0xcc] sm:$0xf] }
 0x7ad   : > { %4494 = vmatpush.bf16.msrb.mxu0 %v6828_v60  ;;  %4520 = vmatpush.bf16.msra.mxu1 %v6868_v34  ;;  %v7050_v10 = vor.u32 %v7593_v30, %v7049_v13  ;;  %v7051_v23 = vld [vmem:[#allocation11 + $0xd8] sm:$0xf0]  ;;  %v7025_v57 = vld [vmem:[#allocation11 + $0xa0] sm:$0xf]  ;;  %v7588_v22 = vld [vmem:[#allocation11 + $0xac] sm:$0xf0] }
 0x7ae   : > { %4508 = vmatpush.bf16.msrb.mxu3 %v6832_v59  ;;  %4536 = vmatpush.bf16.msra.mxu2 %v6840_v54  ;;  %v7054_v6 = vor.u32 %v7591_v7, %v7051_v23  ;;  %v7586_v11 = vld [vmem:[#allocation11 + $0xa4] sm:$0xf]  ;;  %v7026_v26 = vor.u32 %v7588_v22, %v7025_v57  ;;  %v7027_v24 = vld [vmem:[#allocation11 + $0xb0] sm:$0xf0]  ;;  %v7033_v56 = vld [vmem:[#allocation11 + $0xa8] sm:$0xf] }
 0x7af   : > { %v7589_v0 = vld [vmem:[#allocation11 + $0xb4] sm:$0xf0]  ;;  %v7030_v45 = vor.u32 %v7586_v11, %v7027_v24  ;;  %v7587_v41 = vld [vmem:[#allocation11 + $0xac] sm:$0xf]  ;;  %v7035_v60 = vld [vmem:[#allocation11 + $0xb8] sm:$0xf0] }
 0x7b0   : > { %v7034_v61 = vor.u32 %v7589_v0, %v7033_v56  ;;  %v7038_v59 = vor.u32 %v7587_v41, %v7035_v60  ;;  %v7009_v54 = vld [vmem:[#allocation11 + $0x80] sm:$0xf]  ;;  %v7584_v58 = vld [vmem:[#allocation11 + $0x8c] sm:$0xf0]  ;;  %v7582_v16 = vld [vmem:[#allocation11 + $0x84] sm:$0xf] }
 0x7b1   : > { %4495 = vmatpush.bf16.msrb.mxu0 %v6812_v8  ;;  %4521 = vmatpush.bf16.msra.mxu1 %v6852_v63  ;;  %v7010_v42 = vor.u32 %v7584_v58, %v7009_v54  ;;  %v7011_v35 = vld [vmem:[#allocation11 + $0x90] sm:$0xf0]  ;;  %v7017_v47 = vld [vmem:[#allocation11 + $0x88] sm:$0xf]  ;;  %v7585_v49 = vld [vmem:[#allocation11 + $0x94] sm:$0xf0] }
 0x7b2   : > { %4509 = vmatpush.bf16.msrb.mxu3 %v6816_v18  ;;  %4537 = vmatpush.bf16.msra.mxu2 %v6824_v40  ;;  %v7014_v34 = vor.u32 %v7582_v16, %v7011_v35  ;;  %v7018_v15 = vor.u32 %v7585_v49, %v7017_v47  ;;  %v7583_v21 = vld [vmem:[#allocation11 + $0x8c] sm:$0xf]  ;;  %v7019_v8 = vld [vmem:[#allocation11 + $0x98] sm:$0xf0]  ;;  %v6993_v40 = vld [vmem:[#allocation11 + $0x60] sm:$0xf] }
 0x7b3   : > { %v7022_v50 = vor.u32 %v7583_v21, %v7019_v8  ;;  %v7580_v63 = vld [vmem:[#allocation11 + $0x6c] sm:$0xf0]  ;;  %v6995_v1 = vld [vmem:[#allocation11 + $0x70] sm:$0xf0]  ;;  %v7581_v33 = vld [vmem:[#allocation11 + $0x74] sm:$0xf0] }
 0x7b4   : > { %4496 = vmatmul.bf16.vlgmr.msrb.gmra.mxu0 %v4295_v36  ;;  %v6994_v38 = vor.u32 %v7580_v63, %v6993_v40  ;;  %v7579_v28 = vld [vmem:[#allocation11 + $0x6c] sm:$0xf]  ;;  %v7003_v25 = vld [vmem:[#allocation11 + $0x78] sm:$0xf0]  ;;  %v7576_v48 = vld [vmem:[#allocation11 + $0x4c] sm:$0xf0] }
 0x7b5   : > { %4510 = vmatmul.bf16.vlgmr.msrb.gmra.mxu3 %v4295_v36  ;;  %4538 = vmatmul.bf16.vlgmr.msra.gmra.mxu2 %v4295_v36  ;;  %v7574_v31 = vld [vmem:[#allocation11 + $0x44] sm:$0xf]  ;;  %v7577_v29 = vld [vmem:[#allocation11 + $0x54] sm:$0xf0]  ;;  %v7575_v44 = vld [vmem:[#allocation11 + $0x4c] sm:$0xf] }
 0x7b6   : > { %4522 = vmatpush.bf16.msra.mxu1 %v6836_v52  ;;  %4883 = vmatpush.bf16.msra.mxu0 %v7058_v4  ;;  %v7001_v52 = vld [vmem:[#allocation11 + $0x68] sm:$0xf]  ;;  %v7006_v4 = vor.u32 %v7579_v28, %v7003_v25  ;;  %v6961_v7 = vld [vmem:[#allocation11 + $0x20] sm:$0xf]  ;;  %v7572_v23 = vld [vmem:[#allocation11 + $0x2c] sm:$0xf0] }
 0x7b7   : > { %4897 = vmatpush.bf16.msra.mxu3 %v7062_v2  ;;  %4925 = vmatpush.bf16.msrb.mxu2 %v7070_v37  ;;  %v7002_v5 = vor.u32 %v7581_v33, %v7001_v52  ;;  %v6979_v2 = vld [vmem:[#allocation11 + $0x50] sm:$0xf0]  ;;  %v6962_v11 = vor.u32 %v7572_v23, %v6961_v7  ;;  %v6969_v0 = vld [vmem:[#allocation11 + $0x28] sm:$0xf]  ;;  %v6971_v41 = vld [vmem:[#allocation11 + $0x38] sm:$0xf0] }
 0x7b8   : > { %v6982_v12 = vor.u32 %v7574_v31, %v6979_v2  ;;  %v6945_v54 = vld [vmem:[#allocation11] sm:$0xf]  ;;  %v7568_v58 = vld [vmem:[#allocation11 + $0xc] sm:$0xf0]  ;;  %v7566_v16 = vld [vmem:[#allocation11 + $0x4] sm:$0xf] }
 0x7b9   : > { %v6946_v47 = vor.u32 %v7568_v58, %v6945_v54  ;;  %v6947_v49 = vld [vmem:[#allocation11 + $0x10] sm:$0xf0]  ;;  %v9510_v8 = vld [vmem:[#allocation21_spill] sm:$0xff]  ;;  %v7620_v58 = vld [vmem:[#allocation12 + $0xac] sm:$0xf0]  ;;  %p7205_p11 = scmp.ge.s32.totalorder %s5326_s27, 6 }
 0x7ba   : > { %4523 = vmatpush.bf16.msra.mxu1 %v6820_v32  ;;  %4884 = vmatpush.bf16.msra.mxu0 %v7042_v27  ;;  %v6987_v27 = vld [vmem:[#allocation11 + $0x58] sm:$0xf0]  ;;  %v6950_v40 = vor.u32 %v7566_v16, %v6947_v49  ;;  %v7626_v52 = vld [vmem:[#allocation12 + $0xe4] sm:$0xf]  ;;  %v7187_v28 = vld [vmem:[#allocation12 + $0xf0] sm:$0xf0] }
 0x7bb   : > { %4898 = vmatpush.bf16.msra.mxu3 %v7046_v51  ;;  %4926 = vmatpush.bf16.msrb.mxu2 %v7054_v6  ;;  %v6990_v51 = vor.u32 %v7575_v44, %v6987_v27  ;;  %v7570_v6 = vld [vmem:[#allocation11 + $0x24] sm:$0xf]  ;;  %v7169_v27 = vld [vmem:[#allocation12 + $0xc0] sm:$0xf]  ;;  %v7171_v7 = vld [vmem:[#allocation12 + $0xd0] sm:$0xf0] }
 0x7bc   : > { %v9511_v23 = vld [vmem:[#allocation19_spill] sm:$0xff]  ;;  %v7153_v54 = vld [vmem:[#allocation12 + $0xa0] sm:$0xf] }
 0x7bd   : > { %4524 = vmatmul.bf16.vlgmr.msra.gmra.mxu1 %v4295_v36  ;;  %v7578_v36 = vld [vmem:[#allocation11 + $0x64] sm:$0xf] }
 0x7be   : > { %4911 = vmatpush.bf16.msrb.mxu1 %v7066_v19  ;;  %4885 = vmatpush.bf16.msra.mxu0 %v7026_v26  ;;  %v6998_v32 = vor.u32 %v7578_v36, %v6995_v1  ;;  %v6985_v19 = vld [vmem:[#allocation11 + $0x48] sm:$0xf]  ;;  %v6963_v26 = vld [vmem:[#allocation11 + $0x30] sm:$0xf0]  ;;  %v7628_v1 = vld [vmem:[#allocation12 + $0xec] sm:$0xf0] }
 0x7bf   : > { %4899 = vmatpush.bf16.msra.mxu3 %v7030_v45  ;;  %4927 = vmatpush.bf16.msrb.mxu2 %v7038_v59  ;;  %v6986_v17 = vor.u32 %v7577_v29, %v6985_v19 }
 0x7c2   : > { %4912 = vmatpush.bf16.msrb.mxu1 %v7050_v10  ;;  %4886 = vmatpush.bf16.msra.mxu0 %v7010_v42 }
 0x7c3   : > { %4900 = vmatpush.bf16.msra.mxu3 %v7014_v34  ;;  %4928 = vmatpush.bf16.msrb.mxu2 %v7022_v50  ;;  %v6953_v34 = vld [vmem:[#allocation11 + $0x8] sm:$0xf]  ;;  %v7567_v50 = vld [vmem:[#allocation11 + $0xc] sm:$0xf] }
 0x7c6   : > { %4913 = vmatpush.bf16.msrb.mxu1 %v7034_v61  ;;  %4887 = vmatpush.bf16.msra.mxu0 %v6994_v38  ;;  %v7571_v61 = vld [vmem:[#allocation11 + $0x2c] sm:$0xf]  ;;  %v7185_v38 = vld [vmem:[#allocation12 + $0xe0] sm:$0xf] }
 0x7c7   : > { %4901 = vmatpush.bf16.msra.mxu3 %v6998_v32  ;;  %4929 = vmatpush.bf16.msrb.mxu2 %v7006_v4  ;;  %v6974_v59 = vor.u32 %v7571_v61, %v6971_v41  ;;  %v9512_v61 = vld [vmem:[#allocation20_spill] sm:$0xff] }
 0x7ca   : > { %4914 = vmatpush.bf16.msrb.mxu1 %v7018_v15  ;;  %v7569_v15 = vld [vmem:[#allocation11 + $0x14] sm:$0xf0] }
 0x7cb   : > { %4902 = vmatpush.bf16.msra.mxu3 %v6982_v12  ;;  %4930 = vmatpush.bf16.msrb.mxu2 %v6990_v51  ;;  %v6954_v63 = vor.u32 %v7569_v15, %v6953_v34  ;;  %v7627_v12 = vld [vmem:[#allocation12 + $0xec] sm:$0xf]  ;;  %v7618_v34 = vld [vmem:[#allocation12 + $0xa4] sm:$0xf]  ;;  %v7155_v15 = vld [vmem:[#allocation12 + $0xb0] sm:$0xf0] }
 0x7ce   : > { %4915 = vmatpush.bf16.msrb.mxu1 %v7002_v5  ;;  %v7186_v5 = vor.u32 %v7628_v1, %v7185_v38  ;;  %v7131_v38 = vld [vmem:[#allocation12 + $0x78] sm:$0xf0] }
 0x7cf   : > { %4931 = vmatpush.bf16.msrb.mxu2 %v6974_v59 }
 0x7d2   : > { %4916 = vmatpush.bf16.msrb.mxu1 %v6986_v17  ;;  %v7195_v17 = vld [vmem:[#allocation12 + $0xf8] sm:$0xf0] }
 0x831   : > { %v4497_v46 = vpop.f32.mrf.mxu0 }
 0x832   : > { %v4544_v18 = vadd.f32 %v4497_v46, %v8389_v14  ;;  %v6977_v14 = vld [vmem:[#allocation11 + $0x40] sm:$0xf] }
 0x833   : > { %v6978_v43 = vor.u32 %v7576_v48, %v6977_v14  ;;  %v7193_v14 = vld [vmem:[#allocation12 + $0xe8] sm:$0xf]  ;;  %v7629_v48 = vld [vmem:[#allocation12 + $0xf4] sm:$0xf0] }
 0x834   : > { %v6937_v20 = vmul.f32 -1.442695, %v4544_v18  ;;  %v6955_v18 = vld [vmem:[#allocation11 + $0x18] sm:$0xf0]  ;;  %v7194_v19 = vor.u32 %v7629_v48, %v7193_v14  ;;  %v7137_v48 = vld [vmem:[#allocation12 + $0x80] sm:$0xf] }
 0x835   : > { %4888 = vmatpush.bf16.msra.mxu0 %v6978_v43  ;;  %v6958_v36 = vor.u32 %v7567_v50, %v6955_v18  ;;  %v7154_v18 = vor.u32 %v7620_v58, %v7153_v54 }
 0x836   : > { %7883 = vpow2.f32 %v6937_v20 }
 0x837   : > { %4932 = vmatpush.bf16.msrb.mxu2 %v6958_v36 }
 0x838   : > { %v4511_v62 = vpop.f32.mrf.mxu3  ;;  %v4539_v37 = vpop.f32.mrf.mxu2 }
 0x839   : > { %v4545_v39 = vadd.f32 %v4511_v62, %v8395_v55  ;;  %v4547_v13 = vadd.f32 %v4539_v37, %v8398_v3  ;;  %v4499_v30 = vpop.f32.mrf.mxu0  ;;  %v6966_v55 = vor.u32 %v7570_v6, %v6963_v26  ;;  %v7573_v3 = vld [vmem:[#allocation11 + $0x34] sm:$0xf0]  ;;  %4889 = vmatpush.bf16.msra.mxu0 %v6962_v11 }
 0x83a   : > { %v4548_v10 = vadd.f32 %v4499_v30, %v8401_v9  ;;  %v6970_v9 = vor.u32 %v7573_v3, %v6969_v0  ;;  %v9174_v60 = vpop.f32.mrf.mxu1  ;;  %v7625_v11 = vld [vmem:[#allocation12 + $0xd4] sm:$0xf0]  ;;  %v7623_v0 = vld [vmem:[#allocation12 + $0xcc] sm:$0xf]  ;;  %v7179_v3 = vld [vmem:[#allocation12 + $0xd8] sm:$0xf0] }
 0x83b   : > { %v6939_v57 = vmul.f32 -1.442695, %v4545_v39  ;;  %v6941_v22 = vmul.f32 -1.442695, %v4547_v13  ;;  %4903 = vmatpush.bf16.msra.mxu3 %v6966_v55  ;;  %v7624_v39 = vld [vmem:[#allocation12 + $0xcc] sm:$0xf0]  ;;  %v4546_v6 = vadd.f32 %v9174_v60, %v9511_v23  ;;  %v7198_v55 = vor.u32 %v7627_v12, %v7195_v17 }
 0x83c   : > { %v7884_v24 = vpop.eup %7883  ;;  %v6938_v56 = vmul.f32 -1.442695, %v4548_v10  ;;  %4917 = vmatpush.bf16.msrb.mxu1 %v6970_v9  ;;  %v7622_v10 = vld [vmem:[#allocation12 + $0xc4] sm:$0xf]  ;;  %v7170_v60 = vor.u32 %v7624_v39, %v7169_v27  ;;  %v7182_v49 = vor.u32 %v7623_v0, %v7179_v3  ;;  %v7617_v12 = vld [vmem:[#allocation12 + $0x94] sm:$0xf0] }
 0x83d   : > { %v9172_v45 = vadd.f32 1.0, %v7884_v24  ;;  %7885 = vpow2.f32 %v6939_v57  ;;  %4890 = vmatpush.bf16.msra.mxu0 %v6946_v47  ;;  %v7174_v59 = vor.u32 %v7622_v10, %v7171_v7  ;;  %5176 = vmatpush.bf16.msra.mxu2 %v7198_v55  ;;  %v4668_v3 = vld [vmem:[#allocation3 + $0x8] sm:$0xff] }
 0x83e   : > { %7887 = vpow2.f32 %v6941_v22  ;;  %v7177_v22 = vld [vmem:[#allocation12 + $0xc8] sm:$0xf] }
 0x83f   : > { %7889 = vrcp.f32 %v9172_v45  ;;  %4904 = vmatpush.bf16.msra.mxu3 %v6950_v40  ;;  %v4569_v2 = vand.u32 2147483647, %v9172_v45  ;;  %v4571_v37 = vand.u32 2147483648, %v9172_v45  ;;  %vm4565_vm3 = vweird.f32 %v9172_v45 }
 0x840   : > { %7891 = vpow2.f32 %v6938_v56  ;;  %v4513_v42 = vpop.f32.mrf.mxu3  ;;  %v4541_v35 = vpop.f32.mrf.mxu2  ;;  %4918 = vmatpush.bf16.msrb.mxu1 %v6954_v63  ;;  %v7178_v47 = vor.u32 %v7625_v11, %v7177_v22  ;;  %v7158_v40 = vor.u32 %v7618_v34, %v7155_v15  ;;  %v7610_v34 = vld [vmem:[#allocation12 + $0x64] sm:$0xf]  ;;  %v7089_v22 = vld [vmem:[#allocation12 + $0x20] sm:$0xf] }
 0x841   : > { %v4549_v21 = vadd.f32 %v4513_v42, %v8409_v53  ;;  %v4551_v46 = vadd.f32 %v4541_v35, %v9510_v8  ;;  %v7190_v53 = vor.u32 %v7626_v52, %v7187_v28  ;;  %5134 = vmatpush.bf16.msrb.mxu0 %v7186_v5  ;;  %v9200_v24 = vor.u32 1.1754944e-38, %v4571_v37  ;;  %v7161_v52 = vld [vmem:[#allocation12 + $0xa8] sm:$0xf]  ;;  %5177 = vmatpush.bf16.msra.mxu2 %v7182_v49  ;;  %v7121_v49 = vld [vmem:[#allocation12 + $0x60] sm:$0xf] }
 0x842   : > { %v4527_v51 = vpop.f32.mrf.mxu1  ;;  %vm9215_vm5 = vcmp.eq.f32.partialorder %v4569_v2, 8.507059e+37  ;;  %v7616_v2 = vld [vmem:[#allocation12 + $0x8c] sm:$0xf0]  ;;  %v7145_v37 = vld [vmem:[#allocation12 + $0x88] sm:$0xf] }
 0x843   : > { %v7886_v33 = vpop.eup %7885  ;;  %v6940_v20 = vmul.f32 -1.442695, %v4549_v21  ;;  %v6942_v32 = vmul.f32 -1.442695, %v4551_v46  ;;  %5148 = vmatpush.bf16.msrb.mxu3 %v7190_v53  ;;  %v4550_v41 = vadd.f32 %v4527_v51, %v9512_v61  ;;  %v7163_v53 = vld [vmem:[#allocation12 + $0xb8] sm:$0xf0] }
 0x844   : > { %v7888_v25 = vpop.eup %7887  ;;  %v9179_v4 = vadd.f32 1.0, %v7886_v33  ;;  %5162 = vmatpush.bf16.msra.mxu1 %v7194_v19  ;;  %v7621_v33 = vld [vmem:[#allocation12 + $0xb4] sm:$0xf0]  ;;  %v7614_v19 = vld [vmem:[#allocation12 + $0x84] sm:$0xf] }
 0x845   : > { %v9181_v31 = vpop.eup %7889  ;;  %v9183_v43 = vadd.f32 1.0, %v7888_v25  ;;  %7893 = vpow2.f32 %v6940_v20  ;;  %5135 = vmatpush.bf16.msrb.mxu0 %v7170_v60  ;;  %v7619_v25 = vld [vmem:[#allocation12 + $0xac] sm:$0xf]  ;;  %v7147_v51 = vld [vmem:[#allocation12 + $0x98] sm:$0xf0]  ;;  %v7162_v7 = vor.u32 %v7621_v33, %v7161_v52 }
 0x846   : > { %v7892_v29 = vpop.eup %7891  ;;  %v4561_v62 = vmul.f32 %v9181_v31, %v9172_v45  ;;  %7895 = vrcp.f32 %v9179_v4  ;;  %v4609_v30 = vand.u32 2147483648, %v9179_v4  ;;  %v4607_v57 = vand.u32 2147483647, %v9179_v4  ;;  %v7105_v52 = vld [vmem:[#allocation12 + $0x40] sm:$0xf] }
 0x847   : > { %7897 = vrcp.f32 %v9183_v43  ;;  %v9191_v44 = vadd.f32 1.0, %v7892_v29  ;;  %vm4566_vm4 = vweird.f32 %v9181_v31  ;;  %5149 = vmatpush.bf16.msrb.mxu3 %v7174_v59  ;;  %vm4603_vm8 = vweird.f32 %v9179_v4 }
 0x848   : > { %v4562_v13 = vsub.f32 1.0, %v4561_v62  ;;  %7899 = vpow2.f32 %v6942_v32  ;;  %v9207_v42 = vor.u32 1.1754944e-38, %v4609_v30  ;;  %vm9222_vm6 = vcmp.eq.f32.partialorder %v4607_v57, 8.507059e+37  ;;  %5163 = vmatpush.bf16.msra.mxu1 %v7178_v47  ;;  %vm9236_vm7 = vmor %vm4565_vm3, %vm4566_vm4  ;;  %v7139_v62 = vld [vmem:[#allocation12 + $0x90] sm:$0xf0] }
 0x849   : > { %7901 = vrcp.f32 %v9191_v44  ;;  %v4586_v56 = vand.u32 2147483648, %v9191_v44  ;;  %v4584_v50 = vand.u32 2147483647, %v9191_v44  ;;  %vm4580_vm10 = vweird.f32 %v9191_v44  ;;  %5136 = vmatpush.bf16.msrb.mxu0 %v7154_v18  ;;  %v7615_v30 = vld [vmem:[#allocation12 + $0x8c] sm:$0xf] }
 0x84a   : > { %v4563_v26 = vmul.f32 %v9181_v31, %v4562_v13  ;;  %v7166_v23 = vor.u32 %v7619_v25, %v7163_v53  ;;  %v7129_v18 = vld [vmem:[#allocation12 + $0x68] sm:$0xf]  ;;  %v4647_v25 = vand.u32 2147483647, %v9183_v43  ;;  %v7608_v53 = vld [vmem:[#allocation12 + $0x4c] sm:$0xf0]  ;;  %vm4643_vm3 = vweird.f32 %v9183_v43 }
 0x84b   : > { %v7894_v9 = vpop.eup %7893  ;;  %v9226_v1 = vor.u32 1.1754944e-38, %v4586_v56  ;;  %vm9247_vm11 = vcmp.eq.f32.partialorder %v4584_v50, 8.507059e+37  ;;  %5150 = vmatpush.bf16.msrb.mxu3 %v7158_v40  ;;  %v7123_v50 = vld [vmem:[#allocation12 + $0x70] sm:$0xf0]  ;;  %v7613_v40 = vld [vmem:[#allocation12 + $0x74] sm:$0xf0] }
 0x84c   : > { %v9205_v16 = vpop.eup %7895  ;;  %v9209_v35 = vadd.f32 1.0, %v7894_v9  ;;  %v4564_v36 = vadd.f32 %v9181_v31, %v4563_v26  ;;  %v7146_v26 = vor.u32 %v7617_v12, %v7145_v37  ;;  %5164 = vmatpush.bf16.msra.mxu1 %v7162_v7  ;;  %5178 = vmatpush.bf16.msra.mxu2 %v7166_v23  ;;  %v7150_v9 = vor.u32 %v7615_v30, %v7147_v51  ;;  %v7609_v12 = vld [vmem:[#allocation12 + $0x54] sm:$0xf0] }
 0x84d   : > { %v9211_v21 = vpop.eup %7897  ;;  %v4599_v8 = vmul.f32 %v9205_v16, %v9179_v4  ;;  %vm4604_vm9 = vweird.f32 %v9205_v16  ;;  %v7126_v45 = vor.u32 %v7610_v34, %v7123_v50  ;;  %v7130_v37 = vor.u32 %v7613_v40, %v7129_v18  ;;  %v7081_v50 = vld [vmem:[#allocation12 + $0x8] sm:$0xf]  ;;  %v7601_v18 = vld [vmem:[#allocation12 + $0x14] sm:$0xf0]  ;;  %v7599_v40 = vld [vmem:[#allocation12 + $0xc] sm:$0xf] }
 0x84e   : > { %v7900_v63 = vpop.eup %7899  ;;  %7903 = vrcp.f32 %v9209_v35  ;;  %v4639_v17 = vmul.f32 %v9211_v21, %v9183_v43  ;;  %v4624_v39 = vand.u32 2147483648, %v9209_v35  ;;  %v4568_v13 = vsel %vm9236_vm7, %v9181_v31, %v4564_v36  ;;  %vm9264_vm12 = vmor %vm4603_vm8, %vm4604_vm9  ;;  %v7611_v36 = vld [vmem:[#allocation12 + $0x6c] sm:$0xf] }
 0x84f   : > { %v9228_v20 = vpop.eup %7901  ;;  %v4600_v32 = vsub.f32 1.0, %v4599_v8  ;;  %v9230_v5 = vadd.f32 1.0, %v7900_v63  ;;  %7905 = vtanh.f32 %v4546_v6  ;;  %v7138_v6 = vor.u32 %v7616_v2, %v7137_v48  ;;  %v7606_v2 = vld [vmem:[#allocation12 + $0x44] sm:$0xf] }
 0x850   : > { %v4576_v14 = vmul.f32 %v9228_v20, %v9191_v44  ;;  %7907 = vtanh.f32 %v4550_v41  ;;  %vm4581_vm13 = vweird.f32 %v9228_v20  ;;  %v7142_v31 = vor.u32 %v7614_v19, %v7139_v62  ;;  %5165 = vmatpush.bf16.msra.mxu1 %v7146_v26  ;;  %5179 = vmatpush.bf16.msra.mxu2 %v7150_v9  ;;  %v7107_v19 = vld [vmem:[#allocation12 + $0x50] sm:$0xf0]  ;;  %v7603_v9 = vld [vmem:[#allocation12 + $0x2c] sm:$0xf] }
 0x851   : > { %v4601_v29 = vmul.f32 %v9205_v16, %v4600_v32  ;;  %7909 = vrcp.f32 %v9230_v5  ;;  %v4622_v4 = vand.u32 2147483647, %v9209_v35  ;;  %v4640_v41 = vsub.f32 1.0, %v4639_v17  ;;  %5137 = vmatpush.bf16.msrb.mxu0 %v7138_v6  ;;  %vm9290_vm15 = vmor %vm4580_vm10, %vm4581_vm13  ;;  %v7607_v17 = vld [vmem:[#allocation12 + $0x4c] sm:$0xf] }
 0x852   : > { %v4577_v27 = vsub.f32 1.0, %v4576_v14  ;;  %v4573_v60 = vsel %vm9215_vm5, %v9200_v24, %v4568_v13  ;;  %5151 = vmatpush.bf16.msrb.mxu3 %v7142_v31  ;;  %v4625_v47 = vor.u32 1.1754944e-38, %v4624_v39  ;;  %vm4618_vm0 = vweird.f32 %v9209_v35 }
 0x853   : > { %v4602_v10 = vadd.f32 %v9205_v16, %v4601_v29  ;;  %vm9310_vm2 = vcmp.eq.f32.partialorder %v4622_v4, 8.507059e+37  ;;  %v4641_v14 = vmul.f32 %v9211_v21, %v4640_v41  ;;  %v7113_v29 = vld [vmem:[#allocation12 + $0x48] sm:$0xf]  ;;  %v7134_v51 = vor.u32 %v7611_v36, %v7131_v38  ;;  %v7605_v4 = vld [vmem:[#allocation12 + $0x34] sm:$0xf0] }
 0x854   : > { %v9258_v57 = vpop.eup %7903  ;;  %v4578_v11 = vmul.f32 %v9228_v20, %v4577_v27  ;;  %v7115_v27 = vld [vmem:[#allocation12 + $0x58] sm:$0xf0]  ;;  %v4649_v7 = vand.u32 2147483648, %v9183_v43  ;;  %v7106_v23 = vor.u32 %v7608_v53, %v7105_v52  ;;  %v7110_v6 = vor.u32 %v7606_v2, %v7107_v19  ;;  %5166 = vmatpush.bf16.msra.mxu1 %v7130_v37  ;;  %v4939_v43 = vld [vmem:[#allocation4 + $0x8] sm:$0xff]  ;;  %v4713_v37 = vld [vmem:[%s9438_s9] sm:$0xf] }
 0x855   : > { %v7906_v56 = vpop.eup %7905  ;;  %v4614_v55 = vmul.f32 %v9258_v57, %v9209_v35  ;;  %v4606_v0 = vsel %vm9264_vm12, %v9205_v16, %v4602_v10  ;;  %vm4619_vm14 = vweird.f32 %v9258_v57  ;;  %v4669_v35 = vld [vmem:[#allocation3] sm:$0xff]  ;;  %vm4644_vm4 = vweird.f32 %v9211_v21  ;;  %5180 = vmatpush.bf16.msra.mxu2 %v7134_v51 }
 0x856   : > { %v7908_v61 = vpop.eup %7907  ;;  %v4611_v59 = vsel %vm9222_vm6, %v9207_v42, %v4606_v0  ;;  %v4579_v54 = vadd.f32 %v9228_v20, %v4578_v11  ;;  %v7612_v42 = vld [vmem:[#allocation12 + $0x6c] sm:$0xf0]  ;;  %v4672_v63 = vmul.f32 %v7906_v56, %v4573_v60  ;;  %vm9303_vm1 = vmor %vm4618_vm0, %vm4619_vm14  ;;  %5152 = vmatpush.bf16.msrb.mxu3 %v7126_v45  ;;  %v7114_v26 = vor.u32 %v7609_v12, %v7113_v29  ;;  %v7602_v56 = vld [vmem:[#allocation12 + $0x24] sm:$0xf] }
 0x857   : > { %v9283_v58 = vpop.eup %7909  ;;  %v4615_v16 = vsub.f32 1.0, %v4614_v55  ;;  %v4670_v8 = vmul.f32 %v4668_v3, %v4611_v59  ;;  %v7604_v11 = vld [vmem:[#allocation12 + $0x2c] sm:$0xf0]  ;;  %v7091_v55 = vld [vmem:[#allocation12 + $0x30] sm:$0xf0]  ;;  %v4642_v3 = vadd.f32 %v9211_v21, %v4641_v14  ;;  %vm9338_vm6 = vmor %vm4643_vm3, %vm4644_vm4  ;;  %vm4658_vm7 = vweird.f32 %v9230_v5 }
 0x858   : > { %v4654_v15 = vmul.f32 %v9283_v58, %v9230_v5  ;;  %v4583_v46 = vsel %vm9290_vm15, %v9228_v20, %v4579_v54  ;;  %v7097_v0 = vld [vmem:[#allocation12 + $0x28] sm:$0xf]  ;;  %vm4659_vm5 = vweird.f32 %v9283_v58  ;;  %v4662_v60 = vand.u32 2147483647, %v9230_v5  ;;  %5167 = vmatpush.bf16.msra.mxu1 %v7114_v26 }
 0x859   : > { %v4616_v44 = vmul.f32 %v9258_v57, %v4615_v16  ;;  %v4588_v32 = vsel %vm9247_vm11, %v9226_v1, %v4583_v46  ;;  %v9318_v62 = vadd.f32 %v4672_v63, %v4670_v8  ;;  %v7122_v1 = vor.u32 %v7612_v42, %v7121_v49  ;;  %v7073_v49 = vld [vmem:[#allocation12] sm:$0xf]  ;;  %v7600_v42 = vld [vmem:[#allocation12 + $0xc] sm:$0xf0]  ;;  %v7598_v8 = vld [vmem:[#allocation12 + $0x4] sm:$0xf] }
 0x85a   : > { %v4655_v20 = vsub.f32 1.0, %v4654_v15  ;;  %v4673_v30 = vmul.f32 %v7908_v61, %v4588_v32  ;;  %v7099_v61 = vld [vmem:[#allocation12 + $0x38] sm:$0xf0]  ;;  %v4664_v16 = vand.u32 2147483648, %v9230_v5  ;;  %5153 = vmatpush.bf16.msrb.mxu3 %v7110_v6  ;;  %v7094_v24 = vor.u32 %v7602_v56, %v7091_v55  ;;  %v7075_v46 = vld [vmem:[#allocation12 + $0x10] sm:$0xf0]  ;;  %vm9351_vm8 = vmor %vm4658_vm7, %vm4659_vm5 }
 0x85b   : > { %v4617_v48 = vadd.f32 %v9258_v57, %v4616_v44  ;;  %5138 = vmatpush.bf16.msrb.mxu0 %v7122_v1  ;;  %7911 = vtanh.f32 %v9318_v62  ;;  %v7098_v34 = vor.u32 %v7605_v4, %v7097_v0  ;;  %v7102_v15 = vor.u32 %v7603_v9, %v7099_v61  ;;  %v7083_v44 = vld [vmem:[#allocation12 + $0x18] sm:$0xf0] }
 0x85c   : > { %v4656_v39 = vmul.f32 %v9283_v58, %v4655_v20  ;;  %v4646_v63 = vsel %vm9338_vm6, %v9211_v21, %v4642_v3  ;;  %v4650_v36 = vor.u32 1.1754944e-38, %v4649_v7  ;;  %v7074_v5 = vor.u32 %v7600_v42, %v7073_v49 }
 0x85d   : > { %v4621_v13 = vsel %vm9303_vm1, %v9258_v57, %v4617_v48  ;;  %v7118_v57 = vor.u32 %v7607_v17, %v7115_v27  ;;  %v7078_v33 = vor.u32 %v7598_v8, %v7075_v46  ;;  %v4665_v32 = vor.u32 1.1754944e-38, %v4664_v16  ;;  %5168 = vmatpush.bf16.msra.mxu1 %v7098_v34 }
 0x85e   : > { %v4626_v10 = vsel %vm9310_vm2, %v4625_v47, %v4621_v13  ;;  %v4657_v54 = vadd.f32 %v9283_v58, %v4656_v39  ;;  %v7090_v47 = vor.u32 %v7604_v11, %v7089_v22  ;;  %5154 = vmatpush.bf16.msrb.mxu3 %v7094_v24  ;;  %v7082_v21 = vor.u32 %v7601_v18, %v7081_v50 }
 0x85f   : > { %v4671_v31 = vmul.f32 %v4669_v35, %v4626_v10  ;;  %5139 = vmatpush.bf16.msrb.mxu0 %v7106_v23  ;;  %5181 = vmatpush.bf16.msra.mxu2 %v7118_v57  ;;  %v7086_v28 = vor.u32 %v7599_v40, %v7083_v44  ;;  %vm4648_vm9 = vcmp.eq.f32.partialorder %v4647_v25, 8.507059e+37  ;;  %vm4663_vm10 = vcmp.eq.f32.partialorder %v4662_v60, 8.507059e+37  ;;  %v4940_v25 = vld [vmem:[#allocation4] sm:$0xff] }
 0x860   : > { %v4661_v52 = vsel %vm9351_vm8, %v9283_v58, %v4657_v54  ;;  %v4651_v53 = vsel %vm4648_vm9, %v4650_v36, %v4646_v63  ;;  %v4941_v19 = vpack.c.bf16 %v4940_v25, %v4939_v43  ;;  %v4715_v17 = vperm.slane %v4713_v37, 0 }
 0x861   : > { %v9330_v41 = vadd.f32 %v4673_v30, %v4671_v31  ;;  %v7912_v20 = vpop.eup %7911  ;;  %v4666_v14 = vsel %vm4663_vm10, %v4665_v32, %v4661_v52  ;;  %5169 = vmatpush.bf16.msra.mxu1 %v7082_v21  ;;  %v4716_v10 = vperm.slane %v4713_v37, 1  ;;  %v4718_v23 = vperm.slane %v4713_v37, 3 }
 0x862   : > { %v9360_v48 = vmul.f32 %v7912_v20, %v4651_v53  ;;  %5155 = vmatpush.bf16.msrb.mxu3 %v7078_v33  ;;  %v4717_v38 = vperm.slane %v4713_v37, 2 }
 0x863   : > { %7913 = vtanh.f32 %v9330_v41  ;;  %5140 = vmatpush.bf16.msrb.mxu0 %v7090_v47  ;;  %5182 = vmatpush.bf16.msra.mxu2 %v7102_v15 }
 0x867   : > { %5141 = vmatpush.bf16.msrb.mxu0 %v7074_v5  ;;  %5183 = vmatpush.bf16.msra.mxu2 %v7086_v28 }
 0x869   : > { %v7914_v35 = vpop.eup %7913 }
 0x86a   : > { %v9362_v58 = vmul.f32 %v7914_v35, %v4666_v14 }
 0x86c   : > { %v4680_v2 = vpack.c.bf16 %v9362_v58, %v9360_v48 }
 0x86e   : > { %4891 = vmatmul.bf16.vlgmr.msra.gmra.mxu0 %v4680_v2  ;;  %4905 = vmatmul.bf16.vlgmr.msra.gmra.mxu3 %v4680_v2 }
 0x86f   : > { %4919 = vmatmul.bf16.vlgmr.msrb.gmra.mxu1 %v4680_v2  ;;  %4933 = vmatmul.bf16.vlgmr.msrb.gmra.mxu2 %v4680_v2 }
 0x87e   : > { %5142 = vmatmul.bf16.vlgmr.msrb.gmra.mxu0 %v4941_v19  ;;  %5156 = vmatmul.bf16.vlgmr.msrb.gmra.mxu3 %v4941_v19 }
 0x87f   : > { %5170 = vmatmul.bf16.vlgmr.msra.gmra.mxu1 %v4941_v19  ;;  %5184 = vmatmul.bf16.vlgmr.msra.gmra.mxu2 %v4941_v19 }
 0x8eb   : > { %v4892_v29 = vpop.f32.mrf.mxu0 }
 0x8ec   : > { %v4920_v27 = vpop.f32.mrf.mxu1  ;;  %v4893_v13 = vadd.f32 %v4892_v29, %v4715_v17 }
 0x8ed   : > { %v4921_v20 = vadd.f32 %v4920_v27, %v4717_v38 }
 0x8f1   : > { %v4906_v1 = vpop.f32.mrf.mxu3 }
 0x8f2   : > { %v4934_v45 = vpop.f32.mrf.mxu2  ;;  %v4907_v22 = vadd.f32 %v4906_v1, %v4716_v10 }
 0x8f3   : > { %v4894_v12 = vpop.f32.mrf.mxu0  ;;  %v4935_v31 = vadd.f32 %v4934_v45, %v4718_v23 }
 0x8f4   : > { %v4922_v11 = vpop.f32.mrf.mxu1  ;;  %v4895_v57 = vadd.f32 %v4894_v12, %v4715_v17 }
 0x8f5   : > { %v4923_v53 = vadd.f32 %v4922_v11, %v4717_v38 }
 0x8f9   : > { %v4908_v39 = vpop.f32.mrf.mxu3 }
 0x8fa   : > { %v4936_v30 = vpop.f32.mrf.mxu2  ;;  %v4909_v16 = vadd.f32 %v4908_v39, %v4716_v10 }
 0x8fb   : > { %v5143_v51 = vpop.f32.mrf.mxu0  ;;  %v4937_v47 = vadd.f32 %v4936_v30, %v4718_v23 }
 0x8fc   : > { %v5190_v7 = vadd.f32 %v5143_v51, %v4893_v13  ;;  %v5171_v49 = vpop.f32.mrf.mxu1 }
 0x8fd   : > { %v5192_v14 = vadd.f32 %v5171_v49, %v4921_v20 }
 0x8fe   : > { %v7199_v6 = vmul.f32 -1.442695, %v5190_v7 }
 0x900   : > { %7915 = vpow2.f32 %v7199_v6 }
 0x901   : > { %v5157_v26 = vpop.f32.mrf.mxu3 }
 0x902   : > { %v5191_v56 = vadd.f32 %v5157_v26, %v4907_v22  ;;  %v5185_v55 = vpop.f32.mrf.mxu2 }
 0x903   : > { %v5193_v0 = vadd.f32 %v5185_v55, %v4935_v31  ;;  %v5145_v3 = vpop.f32.mrf.mxu0 }
 0x904   : > { %v7201_v4 = vmul.f32 -1.442695, %v5191_v56  ;;  %v5194_v9 = vadd.f32 %v5145_v3, %v4895_v57  ;;  %v5173_v28 = vpop.f32.mrf.mxu1  ;;  %v5314_v56 = vld [vmem:[#allocation5] sm:$0xff] }
 0x905   : > { %v7203_v61 = vmul.f32 -1.442695, %v5193_v0  ;;  %v5196_v45 = vadd.f32 %v5173_v28, %v4923_v53 }
 0x906   : > { %v7916_v60 = vpop.eup %7915  ;;  %7917 = vpow2.f32 %v7201_v4  ;;  %v7200_v59 = vmul.f32 -1.442695, %v5194_v9 }
 0x907   : > { %v5204_v54 = vadd.f32 1.0, %v7916_v60  ;;  %7919 = vpow2.f32 %v7203_v61 }
 0x908   : > { %7921 = vpow2.f32 %v7200_v59 }
 0x909   : > { %7923 = vrcp.f32 %v5204_v54  ;;  %v5159_v24 = vpop.f32.mrf.mxu3  ;;  %v5217_v29 = vand.u32 2147483648, %v5204_v54  ;;  %vm5211_vm12 = vweird.f32 %v5204_v54  ;;  %v5215_v12 = vand.u32 2147483647, %v5204_v54 }
 0x90a   : > { %v5195_v42 = vadd.f32 %v5159_v24, %v4909_v16  ;;  %v5187_v34 = vpop.f32.mrf.mxu2 }
 0x90b   : > { %v5197_v15 = vadd.f32 %v5187_v34, %v4937_v47  ;;  %v5218_v23 = vor.u32 1.1754944e-38, %v5217_v29  ;;  %vm5216_vm15 = vcmp.eq.f32.partialorder %v5215_v12, 8.507059e+37 }
 0x90c   : > { %v7918_v8 = vpop.eup %7917  ;;  %v7202_v46 = vmul.f32 -1.442695, %v5195_v42 }
 0x90d   : > { %v7920_v50 = vpop.eup %7919  ;;  %v5242_v18 = vadd.f32 1.0, %v7918_v8  ;;  %v7204_v63 = vmul.f32 -1.442695, %v5197_v15 }
 0x90e   : > { %v7922_v40 = vpop.eup %7921  ;;  %v9370_v44 = vadd.f32 1.0, %v7920_v50  ;;  %7925 = vpow2.f32 %v7202_v46 }
 0x90f   : > { %v7924_v36 = vpop.eup %7923  ;;  %7927 = vrcp.f32 %v5242_v18  ;;  %v9373_v33 = vadd.f32 1.0, %v7922_v40  ;;  %v5253_v39 = vand.u32 2147483647, %v5242_v18  ;;  %v5255_v13 = vand.u32 2147483648, %v5242_v18 }
 0x910   : > { %v5207_v52 = vmul.f32 %v7924_v36, %v5204_v54  ;;  %7929 = vrcp.f32 %v9370_v44  ;;  %vm5212_vm11 = vweird.f32 %v7924_v36  ;;  %vm5249_vm0 = vweird.f32 %v5242_v18 }
 0x911   : > { %7931 = vpow2.f32 %v7204_v63  ;;  %vm9383_vm13 = vmor %vm5211_vm12, %vm5212_vm11  ;;  %vm5254_vm2 = vcmp.eq.f32.partialorder %v5253_v39, 8.507059e+37  ;;  %v5256_v57 = vor.u32 1.1754944e-38, %v5255_v13  ;;  %vm5289_vm3 = vweird.f32 %v9370_v44 }
 0x912   : > { %v5208_v5 = vsub.f32 1.0, %v5207_v52  ;;  %7933 = vrcp.f32 %v9373_v33  ;;  %v5295_v3 = vand.u32 2147483648, %v9370_v44  ;;  %v5232_v4 = vand.u32 2147483648, %v9373_v33 }
 0x913   : > { %v5230_v24 = vand.u32 2147483647, %v9373_v33  ;;  %vm5226_vm6 = vweird.f32 %v9373_v33 }
 0x914   : > { %v7926_v32 = vpop.eup %7925  ;;  %v5209_v21 = vmul.f32 %v7924_v36, %v5208_v5  ;;  %v5293_v5 = vand.u32 2147483647, %v9370_v44 }
 0x915   : > { %v7928_v35 = vpop.eup %7927  ;;  %v9376_v2 = vadd.f32 1.0, %v7926_v32  ;;  %vm5231_vm9 = vcmp.eq.f32.partialorder %v5230_v24, 8.507059e+37  ;;  %v5315_v32 = vld [vmem:[#allocation5 + $0x8] sm:$0xff] }
 0x916   : > { %v9378_v43 = vpop.eup %7929  ;;  %v5210_v25 = vadd.f32 %v7924_v36, %v5209_v21  ;;  %v5245_v19 = vmul.f32 %v7928_v35, %v5242_v18  ;;  %vm5250_vm14 = vweird.f32 %v7928_v35 }
 0x917   : > { %v5285_v1 = vmul.f32 %v9378_v43, %v9370_v44  ;;  %7935 = vrcp.f32 %v9376_v2  ;;  %v7932_v37 = vpop.eup %7931  ;;  %vm5251_vm1 = vmor %vm5249_vm0, %vm5250_vm14  ;;  %vm5290_vm5 = vweird.f32 %v9378_v43  ;;  %v5270_v15 = vand.u32 2147483648, %v9376_v2 }
 0x918   : > { %v5246_v17 = vsub.f32 1.0, %v5245_v19  ;;  %7937 = vtanh.f32 %v5192_v14  ;;  %v9387_v30 = vadd.f32 1.0, %v7932_v37  ;;  %v7934_v51 = vpop.eup %7933  ;;  %v5214_v10 = vsel %vm9383_vm13, %v7924_v36, %v5210_v25  ;;  %vm5291_vm12 = vmor %vm5289_vm3, %vm5290_vm5 }
 0x919   : > { %v5286_v6 = vsub.f32 1.0, %v5285_v1  ;;  %v5222_v22 = vmul.f32 %v7934_v51, %v9373_v33  ;;  %7939 = vtanh.f32 %v5196_v45  ;;  %v5219_v26 = vsel %vm5216_vm15, %v5218_v23, %v5214_v10 }
 0x91a   : > { %v5247_v7 = vmul.f32 %v7928_v35, %v5246_v17  ;;  %7941 = vrcp.f32 %v9387_v30  ;;  %vm5227_vm4 = vweird.f32 %v7934_v51  ;;  %v5268_v18 = vand.u32 2147483647, %v9376_v2 }
 0x91b   : > { %v5223_v55 = vsub.f32 1.0, %v5222_v22  ;;  %v5287_v59 = vmul.f32 %v9378_v43, %v5286_v6  ;;  %vm5228_vm7 = vmor %vm5226_vm6, %vm5227_vm4  ;;  %v5233_v36 = vor.u32 1.1754944e-38, %v5232_v4  ;;  %vm5264_vm10 = vweird.f32 %v9376_v2 }
 0x91c   : > { %v5248_v11 = vadd.f32 %v7928_v35, %v5247_v7  ;;  %v5271_v20 = vor.u32 1.1754944e-38, %v5270_v15  ;;  %vm5269_vm13 = vcmp.eq.f32.partialorder %v5268_v18, 8.507059e+37  ;;  %v5296_v25 = vor.u32 1.1754944e-38, %v5295_v3 }
 0x91d   : > { %v7936_v31 = vpop.eup %7935  ;;  %v5224_v54 = vmul.f32 %v7934_v51, %v5223_v55  ;;  %v5288_v40 = vadd.f32 %v9378_v43, %v5287_v59  ;;  %vm5294_vm14 = vcmp.eq.f32.partialorder %v5293_v5, 8.507059e+37  ;;  %v5310_v44 = vand.u32 2147483648, %v9387_v30 }
 0x91e   : > { %v5252_v0 = vsel %vm5251_vm1, %v7928_v35, %v5248_v11  ;;  %v5260_v9 = vmul.f32 %v7936_v31, %v9376_v2  ;;  %v7938_v61 = vpop.eup %7937  ;;  %vm5265_vm8 = vweird.f32 %v7936_v31  ;;  %vm5304_vm0 = vweird.f32 %v9387_v30 }
 0x91f   : > { %v5257_v60 = vsel %vm5254_vm2, %v5256_v57, %v5252_v0  ;;  %v5318_v16 = vmul.f32 %v7938_v61, %v5219_v26  ;;  %v7940_v42 = vpop.eup %7939  ;;  %v5225_v34 = vadd.f32 %v7934_v51, %v5224_v54  ;;  %vm5266_vm11 = vmor %vm5264_vm10, %vm5265_vm8  ;;  %v5292_v35 = vsel %vm5291_vm12, %v9378_v43, %v5288_v40 }
 0x920   : > { %v5316_v47 = vmul.f32 %v5314_v56, %v5257_v60  ;;  %v5261_v49 = vsub.f32 1.0, %v5260_v9  ;;  %v7942_v8 = vpop.eup %7941  ;;  %v5297_v1 = vsel %vm5294_vm14, %v5296_v25, %v5292_v35  ;;  %v5308_v17 = vand.u32 2147483647, %v9387_v30 }
 0x921   : > { %v5229_v63 = vsel %vm5228_vm7, %v7934_v51, %v5225_v34  ;;  %v5300_v38 = vmul.f32 %v7942_v8, %v9387_v30  ;;  %vm5305_vm15 = vweird.f32 %v7942_v8  ;;  %v5311_v27 = vor.u32 1.1754944e-38, %v5310_v44 }
 0x922   : > { %v5320_v46 = vadd.f32 %v5318_v16, %v5316_v47  ;;  %v5262_v50 = vmul.f32 %v7936_v31, %v5261_v49  ;;  %v5234_v33 = vsel %vm5231_vm9, %v5233_v36, %v5229_v63  ;;  %vm5306_vm1 = vmor %vm5304_vm0, %vm5305_vm15  ;;  %vm5309_vm2 = vcmp.eq.f32.partialorder %v5308_v17, 8.507059e+37 }
 0x923   : > { %v5301_v21 = vsub.f32 1.0, %v5300_v38  ;;  %v5319_v2 = vmul.f32 %v7940_v42, %v5234_v33 }
 0x924   : > { %7943 = vtanh.f32 %v5320_v46  ;;  %v5263_v52 = vadd.f32 %v7936_v31, %v5262_v50 }
 0x925   : > { %v5302_v14 = vmul.f32 %v7942_v8, %v5301_v21 }
 0x926   : > { %v5267_v28 = vsel %vm5266_vm11, %v7936_v31, %v5263_v52 }
 0x927   : > { %v5272_v53 = vsel %vm5269_vm13, %v5271_v20, %v5267_v28  ;;  %v5303_v12 = vadd.f32 %v7942_v8, %v5302_v14 }
 0x928   : > { %v5317_v19 = vmul.f32 %v5315_v32, %v5272_v53 }
 0x929   : > { %v5307_v43 = vsel %vm5306_vm1, %v7942_v8, %v5303_v12 }
 0x92a   : > { %v7944_v29 = vpop.eup %7943  ;;  %v5321_v45 = vadd.f32 %v5319_v2, %v5317_v19  ;;  %v5312_v13 = vsel %vm5309_vm2, %v5311_v27, %v5307_v43 }
 0x92b   : > { %v5324_v37 = vmul.f32 %v7944_v29, %v5297_v1 }
 0x92c   : > { %7945 = vtanh.f32 %v5321_v45 }
 0x92f   : > { %5330 = sbr.rel (%p7205_p11) target bundleno = 2364 (0x93c), region = 96 }
 0x932   : > { %v7946_v39 = vpop.eup %7945 }
 0x933   : > { %v5325_v51 = vmul.f32 %v7946_v39, %v5312_v13 }
 0x934   : > { %5331 = vst [vmem:[#allocation2] sm:$0xff] %v9360_v48 }
 0x935   : > { %5332 = vst [vmem:[#allocation2 + $0x8] sm:$0xff] %v9362_v58 }
 0x936   : > { %5333 = vst [vmem:[#allocation3 + $0x8] sm:$0xff] %v9318_v62 }
 0x937   : > { %5334 = vst [vmem:[#allocation3] sm:$0xff] %v9330_v41 }
 0x938   : > { %5335 = vst [vmem:[#allocation4 + $0x8] sm:$0xff] %v5324_v37 }
 0x939   : > { %5336 = vst [vmem:[#allocation4] sm:$0xff] %v5325_v51 }
 0x93a   : > { %5337 = vst [vmem:[#allocation5] sm:$0xff] %v5320_v46 }
 0x93b   : > { %5338 = vst [vmem:[#allocation5 + $0x8] sm:$0xff] %v5321_v45 }
 0x93c PF: > { %p7206_p12 = scmp.ne.s32.totalorder %s8190_s14, 1 }
 0x93e   : > { %5342 = sbr.rel (%p7206_p12) target bundleno = 2374 (0x946), region = 100 }
 0x943   : > { %v5343_v30 = vld [vmem:[#allocation4 + $0x8] sm:$0xff]  ;;  %v5344_v10 = vld [vmem:[#allocation4] sm:$0xff] }
 0x944   : > { %5345 = vst [vmem:[#allocation14] sm:$0xff] %v5343_v30 }
 0x945   : > { %5346 = vst [vmem:[#allocation14 + $0x8] sm:$0xff] %v5344_v10 }
 0x946 PF: > { %p7671_p13 = scmp.eq.s32.totalorder %s8190_s14, 1  ;;  %s8126_s17 = smov [#allocation14]  }
 0x947   : > { %s5352_s30 = sshll.u32 %s8126_s17, 4  ;;  %s5354_s15 = sshll.u32 %s9439_s10, 4  ;;  %s5353_s30 = int_to_ptr.vmem [resolvable:$true] %s5352_s30  ;;  %s5355_s15 = int_to_ptr.hbm [resolvable:$true] %s5354_s15 }
 0x948   : > { %s8127_s16 = smov 128   ;;  %s8128_s19 = smov 8  }
 0x949   : > { %7647 = dma.vmem_to_hbm [thread:$0]  (%p7671_p13), %s5353_s30, 256, %s5355_s15, [#allocation8], %s8127_s16, %s8127_s16, %s8128_s19  }
 0x94a   : > { %8112 = dma.done.wait (%p7671_p13), [#allocation8], 256  }
 0x94b   : > { %8114 = vsyncadd (%p7671_p13), [#allocation8], 4294967040 }
 0x94c PF: > { %s24_s13 = sadd.s32 1, %s8117_s13  }
 0x94d   : > { %p21_p0 = scmp.ge.s32.totalorder %s24_s13, 4  }
 0x94f   :  { %23 = sbr.rel (!%p21_p0) target bundleno = 4 (0x4), region = 131 }
 0x954   :  { %5371 = vsyncpa [#allocation7], 1 }
 0x955   :  { %5373 = vsyncpa [#allocation7 + $0x1], 1 }
 0x956   :  { %5374 = vsyncpa [#allocation10], 1 }
 0x957   :  { %5375 = vsyncpa [#allocation13], 1 }
 0x958   :  { %5376 = vsyncpa [#allocation8], 1 }
 0x959   :  { %5378 = vsyncpa [#allocation8 + $0x1], 1 }

</bundles_post_ra>
